<compile_context>
chip_gen: v5e
topology: v5e:2x2
jax: 0.10.0
libtpu: 0.0.40
codegen_flags: <defaults>
</compile_context>

<pallas_src>
import functools

import jax
import jax.numpy as jnp
from jax import lax
from jax.experimental import pallas as pl
from jax.experimental.pallas import tpu as pltpu


# --------------------------- Fused LSTM(2) + FC kernel ---------------------------
def fused_lstm_fc_kernel(x_ref, w_ih0_ref, w_hh0_ref, b0_ref,
                         w_l1_ref, b1_ref, w_fc_ref, b_fc_ref,
                         out_ref, *, seq_len, batch_p, hidden_size):
    """Fused 2-layer LSTM (zero init state, PyTorch gate order i,f,g,o) + Linear head.

    x_ref:     (T*Bp, E)  bf16  time-major flattened embedded input (row r = t*Bp + b)
    w_ih0:     (E, 4H)    bf16  weight_ih_l0^T
    w_hh0:     (H, 4H)    bf16  weight_hh_l0^T
    b0:        (1, 4H)    f32   b_ih_l0 + b_hh_l0
    w_l1:      (2H, 4H)   bf16  [weight_ih_l1^T ; weight_hh_l1^T] stacked on axis 0
    b1:        (1, 4H)    f32   b_ih_l1 + b_hh_l1
    w_fc:      (1, H)     f32   fc weight (used on the VPU, not the MXU)
    b_fc:      (1, 1)     f32
    out_ref:   (Bp, 1)    f32   logits (padded batch rows are garbage, sliced off outside)
    """
    T, Bp, H = seq_len, batch_p, hidden_size
    f32 = jnp.float32
    bf16 = jnp.bfloat16

    # Hoisted layer-0 input projection for the whole (padded) sequence: one big
    # (T*Bp, E) x (E, 4H) MXU matmul off the serial chain, bias folded in.
    xw0 = (jnp.dot(x_ref[...], w_ih0_ref[...], preferred_element_type=f32)
           + b0_ref[...])                                        # (T*Bp, 4H) f32

    w_hh0 = w_hh0_ref[...]                                       # (H, 4H)  bf16
    w_l1 = w_l1_ref[...]                                         # (2H, 4H) bf16
    b1 = b1_ref[...]                                             # (1, 4H)  f32

    def cell(gates, c):
        # gates: (Bp, 4H) f32, PyTorch order i, f, g, o. All elementwise math in f32.
        i = jax.nn.sigmoid(gates[:, 0 * H:1 * H])
        f = jax.nn.sigmoid(gates[:, 1 * H:2 * H])
        g = jnp.tanh(gates[:, 2 * H:3 * H])
        o = jax.nn.sigmoid(gates[:, 3 * H:4 * H])
        c_new = f * c + i * g
        h_new = o * jnp.tanh(c_new)
        return h_new, c_new

    zeros = jnp.zeros((Bp, H), f32)
    h0, c0 = zeros, zeros
    h1, c1 = zeros, zeros

    # Wavefront across layers, fully unrolled (T is small & static): iteration k
    # runs layer-0 step k and layer-1 step k-1; both depend only on h0_{k-1}, so
    # their matmuls are independent and can overlap in the MXU.
    for k in range(T + 1):
        h0_b = h0.astype(bf16)                                   # one cast, reused

        if k >= 1:
            # Layer-1 step k-1: single K=2H=256 stacked matmul.
            inp1 = jnp.concatenate([h0_b, h1.astype(bf16)], axis=1)   # (Bp, 2H)
            gates1 = jnp.dot(inp1, w_l1, preferred_element_type=f32) + b1

        if k < T:
            xk = xw0[k * Bp:(k + 1) * Bp, :]                     # static, tile-aligned
            if k == 0:
                # h0 == 0: skip the pointless zero matmul.
                h0, c0 = cell(xk, c0)
            else:
                gates0 = xk + jnp.dot(h0_b, w_hh0, preferred_element_type=f32)
                h0, c0 = cell(gates0, c0)

        if k >= 1:
            h1, c1 = cell(gates1, c1)

    # FC head on h_n[-1] = h1: VPU multiply + lane reduce (avoids a 1-column MXU pass).
    out_ref[...] = (jnp.sum(h1 * w_fc_ref[...], axis=1, keepdims=True)
                    + b_fc_ref[...])


def _fused_forward(x_emb_flat, p, *, seq_len, batch_p, hidden_size):
    vmem = pltpu.MemorySpace.VMEM
    kernel = functools.partial(fused_lstm_fc_kernel, seq_len=seq_len,
                               batch_p=batch_p, hidden_size=hidden_size)
    return pl.pallas_call(
        kernel,
        out_shape=jax.ShapeDtypeStruct((batch_p, 1), jnp.float32),
        in_specs=[pl.BlockSpec(memory_space=vmem)] * 8,
        out_specs=pl.BlockSpec(memory_space=vmem),
    )(x_emb_flat, p["w_ih0"], p["w_hh0"], p["b0"],
      p["w_l1"], p["b1"], p["w_fc"], p["b_fc"])


# ------------------------------ Param preparation --------------------------------
def prepare_params(emb_table, lstm_params, fc_params):
    """Pre-transpose / pre-stack weights, pre-sum biases and cast to bf16 ONCE."""
    assert len(lstm_params) == 2, "kernel is specialized for num_layers=2"
    (w_ih0, w_hh0, b_ih0, b_hh0), (w_ih1, w_hh1, b_ih1, b_hh1) = lstm_params
    w_fc, b_fc = fc_params
    bf16 = jnp.bfloat16
    return {
        "emb":   emb_table.astype(bf16),                              # (V, E)
        "w_ih0": jnp.transpose(w_ih0).astype(bf16),                   # (E, 4H)
        "w_hh0": jnp.transpose(w_hh0).astype(bf16),                   # (H, 4H)
        "b0":    (b_ih0 + b_hh0)[None, :].astype(jnp.float32),        # (1, 4H)
        # Stacked layer-1 weight: rows [0:H] multiply h0_t, rows [H:2H] multiply h1_{t-1}.
        "w_l1":  jnp.concatenate([jnp.transpose(w_ih1),
                                  jnp.transpose(w_hh1)], axis=0).astype(bf16),  # (2H, 4H)
        "b1":    (b_ih1 + b_hh1)[None, :].astype(jnp.float32),        # (1, 4H)
        "w_fc":  w_fc.astype(jnp.float32),                            # (1, H)  VPU head
        "b_fc":  b_fc[None, :].astype(jnp.float32),                   # (1, 1)
    }


# ------------------------------- Full forward ------------------------------------
def spam_classifier_forward(x_tokens, prepared, *, hidden_size):
    """x_tokens: (B, T) int32 -> logits (B, 1) f32."""
    B, T = x_tokens.shape
    Bp = max(8, ((B + 7) // 8) * 8)          # pad batch to the 8-sublane tile
    # Padded rows use token 0 (padding_idx -> zero embedding); they compute harmless
    # garbage that is sliced off below and never mixes across rows.
    x_pad = jnp.pad(x_tokens, ((0, Bp - B), (0, 0)))
    # Embedding gather directly in time-major flat order (row r = t*Bp + b).
    flat_ids = jnp.transpose(x_pad).reshape(-1)                  # (T*Bp,)
    x_emb = jnp.take(prepared["emb"], flat_ids, axis=0)          # (T*Bp, E) bf16
    # TODO(synk): move the embedding gather in-kernel (scalar-prefetched ids + the
    # ~25 KiB table in VMEM) to shave the standalone XLA gather's fixed overhead.
    # TODO(synk): for large B on v7x add a parallel batch grid axis
    # (dimension_semantics=("parallel",)) so both TensorCores are used, and
    # re-derive VMEM usage against its 64 MiB budget.
    out = _fused_forward(x_emb, prepared, seq_len=T, batch_p=Bp,
                         hidden_size=hidden_size)
    return out[:B]


# ------------------------------- Pure-JAX reference ------------------------------
def reference_forward(x_tokens, emb_table, lstm_params, fc_params, hidden_size):
    H = hidden_size
    xe = jnp.take(emb_table, x_tokens, axis=0)                   # (B, T, E)
    seq = jnp.transpose(xe, (1, 0, 2))                           # (T, B, E)
    hn = None
    for (w_ih, w_hh, b_ih, b_hh) in lstm_params:
        B = seq.shape[1]

        def step(carry, x_t):
            h, c = carry
            gates = x_t @ w_ih.T + h @ w_hh.T + b_ih + b_hh
            i = jax.nn.sigmoid(gates[:, 0 * H:1 * H])
            f = jax.nn.sigmoid(gates[:, 1 * H:2 * H])
            g = jnp.tanh(gates[:, 2 * H:3 * H])
            o = jax.nn.sigmoid(gates[:, 3 * H:4 * H])
            c_new = f * c + i * g
            h_new = o * jnp.tanh(c_new)
            return (h_new, c_new), h_new

        init = (jnp.zeros((B, H), jnp.float32), jnp.zeros((B, H), jnp.float32))
        (hn, _cn), seq = lax.scan(step, init, seq)
    w_fc, b_fc = fc_params
    return hn @ w_fc.T + b_fc


# ------------------------------------ Main ----------------------------------------
if __name__ == "__main__":
    # Shapes per the module spec (embed_size = hidden_size = 128, num_layers = 2);
    # small batch/seq for the test.
    vocab_size = 50
    embed_size = 128
    hidden_size = 128
    num_layers = 2
    B, T = 2, 8

    key = jax.random.PRNGKey(0)
    ks = iter(jax.random.split(key, 16))

    # Embedding: N(0,1) like nn.Embedding default; padding_idx=0 row zeroed.
    emb_table = jax.random.normal(next(ks), (vocab_size, embed_size), jnp.float32)
    emb_table = emb_table.at[0].set(0.0)

    def init_lstm_layer(k, input_size, H):
        k1, k2, k3, k4 = jax.random.split(k, 4)
        bound = 1.0 / jnp.sqrt(H)
        w_ih = jax.random.uniform(k1, (4 * H, input_size), jnp.float32, -bound, bound)
        w_hh = jax.random.uniform(k2, (4 * H, H), jnp.float32, -bound, bound)
        b_ih = jax.random.uniform(k3, (4 * H,), jnp.float32, -bound, bound)
        b_hh = jax.random.uniform(k4, (4 * H,), jnp.float32, -bound, bound)
        return w_ih, w_hh, b_ih, b_hh

    lstm_params = []
    for layer in range(num_layers):
        in_size = embed_size if layer == 0 else hidden_size
        lstm_params.append(init_lstm_layer(next(ks), in_size, hidden_size))

    fc_bound = 1.0 / jnp.sqrt(hidden_size)
    w_fc = jax.random.uniform(next(ks), (1, hidden_size), jnp.float32, -fc_bound, fc_bound)
    b_fc = jax.random.uniform(next(ks), (1,), jnp.float32, -fc_bound, fc_bound)

    x = jax.random.randint(next(ks), (B, T), 0, vocab_size, dtype=jnp.int32)

    # Prepare (transpose / stack / bias-sum / bf16-cast) params once, outside forward.
    prepared = prepare_params(emb_table, lstm_params, (w_fc, b_fc))

    fwd = jax.jit(functools.partial(spam_classifier_forward, hidden_size=hidden_size))
    out = fwd(x, prepared)
    out = jax.block_until_ready(out)
    assert out.shape == (B, 1), out.shape

    ref = reference_forward(x, emb_table, lstm_params, (w_fc, b_fc), hidden_size)
    max_err = float(jnp.max(jnp.abs(out - ref)))
    # bf16 matmul operands (f32 accumulation / f32 elementwise) -> looser tolerance
    # than the pure-f32 reference.
    assert jnp.allclose(out, ref, atol=5e-2, rtol=5e-2), (out, ref, max_err)

    print("KERNEL_OK")
</pallas_src>

<mosaic_0001>
module attributes {stable_mosaic.version = 11 : i64} {
  func.func @fused_lstm_fc_kernel(%arg0: memref<64x128xbf16, #tpu.memory_space<vmem>>, %arg1: memref<128x512xbf16, #tpu.memory_space<vmem>>, %arg2: memref<128x512xbf16, #tpu.memory_space<vmem>>, %arg3: memref<1x512xf32, #tpu.memory_space<vmem>>, %arg4: memref<256x512xbf16, #tpu.memory_space<vmem>>, %arg5: memref<1x512xf32, #tpu.memory_space<vmem>>, %arg6: memref<1x128xf32, #tpu.memory_space<vmem>>, %arg7: memref<1x1xf32, #tpu.memory_space<vmem>>, %arg8: memref<8x1xf32, #tpu.memory_space<vmem>>) attributes {dimension_semantics = [], scalar_prefetch = 0 : i64, scratch_operands = 0 : i64, tpu.core_type = #tpu.core_type<tc>} {
    %c0 = arith.constant 0 : index
    %c0_0 = arith.constant 0 : index
    %0 = vector.load %arg0[%c0, %c0_0] : memref<64x128xbf16, #tpu.memory_space<vmem>>, vector<64x128xbf16>
    %c0_1 = arith.constant 0 : index
    %c0_2 = arith.constant 0 : index
    %1 = vector.load %arg1[%c0_1, %c0_2] : memref<128x512xbf16, #tpu.memory_space<vmem>>, vector<128x512xbf16>
    %cst = arith.constant dense<0.000000e+00> : vector<64x512xf32>
    %2 = tpu.matmul %0, %1, %cst {dimension_numbers = #tpu.dot_dimension_numbers<[1], [0], [0], [1], [0, 0, 1, 1], [], []>} : vector<64x128xbf16>, vector<128x512xbf16>, vector<64x512xf32> -> vector<64x512xf32>
    %c0_3 = arith.constant 0 : index
    %c0_4 = arith.constant 0 : index
    %3 = vector.load %arg3[%c0_3, %c0_4] : memref<1x512xf32, #tpu.memory_space<vmem>>, vector<1x512xf32>
    %4 = vector.broadcast %3 : vector<1x512xf32> to vector<64x512xf32>
    %5 = arith.addf %2, %4 : vector<64x512xf32>
    %c0_5 = arith.constant 0 : index
    %c0_6 = arith.constant 0 : index
    %6 = vector.load %arg2[%c0_5, %c0_6] : memref<128x512xbf16, #tpu.memory_space<vmem>>, vector<128x512xbf16>
    %c0_7 = arith.constant 0 : index
    %c0_8 = arith.constant 0 : index
    %7 = vector.load %arg4[%c0_7, %c0_8] : memref<256x512xbf16, #tpu.memory_space<vmem>>, vector<256x512xbf16>
    %c0_9 = arith.constant 0 : index
    %c0_10 = arith.constant 0 : index
    %8 = vector.load %arg5[%c0_9, %c0_10] : memref<1x512xf32, #tpu.memory_space<vmem>>, vector<1x512xf32>
    %cst_11 = arith.constant 0.000000e+00 : f32
    %9 = vector.broadcast %cst_11 : f32 to vector<8x128xf32>
    %10 = vector.extract_strided_slice %5 {offsets = [0, 0], sizes = [8, 512], strides = [1, 1]} : vector<64x512xf32> to vector<8x512xf32>
    %11 = vector.extract_strided_slice %10 {offsets = [0, 0], sizes = [8, 128], strides = [1, 1]} : vector<8x512xf32> to vector<8x128xf32>
    %12 = arith.negf %11 : vector<8x128xf32>
    %13 = math.exp %12 : vector<8x128xf32>
    %cst_12 = arith.constant 1.000000e+00 : f32
    %14 = vector.broadcast %cst_12 : f32 to vector<8x128xf32>
    %15 = arith.addf %14, %13 : vector<8x128xf32>
    %16 = arith.divf %14, %15 : vector<8x128xf32>
    %17 = vector.extract_strided_slice %10 {offsets = [0, 128], sizes = [8, 128], strides = [1, 1]} : vector<8x512xf32> to vector<8x128xf32>
    %18 = arith.negf %17 : vector<8x128xf32>
    %19 = math.exp %18 : vector<8x128xf32>
    %cst_13 = arith.constant 1.000000e+00 : f32
    %20 = vector.broadcast %cst_13 : f32 to vector<8x128xf32>
    %21 = arith.addf %20, %19 : vector<8x128xf32>
    %22 = arith.divf %20, %21 : vector<8x128xf32>
    %23 = vector.extract_strided_slice %10 {offsets = [0, 256], sizes = [8, 128], strides = [1, 1]} : vector<8x512xf32> to vector<8x128xf32>
    %24 = math.tanh %23 : vector<8x128xf32>
    %25 = vector.extract_strided_slice %10 {offsets = [0, 384], sizes = [8, 128], strides = [1, 1]} : vector<8x512xf32> to vector<8x128xf32>
    %26 = arith.negf %25 : vector<8x128xf32>
    %27 = math.exp %26 : vector<8x128xf32>
    %cst_14 = arith.constant 1.000000e+00 : f32
    %28 = vector.broadcast %cst_14 : f32 to vector<8x128xf32>
    %29 = arith.addf %28, %27 : vector<8x128xf32>
    %30 = arith.divf %28, %29 : vector<8x128xf32>
    %31 = arith.mulf %22, %9 : vector<8x128xf32>
    %32 = arith.mulf %16, %24 : vector<8x128xf32>
    %33 = arith.addf %31, %32 : vector<8x128xf32>
    %34 = math.tanh %33 : vector<8x128xf32>
    %35 = arith.mulf %30, %34 : vector<8x128xf32>
    %36 = arith.truncf %35 : vector<8x128xf32> to vector<8x128xbf16>
    %37 = arith.truncf %9 : vector<8x128xf32> to vector<8x128xbf16>
    %38 = tpu.concatenate %36, %37 in 1 : vector<8x128xbf16>, vector<8x128xbf16> -> vector<8x256xbf16>
    %cst_15 = arith.constant dense<0.000000e+00> : vector<8x512xf32>
    %39 = tpu.matmul %38, %7, %cst_15 {dimension_numbers = #tpu.dot_dimension_numbers<[1], [0], [0], [1], [0, 0, 1, 1], [], []>} : vector<8x256xbf16>, vector<256x512xbf16>, vector<8x512xf32> -> vector<8x512xf32>
    %40 = vector.broadcast %8 : vector<1x512xf32> to vector<8x512xf32>
    %41 = arith.addf %39, %40 : vector<8x512xf32>
    %42 = vector.extract_strided_slice %5 {offsets = [8, 0], sizes = [8, 512], strides = [1, 1]} : vector<64x512xf32> to vector<8x512xf32>
    %cst_16 = arith.constant dense<0.000000e+00> : vector<8x512xf32>
    %43 = tpu.matmul %36, %6, %cst_16 {dimension_numbers = #tpu.dot_dimension_numbers<[1], [0], [0], [1], [0, 0, 1, 1], [], []>} : vector<8x128xbf16>, vector<128x512xbf16>, vector<8x512xf32> -> vector<8x512xf32>
    %44 = arith.addf %42, %43 : vector<8x512xf32>
    %45 = vector.extract_strided_slice %44 {offsets = [0, 0], sizes = [8, 128], strides = [1, 1]} : vector<8x512xf32> to vector<8x128xf32>
    %46 = arith.negf %45 : vector<8x128xf32>
    %47 = math.exp %46 : vector<8x128xf32>
    %cst_17 = arith.constant 1.000000e+00 : f32
    %48 = vector.broadcast %cst_17 : f32 to vector<8x128xf32>
    %49 = arith.addf %48, %47 : vector<8x128xf32>
    %50 = arith.divf %48, %49 : vector<8x128xf32>
    %51 = vector.extract_strided_slice %44 {offsets = [0, 128], sizes = [8, 128], strides = [1, 1]} : vector<8x512xf32> to vector<8x128xf32>
    %52 = arith.negf %51 : vector<8x128xf32>
    %53 = math.exp %52 : vector<8x128xf32>
    %cst_18 = arith.constant 1.000000e+00 : f32
    %54 = vector.broadcast %cst_18 : f32 to vector<8x128xf32>
    %55 = arith.addf %54, %53 : vector<8x128xf32>
    %56 = arith.divf %54, %55 : vector<8x128xf32>
    %57 = vector.extract_strided_slice %44 {offsets = [0, 256], sizes = [8, 128], strides = [1, 1]} : vector<8x512xf32> to vector<8x128xf32>
    %58 = math.tanh %57 : vector<8x128xf32>
    %59 = vector.extract_strided_slice %44 {offsets = [0, 384], sizes = [8, 128], strides = [1, 1]} : vector<8x512xf32> to vector<8x128xf32>
    %60 = arith.negf %59 : vector<8x128xf32>
    %61 = math.exp %60 : vector<8x128xf32>
    %cst_19 = arith.constant 1.000000e+00 : f32
    %62 = vector.broadcast %cst_19 : f32 to vector<8x128xf32>
    %63 = arith.addf %62, %61 : vector<8x128xf32>
    %64 = arith.divf %62, %63 : vector<8x128xf32>
    %65 = arith.mulf %56, %33 : vector<8x128xf32>
    %66 = arith.mulf %50, %58 : vector<8x128xf32>
    %67 = arith.addf %65, %66 : vector<8x128xf32>
    %68 = math.tanh %67 : vector<8x128xf32>
    %69 = arith.mulf %64, %68 : vector<8x128xf32>
    %70 = vector.extract_strided_slice %41 {offsets = [0, 0], sizes = [8, 128], strides = [1, 1]} : vector<8x512xf32> to vector<8x128xf32>
    %71 = arith.negf %70 : vector<8x128xf32>
    %72 = math.exp %71 : vector<8x128xf32>
    %cst_20 = arith.constant 1.000000e+00 : f32
    %73 = vector.broadcast %cst_20 : f32 to vector<8x128xf32>
    %74 = arith.addf %73, %72 : vector<8x128xf32>
    %75 = arith.divf %73, %74 : vector<8x128xf32>
    %76 = vector.extract_strided_slice %41 {offsets = [0, 128], sizes = [8, 128], strides = [1, 1]} : vector<8x512xf32> to vector<8x128xf32>
    %77 = arith.negf %76 : vector<8x128xf32>
    %78 = math.exp %77 : vector<8x128xf32>
    %cst_21 = arith.constant 1.000000e+00 : f32
    %79 = vector.broadcast %cst_21 : f32 to vector<8x128xf32>
    %80 = arith.addf %79, %78 : vector<8x128xf32>
    %81 = arith.divf %79, %80 : vector<8x128xf32>
    %82 = vector.extract_strided_slice %41 {offsets = [0, 256], sizes = [8, 128], strides = [1, 1]} : vector<8x512xf32> to vector<8x128xf32>
    %83 = math.tanh %82 : vector<8x128xf32>
    %84 = vector.extract_strided_slice %41 {offsets = [0, 384], sizes = [8, 128], strides = [1, 1]} : vector<8x512xf32> to vector<8x128xf32>
    %85 = arith.negf %84 : vector<8x128xf32>
    %86 = math.exp %85 : vector<8x128xf32>
    %cst_22 = arith.constant 1.000000e+00 : f32
    %87 = vector.broadcast %cst_22 : f32 to vector<8x128xf32>
    %88 = arith.addf %87, %86 : vector<8x128xf32>
    %89 = arith.divf %87, %88 : vector<8x128xf32>
    %90 = arith.mulf %81, %9 : vector<8x128xf32>
    %91 = arith.mulf %75, %83 : vector<8x128xf32>
    %92 = arith.addf %90, %91 : vector<8x128xf32>
    %93 = math.tanh %92 : vector<8x128xf32>
    %94 = arith.mulf %89, %93 : vector<8x128xf32>
    %95 = arith.truncf %69 : vector<8x128xf32> to vector<8x128xbf16>
    %96 = arith.truncf %94 : vector<8x128xf32> to vector<8x128xbf16>
    %97 = tpu.concatenate %95, %96 in 1 : vector<8x128xbf16>, vector<8x128xbf16> -> vector<8x256xbf16>
    %cst_23 = arith.constant dense<0.000000e+00> : vector<8x512xf32>
    %98 = tpu.matmul %97, %7, %cst_23 {dimension_numbers = #tpu.dot_dimension_numbers<[1], [0], [0], [1], [0, 0, 1, 1], [], []>} : vector<8x256xbf16>, vector<256x512xbf16>, vector<8x512xf32> -> vector<8x512xf32>
    %99 = vector.broadcast %8 : vector<1x512xf32> to vector<8x512xf32>
    %100 = arith.addf %98, %99 : vector<8x512xf32>
    %101 = vector.extract_strided_slice %5 {offsets = [16, 0], sizes = [8, 512], strides = [1, 1]} : vector<64x512xf32> to vector<8x512xf32>
    %cst_24 = arith.constant dense<0.000000e+00> : vector<8x512xf32>
    %102 = tpu.matmul %95, %6, %cst_24 {dimension_numbers = #tpu.dot_dimension_numbers<[1], [0], [0], [1], [0, 0, 1, 1], [], []>} : vector<8x128xbf16>, vector<128x512xbf16>, vector<8x512xf32> -> vector<8x512xf32>
    %103 = arith.addf %101, %102 : vector<8x512xf32>
    %104 = vector.extract_strided_slice %103 {offsets = [0, 0], sizes = [8, 128], strides = [1, 1]} : vector<8x512xf32> to vector<8x128xf32>
    %105 = arith.negf %104 : vector<8x128xf32>
    %106 = math.exp %105 : vector<8x128xf32>
    %cst_25 = arith.constant 1.000000e+00 : f32
    %107 = vector.broadcast %cst_25 : f32 to vector<8x128xf32>
    %108 = arith.addf %107, %106 : vector<8x128xf32>
    %109 = arith.divf %107, %108 : vector<8x128xf32>
    %110 = vector.extract_strided_slice %103 {offsets = [0, 128], sizes = [8, 128], strides = [1, 1]} : vector<8x512xf32> to vector<8x128xf32>
    %111 = arith.negf %110 : vector<8x128xf32>
    %112 = math.exp %111 : vector<8x128xf32>
    %cst_26 = arith.constant 1.000000e+00 : f32
    %113 = vector.broadcast %cst_26 : f32 to vector<8x128xf32>
    %114 = arith.addf %113, %112 : vector<8x128xf32>
    %115 = arith.divf %113, %114 : vector<8x128xf32>
    %116 = vector.extract_strided_slice %103 {offsets = [0, 256], sizes = [8, 128], strides = [1, 1]} : vector<8x512xf32> to vector<8x128xf32>
    %117 = math.tanh %116 : vector<8x128xf32>
    %118 = vector.extract_strided_slice %103 {offsets = [0, 384], sizes = [8, 128], strides = [1, 1]} : vector<8x512xf32> to vector<8x128xf32>
    %119 = arith.negf %118 : vector<8x128xf32>
    %120 = math.exp %119 : vector<8x128xf32>
    %cst_27 = arith.constant 1.000000e+00 : f32
    %121 = vector.broadcast %cst_27 : f32 to vector<8x128xf32>
    %122 = arith.addf %121, %120 : vector<8x128xf32>
    %123 = arith.divf %121, %122 : vector<8x128xf32>
    %124 = arith.mulf %115, %67 : vector<8x128xf32>
    %125 = arith.mulf %109, %117 : vector<8x128xf32>
    %126 = arith.addf %124, %125 : vector<8x128xf32>
    %127 = math.tanh %126 : vector<8x128xf32>
    %128 = arith.mulf %123, %127 : vector<8x128xf32>
    %129 = vector.extract_strided_slice %100 {offsets = [0, 0], sizes = [8, 128], strides = [1, 1]} : vector<8x512xf32> to vector<8x128xf32>
    %130 = arith.negf %129 : vector<8x128xf32>
    %131 = math.exp %130 : vector<8x128xf32>
    %cst_28 = arith.constant 1.000000e+00 : f32
    %132 = vector.broadcast %cst_28 : f32 to vector<8x128xf32>
    %133 = arith.addf %132, %131 : vector<8x128xf32>
    %134 = arith.divf %132, %133 : vector<8x128xf32>
    %135 = vector.extract_strided_slice %100 {offsets = [0, 128], sizes = [8, 128], strides = [1, 1]} : vector<8x512xf32> to vector<8x128xf32>
    %136 = arith.negf %135 : vector<8x128xf32>
    %137 = math.exp %136 : vector<8x128xf32>
    %cst_29 = arith.constant 1.000000e+00 : f32
    %138 = vector.broadcast %cst_29 : f32 to vector<8x128xf32>
    %139 = arith.addf %138, %137 : vector<8x128xf32>
    %140 = arith.divf %138, %139 : vector<8x128xf32>
    %141 = vector.extract_strided_slice %100 {offsets = [0, 256], sizes = [8, 128], strides = [1, 1]} : vector<8x512xf32> to vector<8x128xf32>
    %142 = math.tanh %141 : vector<8x128xf32>
    %143 = vector.extract_strided_slice %100 {offsets = [0, 384], sizes = [8, 128], strides = [1, 1]} : vector<8x512xf32> to vector<8x128xf32>
    %144 = arith.negf %143 : vector<8x128xf32>
    %145 = math.exp %144 : vector<8x128xf32>
    %cst_30 = arith.constant 1.000000e+00 : f32
    %146 = vector.broadcast %cst_30 : f32 to vector<8x128xf32>
    %147 = arith.addf %146, %145 : vector<8x128xf32>
    %148 = arith.divf %146, %147 : vector<8x128xf32>
    %149 = arith.mulf %140, %92 : vector<8x128xf32>
    %150 = arith.mulf %134, %142 : vector<8x128xf32>
    %151 = arith.addf %149, %150 : vector<8x128xf32>
    %152 = math.tanh %151 : vector<8x128xf32>
    %153 = arith.mulf %148, %152 : vector<8x128xf32>
    %154 = arith.truncf %128 : vector<8x128xf32> to vector<8x128xbf16>
    %155 = arith.truncf %153 : vector<8x128xf32> to vector<8x128xbf16>
    %156 = tpu.concatenate %154, %155 in 1 : vector<8x128xbf16>, vector<8x128xbf16> -> vector<8x256xbf16>
    %cst_31 = arith.constant dense<0.000000e+00> : vector<8x512xf32>
    %157 = tpu.matmul %156, %7, %cst_31 {dimension_numbers = #tpu.dot_dimension_numbers<[1], [0], [0], [1], [0, 0, 1, 1], [], []>} : vector<8x256xbf16>, vector<256x512xbf16>, vector<8x512xf32> -> vector<8x512xf32>
    %158 = vector.broadcast %8 : vector<1x512xf32> to vector<8x512xf32>
    %159 = arith.addf %157, %158 : vector<8x512xf32>
    %160 = vector.extract_strided_slice %5 {offsets = [24, 0], sizes = [8, 512], strides = [1, 1]} : vector<64x512xf32> to vector<8x512xf32>
    %cst_32 = arith.constant dense<0.000000e+00> : vector<8x512xf32>
    %161 = tpu.matmul %154, %6, %cst_32 {dimension_numbers = #tpu.dot_dimension_numbers<[1], [0], [0], [1], [0, 0, 1, 1], [], []>} : vector<8x128xbf16>, vector<128x512xbf16>, vector<8x512xf32> -> vector<8x512xf32>
    %162 = arith.addf %160, %161 : vector<8x512xf32>
    %163 = vector.extract_strided_slice %162 {offsets = [0, 0], sizes = [8, 128], strides = [1, 1]} : vector<8x512xf32> to vector<8x128xf32>
    %164 = arith.negf %163 : vector<8x128xf32>
    %165 = math.exp %164 : vector<8x128xf32>
    %cst_33 = arith.constant 1.000000e+00 : f32
    %166 = vector.broadcast %cst_33 : f32 to vector<8x128xf32>
    %167 = arith.addf %166, %165 : vector<8x128xf32>
    %168 = arith.divf %166, %167 : vector<8x128xf32>
    %169 = vector.extract_strided_slice %162 {offsets = [0, 128], sizes = [8, 128], strides = [1, 1]} : vector<8x512xf32> to vector<8x128xf32>
    %170 = arith.negf %169 : vector<8x128xf32>
    %171 = math.exp %170 : vector<8x128xf32>
    %cst_34 = arith.constant 1.000000e+00 : f32
    %172 = vector.broadcast %cst_34 : f32 to vector<8x128xf32>
    %173 = arith.addf %172, %171 : vector<8x128xf32>
    %174 = arith.divf %172, %173 : vector<8x128xf32>
    %175 = vector.extract_strided_slice %162 {offsets = [0, 256], sizes = [8, 128], strides = [1, 1]} : vector<8x512xf32> to vector<8x128xf32>
    %176 = math.tanh %175 : vector<8x128xf32>
    %177 = vector.extract_strided_slice %162 {offsets = [0, 384], sizes = [8, 128], strides = [1, 1]} : vector<8x512xf32> to vector<8x128xf32>
    %178 = arith.negf %177 : vector<8x128xf32>
    %179 = math.exp %178 : vector<8x128xf32>
    %cst_35 = arith.constant 1.000000e+00 : f32
    %180 = vector.broadcast %cst_35 : f32 to vector<8x128xf32>
    %181 = arith.addf %180, %179 : vector<8x128xf32>
    %182 = arith.divf %180, %181 : vector<8x128xf32>
    %183 = arith.mulf %174, %126 : vector<8x128xf32>
    %184 = arith.mulf %168, %176 : vector<8x128xf32>
    %185 = arith.addf %183, %184 : vector<8x128xf32>
    %186 = math.tanh %185 : vector<8x128xf32>
    %187 = arith.mulf %182, %186 : vector<8x128xf32>
    %188 = vector.extract_strided_slice %159 {offsets = [0, 0], sizes = [8, 128], strides = [1, 1]} : vector<8x512xf32> to vector<8x128xf32>
    %189 = arith.negf %188 : vector<8x128xf32>
    %190 = math.exp %189 : vector<8x128xf32>
    %cst_36 = arith.constant 1.000000e+00 : f32
    %191 = vector.broadcast %cst_36 : f32 to vector<8x128xf32>
    %192 = arith.addf %191, %190 : vector<8x128xf32>
    %193 = arith.divf %191, %192 : vector<8x128xf32>
    %194 = vector.extract_strided_slice %159 {offsets = [0, 128], sizes = [8, 128], strides = [1, 1]} : vector<8x512xf32> to vector<8x128xf32>
    %195 = arith.negf %194 : vector<8x128xf32>
    %196 = math.exp %195 : vector<8x128xf32>
    %cst_37 = arith.constant 1.000000e+00 : f32
    %197 = vector.broadcast %cst_37 : f32 to vector<8x128xf32>
    %198 = arith.addf %197, %196 : vector<8x128xf32>
    %199 = arith.divf %197, %198 : vector<8x128xf32>
    %200 = vector.extract_strided_slice %159 {offsets = [0, 256], sizes = [8, 128], strides = [1, 1]} : vector<8x512xf32> to vector<8x128xf32>
    %201 = math.tanh %200 : vector<8x128xf32>
    %202 = vector.extract_strided_slice %159 {offsets = [0, 384], sizes = [8, 128], strides = [1, 1]} : vector<8x512xf32> to vector<8x128xf32>
    %203 = arith.negf %202 : vector<8x128xf32>
    %204 = math.exp %203 : vector<8x128xf32>
    %cst_38 = arith.constant 1.000000e+00 : f32
    %205 = vector.broadcast %cst_38 : f32 to vector<8x128xf32>
    %206 = arith.addf %205, %204 : vector<8x128xf32>
    %207 = arith.divf %205, %206 : vector<8x128xf32>
    %208 = arith.mulf %199, %151 : vector<8x128xf32>
    %209 = arith.mulf %193, %201 : vector<8x128xf32>
    %210 = arith.addf %208, %209 : vector<8x128xf32>
    %211 = math.tanh %210 : vector<8x128xf32>
    %212 = arith.mulf %207, %211 : vector<8x128xf32>
    %213 = arith.truncf %187 : vector<8x128xf32> to vector<8x128xbf16>
    %214 = arith.truncf %212 : vector<8x128xf32> to vector<8x128xbf16>
    %215 = tpu.concatenate %213, %214 in 1 : vector<8x128xbf16>, vector<8x128xbf16> -> vector<8x256xbf16>
    %cst_39 = arith.constant dense<0.000000e+00> : vector<8x512xf32>
    %216 = tpu.matmul %215, %7, %cst_39 {dimension_numbers = #tpu.dot_dimension_numbers<[1], [0], [0], [1], [0, 0, 1, 1], [], []>} : vector<8x256xbf16>, vector<256x512xbf16>, vector<8x512xf32> -> vector<8x512xf32>
    %217 = vector.broadcast %8 : vector<1x512xf32> to vector<8x512xf32>
    %218 = arith.addf %216, %217 : vector<8x512xf32>
    %219 = vector.extract_strided_slice %5 {offsets = [32, 0], sizes = [8, 512], strides = [1, 1]} : vector<64x512xf32> to vector<8x512xf32>
    %cst_40 = arith.constant dense<0.000000e+00> : vector<8x512xf32>
    %220 = tpu.matmul %213, %6, %cst_40 {dimension_numbers = #tpu.dot_dimension_numbers<[1], [0], [0], [1], [0, 0, 1, 1], [], []>} : vector<8x128xbf16>, vector<128x512xbf16>, vector<8x512xf32> -> vector<8x512xf32>
    %221 = arith.addf %219, %220 : vector<8x512xf32>
    %222 = vector.extract_strided_slice %221 {offsets = [0, 0], sizes = [8, 128], strides = [1, 1]} : vector<8x512xf32> to vector<8x128xf32>
    %223 = arith.negf %222 : vector<8x128xf32>
    %224 = math.exp %223 : vector<8x128xf32>
    %cst_41 = arith.constant 1.000000e+00 : f32
    %225 = vector.broadcast %cst_41 : f32 to vector<8x128xf32>
    %226 = arith.addf %225, %224 : vector<8x128xf32>
    %227 = arith.divf %225, %226 : vector<8x128xf32>
    %228 = vector.extract_strided_slice %221 {offsets = [0, 128], sizes = [8, 128], strides = [1, 1]} : vector<8x512xf32> to vector<8x128xf32>
    %229 = arith.negf %228 : vector<8x128xf32>
    %230 = math.exp %229 : vector<8x128xf32>
    %cst_42 = arith.constant 1.000000e+00 : f32
    %231 = vector.broadcast %cst_42 : f32 to vector<8x128xf32>
    %232 = arith.addf %231, %230 : vector<8x128xf32>
    %233 = arith.divf %231, %232 : vector<8x128xf32>
    %234 = vector.extract_strided_slice %221 {offsets = [0, 256], sizes = [8, 128], strides = [1, 1]} : vector<8x512xf32> to vector<8x128xf32>
    %235 = math.tanh %234 : vector<8x128xf32>
    %236 = vector.extract_strided_slice %221 {offsets = [0, 384], sizes = [8, 128], strides = [1, 1]} : vector<8x512xf32> to vector<8x128xf32>
    %237 = arith.negf %236 : vector<8x128xf32>
    %238 = math.exp %237 : vector<8x128xf32>
    %cst_43 = arith.constant 1.000000e+00 : f32
    %239 = vector.broadcast %cst_43 : f32 to vector<8x128xf32>
    %240 = arith.addf %239, %238 : vector<8x128xf32>
    %241 = arith.divf %239, %240 : vector<8x128xf32>
    %242 = arith.mulf %233, %185 : vector<8x128xf32>
    %243 = arith.mulf %227, %235 : vector<8x128xf32>
    %244 = arith.addf %242, %243 : vector<8x128xf32>
    %245 = math.tanh %244 : vector<8x128xf32>
    %246 = arith.mulf %241, %245 : vector<8x128xf32>
    %247 = vector.extract_strided_slice %218 {offsets = [0, 0], sizes = [8, 128], strides = [1, 1]} : vector<8x512xf32> to vector<8x128xf32>
    %248 = arith.negf %247 : vector<8x128xf32>
    %249 = math.exp %248 : vector<8x128xf32>
    %cst_44 = arith.constant 1.000000e+00 : f32
    %250 = vector.broadcast %cst_44 : f32 to vector<8x128xf32>
    %251 = arith.addf %250, %249 : vector<8x128xf32>
    %252 = arith.divf %250, %251 : vector<8x128xf32>
    %253 = vector.extract_strided_slice %218 {offsets = [0, 128], sizes = [8, 128], strides = [1, 1]} : vector<8x512xf32> to vector<8x128xf32>
    %254 = arith.negf %253 : vector<8x128xf32>
    %255 = math.exp %254 : vector<8x128xf32>
    %cst_45 = arith.constant 1.000000e+00 : f32
    %256 = vector.broadcast %cst_45 : f32 to vector<8x128xf32>
    %257 = arith.addf %256, %255 : vector<8x128xf32>
    %258 = arith.divf %256, %257 : vector<8x128xf32>
    %259 = vector.extract_strided_slice %218 {offsets = [0, 256], sizes = [8, 128], strides = [1, 1]} : vector<8x512xf32> to vector<8x128xf32>
    %260 = math.tanh %259 : vector<8x128xf32>
    %261 = vector.extract_strided_slice %218 {offsets = [0, 384], sizes = [8, 128], strides = [1, 1]} : vector<8x512xf32> to vector<8x128xf32>
    %262 = arith.negf %261 : vector<8x128xf32>
    %263 = math.exp %262 : vector<8x128xf32>
    %cst_46 = arith.constant 1.000000e+00 : f32
    %264 = vector.broadcast %cst_46 : f32 to vector<8x128xf32>
    %265 = arith.addf %264, %263 : vector<8x128xf32>
    %266 = arith.divf %264, %265 : vector<8x128xf32>
    %267 = arith.mulf %258, %210 : vector<8x128xf32>
    %268 = arith.mulf %252, %260 : vector<8x128xf32>
    %269 = arith.addf %267, %268 : vector<8x128xf32>
    %270 = math.tanh %269 : vector<8x128xf32>
    %271 = arith.mulf %266, %270 : vector<8x128xf32>
    %272 = arith.truncf %246 : vector<8x128xf32> to vector<8x128xbf16>
    %273 = arith.truncf %271 : vector<8x128xf32> to vector<8x128xbf16>
    %274 = tpu.concatenate %272, %273 in 1 : vector<8x128xbf16>, vector<8x128xbf16> -> vector<8x256xbf16>
    %cst_47 = arith.constant dense<0.000000e+00> : vector<8x512xf32>
    %275 = tpu.matmul %274, %7, %cst_47 {dimension_numbers = #tpu.dot_dimension_numbers<[1], [0], [0], [1], [0, 0, 1, 1], [], []>} : vector<8x256xbf16>, vector<256x512xbf16>, vector<8x512xf32> -> vector<8x512xf32>
    %276 = vector.broadcast %8 : vector<1x512xf32> to vector<8x512xf32>
    %277 = arith.addf %275, %276 : vector<8x512xf32>
    %278 = vector.extract_strided_slice %5 {offsets = [40, 0], sizes = [8, 512], strides = [1, 1]} : vector<64x512xf32> to vector<8x512xf32>
    %cst_48 = arith.constant dense<0.000000e+00> : vector<8x512xf32>
    %279 = tpu.matmul %272, %6, %cst_48 {dimension_numbers = #tpu.dot_dimension_numbers<[1], [0], [0], [1], [0, 0, 1, 1], [], []>} : vector<8x128xbf16>, vector<128x512xbf16>, vector<8x512xf32> -> vector<8x512xf32>
    %280 = arith.addf %278, %279 : vector<8x512xf32>
    %281 = vector.extract_strided_slice %280 {offsets = [0, 0], sizes = [8, 128], strides = [1, 1]} : vector<8x512xf32> to vector<8x128xf32>
    %282 = arith.negf %281 : vector<8x128xf32>
    %283 = math.exp %282 : vector<8x128xf32>
    %cst_49 = arith.constant 1.000000e+00 : f32
    %284 = vector.broadcast %cst_49 : f32 to vector<8x128xf32>
    %285 = arith.addf %284, %283 : vector<8x128xf32>
    %286 = arith.divf %284, %285 : vector<8x128xf32>
    %287 = vector.extract_strided_slice %280 {offsets = [0, 128], sizes = [8, 128], strides = [1, 1]} : vector<8x512xf32> to vector<8x128xf32>
    %288 = arith.negf %287 : vector<8x128xf32>
    %289 = math.exp %288 : vector<8x128xf32>
    %cst_50 = arith.constant 1.000000e+00 : f32
    %290 = vector.broadcast %cst_50 : f32 to vector<8x128xf32>
    %291 = arith.addf %290, %289 : vector<8x128xf32>
    %292 = arith.divf %290, %291 : vector<8x128xf32>
    %293 = vector.extract_strided_slice %280 {offsets = [0, 256], sizes = [8, 128], strides = [1, 1]} : vector<8x512xf32> to vector<8x128xf32>
    %294 = math.tanh %293 : vector<8x128xf32>
    %295 = vector.extract_strided_slice %280 {offsets = [0, 384], sizes = [8, 128], strides = [1, 1]} : vector<8x512xf32> to vector<8x128xf32>
    %296 = arith.negf %295 : vector<8x128xf32>
    %297 = math.exp %296 : vector<8x128xf32>
    %cst_51 = arith.constant 1.000000e+00 : f32
    %298 = vector.broadcast %cst_51 : f32 to vector<8x128xf32>
    %299 = arith.addf %298, %297 : vector<8x128xf32>
    %300 = arith.divf %298, %299 : vector<8x128xf32>
    %301 = arith.mulf %292, %244 : vector<8x128xf32>
    %302 = arith.mulf %286, %294 : vector<8x128xf32>
    %303 = arith.addf %301, %302 : vector<8x128xf32>
    %304 = math.tanh %303 : vector<8x128xf32>
    %305 = arith.mulf %300, %304 : vector<8x128xf32>
    %306 = vector.extract_strided_slice %277 {offsets = [0, 0], sizes = [8, 128], strides = [1, 1]} : vector<8x512xf32> to vector<8x128xf32>
    %307 = arith.negf %306 : vector<8x128xf32>
    %308 = math.exp %307 : vector<8x128xf32>
    %cst_52 = arith.constant 1.000000e+00 : f32
    %309 = vector.broadcast %cst_52 : f32 to vector<8x128xf32>
    %310 = arith.addf %309, %308 : vector<8x128xf32>
    %311 = arith.divf %309, %310 : vector<8x128xf32>
    %312 = vector.extract_strided_slice %277 {offsets = [0, 128], sizes = [8, 128], strides = [1, 1]} : vector<8x512xf32> to vector<8x128xf32>
    %313 = arith.negf %312 : vector<8x128xf32>
    %314 = math.exp %313 : vector<8x128xf32>
    %cst_53 = arith.constant 1.000000e+00 : f32
    %315 = vector.broadcast %cst_53 : f32 to vector<8x128xf32>
    %316 = arith.addf %315, %314 : vector<8x128xf32>
    %317 = arith.divf %315, %316 : vector<8x128xf32>
    %318 = vector.extract_strided_slice %277 {offsets = [0, 256], sizes = [8, 128], strides = [1, 1]} : vector<8x512xf32> to vector<8x128xf32>
    %319 = math.tanh %318 : vector<8x128xf32>
    %320 = vector.extract_strided_slice %277 {offsets = [0, 384], sizes = [8, 128], strides = [1, 1]} : vector<8x512xf32> to vector<8x128xf32>
    %321 = arith.negf %320 : vector<8x128xf32>
    %322 = math.exp %321 : vector<8x128xf32>
    %cst_54 = arith.constant 1.000000e+00 : f32
    %323 = vector.broadcast %cst_54 : f32 to vector<8x128xf32>
    %324 = arith.addf %323, %322 : vector<8x128xf32>
    %325 = arith.divf %323, %324 : vector<8x128xf32>
    %326 = arith.mulf %317, %269 : vector<8x128xf32>
    %327 = arith.mulf %311, %319 : vector<8x128xf32>
    %328 = arith.addf %326, %327 : vector<8x128xf32>
    %329 = math.tanh %328 : vector<8x128xf32>
    %330 = arith.mulf %325, %329 : vector<8x128xf32>
    %331 = arith.truncf %305 : vector<8x128xf32> to vector<8x128xbf16>
    %332 = arith.truncf %330 : vector<8x128xf32> to vector<8x128xbf16>
    %333 = tpu.concatenate %331, %332 in 1 : vector<8x128xbf16>, vector<8x128xbf16> -> vector<8x256xbf16>
    %cst_55 = arith.constant dense<0.000000e+00> : vector<8x512xf32>
    %334 = tpu.matmul %333, %7, %cst_55 {dimension_numbers = #tpu.dot_dimension_numbers<[1], [0], [0], [1], [0, 0, 1, 1], [], []>} : vector<8x256xbf16>, vector<256x512xbf16>, vector<8x512xf32> -> vector<8x512xf32>
    %335 = vector.broadcast %8 : vector<1x512xf32> to vector<8x512xf32>
    %336 = arith.addf %334, %335 : vector<8x512xf32>
    %337 = vector.extract_strided_slice %5 {offsets = [48, 0], sizes = [8, 512], strides = [1, 1]} : vector<64x512xf32> to vector<8x512xf32>
    %cst_56 = arith.constant dense<0.000000e+00> : vector<8x512xf32>
    %338 = tpu.matmul %331, %6, %cst_56 {dimension_numbers = #tpu.dot_dimension_numbers<[1], [0], [0], [1], [0, 0, 1, 1], [], []>} : vector<8x128xbf16>, vector<128x512xbf16>, vector<8x512xf32> -> vector<8x512xf32>
    %339 = arith.addf %337, %338 : vector<8x512xf32>
    %340 = vector.extract_strided_slice %339 {offsets = [0, 0], sizes = [8, 128], strides = [1, 1]} : vector<8x512xf32> to vector<8x128xf32>
    %341 = arith.negf %340 : vector<8x128xf32>
    %342 = math.exp %341 : vector<8x128xf32>
    %cst_57 = arith.constant 1.000000e+00 : f32
    %343 = vector.broadcast %cst_57 : f32 to vector<8x128xf32>
    %344 = arith.addf %343, %342 : vector<8x128xf32>
    %345 = arith.divf %343, %344 : vector<8x128xf32>
    %346 = vector.extract_strided_slice %339 {offsets = [0, 128], sizes = [8, 128], strides = [1, 1]} : vector<8x512xf32> to vector<8x128xf32>
    %347 = arith.negf %346 : vector<8x128xf32>
    %348 = math.exp %347 : vector<8x128xf32>
    %cst_58 = arith.constant 1.000000e+00 : f32
    %349 = vector.broadcast %cst_58 : f32 to vector<8x128xf32>
    %350 = arith.addf %349, %348 : vector<8x128xf32>
    %351 = arith.divf %349, %350 : vector<8x128xf32>
    %352 = vector.extract_strided_slice %339 {offsets = [0, 256], sizes = [8, 128], strides = [1, 1]} : vector<8x512xf32> to vector<8x128xf32>
    %353 = math.tanh %352 : vector<8x128xf32>
    %354 = vector.extract_strided_slice %339 {offsets = [0, 384], sizes = [8, 128], strides = [1, 1]} : vector<8x512xf32> to vector<8x128xf32>
    %355 = arith.negf %354 : vector<8x128xf32>
    %356 = math.exp %355 : vector<8x128xf32>
    %cst_59 = arith.constant 1.000000e+00 : f32
    %357 = vector.broadcast %cst_59 : f32 to vector<8x128xf32>
    %358 = arith.addf %357, %356 : vector<8x128xf32>
    %359 = arith.divf %357, %358 : vector<8x128xf32>
    %360 = arith.mulf %351, %303 : vector<8x128xf32>
    %361 = arith.mulf %345, %353 : vector<8x128xf32>
    %362 = arith.addf %360, %361 : vector<8x128xf32>
    %363 = math.tanh %362 : vector<8x128xf32>
    %364 = arith.mulf %359, %363 : vector<8x128xf32>
    %365 = vector.extract_strided_slice %336 {offsets = [0, 0], sizes = [8, 128], strides = [1, 1]} : vector<8x512xf32> to vector<8x128xf32>
    %366 = arith.negf %365 : vector<8x128xf32>
    %367 = math.exp %366 : vector<8x128xf32>
    %cst_60 = arith.constant 1.000000e+00 : f32
    %368 = vector.broadcast %cst_60 : f32 to vector<8x128xf32>
    %369 = arith.addf %368, %367 : vector<8x128xf32>
    %370 = arith.divf %368, %369 : vector<8x128xf32>
    %371 = vector.extract_strided_slice %336 {offsets = [0, 128], sizes = [8, 128], strides = [1, 1]} : vector<8x512xf32> to vector<8x128xf32>
    %372 = arith.negf %371 : vector<8x128xf32>
    %373 = math.exp %372 : vector<8x128xf32>
    %cst_61 = arith.constant 1.000000e+00 : f32
    %374 = vector.broadcast %cst_61 : f32 to vector<8x128xf32>
    %375 = arith.addf %374, %373 : vector<8x128xf32>
    %376 = arith.divf %374, %375 : vector<8x128xf32>
    %377 = vector.extract_strided_slice %336 {offsets = [0, 256], sizes = [8, 128], strides = [1, 1]} : vector<8x512xf32> to vector<8x128xf32>
    %378 = math.tanh %377 : vector<8x128xf32>
    %379 = vector.extract_strided_slice %336 {offsets = [0, 384], sizes = [8, 128], strides = [1, 1]} : vector<8x512xf32> to vector<8x128xf32>
    %380 = arith.negf %379 : vector<8x128xf32>
    %381 = math.exp %380 : vector<8x128xf32>
    %cst_62 = arith.constant 1.000000e+00 : f32
    %382 = vector.broadcast %cst_62 : f32 to vector<8x128xf32>
    %383 = arith.addf %382, %381 : vector<8x128xf32>
    %384 = arith.divf %382, %383 : vector<8x128xf32>
    %385 = arith.mulf %376, %328 : vector<8x128xf32>
    %386 = arith.mulf %370, %378 : vector<8x128xf32>
    %387 = arith.addf %385, %386 : vector<8x128xf32>
    %388 = math.tanh %387 : vector<8x128xf32>
    %389 = arith.mulf %384, %388 : vector<8x128xf32>
    %390 = arith.truncf %364 : vector<8x128xf32> to vector<8x128xbf16>
    %391 = arith.truncf %389 : vector<8x128xf32> to vector<8x128xbf16>
    %392 = tpu.concatenate %390, %391 in 1 : vector<8x128xbf16>, vector<8x128xbf16> -> vector<8x256xbf16>
    %cst_63 = arith.constant dense<0.000000e+00> : vector<8x512xf32>
    %393 = tpu.matmul %392, %7, %cst_63 {dimension_numbers = #tpu.dot_dimension_numbers<[1], [0], [0], [1], [0, 0, 1, 1], [], []>} : vector<8x256xbf16>, vector<256x512xbf16>, vector<8x512xf32> -> vector<8x512xf32>
    %394 = vector.broadcast %8 : vector<1x512xf32> to vector<8x512xf32>
    %395 = arith.addf %393, %394 : vector<8x512xf32>
    %396 = vector.extract_strided_slice %5 {offsets = [56, 0], sizes = [8, 512], strides = [1, 1]} : vector<64x512xf32> to vector<8x512xf32>
    %cst_64 = arith.constant dense<0.000000e+00> : vector<8x512xf32>
    %397 = tpu.matmul %390, %6, %cst_64 {dimension_numbers = #tpu.dot_dimension_numbers<[1], [0], [0], [1], [0, 0, 1, 1], [], []>} : vector<8x128xbf16>, vector<128x512xbf16>, vector<8x512xf32> -> vector<8x512xf32>
    %398 = arith.addf %396, %397 : vector<8x512xf32>
    %399 = vector.extract_strided_slice %398 {offsets = [0, 0], sizes = [8, 128], strides = [1, 1]} : vector<8x512xf32> to vector<8x128xf32>
    %400 = arith.negf %399 : vector<8x128xf32>
    %401 = math.exp %400 : vector<8x128xf32>
    %cst_65 = arith.constant 1.000000e+00 : f32
    %402 = vector.broadcast %cst_65 : f32 to vector<8x128xf32>
    %403 = arith.addf %402, %401 : vector<8x128xf32>
    %404 = arith.divf %402, %403 : vector<8x128xf32>
    %405 = vector.extract_strided_slice %398 {offsets = [0, 128], sizes = [8, 128], strides = [1, 1]} : vector<8x512xf32> to vector<8x128xf32>
    %406 = arith.negf %405 : vector<8x128xf32>
    %407 = math.exp %406 : vector<8x128xf32>
    %cst_66 = arith.constant 1.000000e+00 : f32
    %408 = vector.broadcast %cst_66 : f32 to vector<8x128xf32>
    %409 = arith.addf %408, %407 : vector<8x128xf32>
    %410 = arith.divf %408, %409 : vector<8x128xf32>
    %411 = vector.extract_strided_slice %398 {offsets = [0, 256], sizes = [8, 128], strides = [1, 1]} : vector<8x512xf32> to vector<8x128xf32>
    %412 = math.tanh %411 : vector<8x128xf32>
    %413 = vector.extract_strided_slice %398 {offsets = [0, 384], sizes = [8, 128], strides = [1, 1]} : vector<8x512xf32> to vector<8x128xf32>
    %414 = arith.negf %413 : vector<8x128xf32>
    %415 = math.exp %414 : vector<8x128xf32>
    %cst_67 = arith.constant 1.000000e+00 : f32
    %416 = vector.broadcast %cst_67 : f32 to vector<8x128xf32>
    %417 = arith.addf %416, %415 : vector<8x128xf32>
    %418 = arith.divf %416, %417 : vector<8x128xf32>
    %419 = arith.mulf %410, %362 : vector<8x128xf32>
    %420 = arith.mulf %404, %412 : vector<8x128xf32>
    %421 = arith.addf %419, %420 : vector<8x128xf32>
    %422 = math.tanh %421 : vector<8x128xf32>
    %423 = arith.mulf %418, %422 : vector<8x128xf32>
    %424 = vector.extract_strided_slice %395 {offsets = [0, 0], sizes = [8, 128], strides = [1, 1]} : vector<8x512xf32> to vector<8x128xf32>
    %425 = arith.negf %424 : vector<8x128xf32>
    %426 = math.exp %425 : vector<8x128xf32>
    %cst_68 = arith.constant 1.000000e+00 : f32
    %427 = vector.broadcast %cst_68 : f32 to vector<8x128xf32>
    %428 = arith.addf %427, %426 : vector<8x128xf32>
    %429 = arith.divf %427, %428 : vector<8x128xf32>
    %430 = vector.extract_strided_slice %395 {offsets = [0, 128], sizes = [8, 128], strides = [1, 1]} : vector<8x512xf32> to vector<8x128xf32>
    %431 = arith.negf %430 : vector<8x128xf32>
    %432 = math.exp %431 : vector<8x128xf32>
    %cst_69 = arith.constant 1.000000e+00 : f32
    %433 = vector.broadcast %cst_69 : f32 to vector<8x128xf32>
    %434 = arith.addf %433, %432 : vector<8x128xf32>
    %435 = arith.divf %433, %434 : vector<8x128xf32>
    %436 = vector.extract_strided_slice %395 {offsets = [0, 256], sizes = [8, 128], strides = [1, 1]} : vector<8x512xf32> to vector<8x128xf32>
    %437 = math.tanh %436 : vector<8x128xf32>
    %438 = vector.extract_strided_slice %395 {offsets = [0, 384], sizes = [8, 128], strides = [1, 1]} : vector<8x512xf32> to vector<8x128xf32>
    %439 = arith.negf %438 : vector<8x128xf32>
    %440 = math.exp %439 : vector<8x128xf32>
    %cst_70 = arith.constant 1.000000e+00 : f32
    %441 = vector.broadcast %cst_70 : f32 to vector<8x128xf32>
    %442 = arith.addf %441, %440 : vector<8x128xf32>
    %443 = arith.divf %441, %442 : vector<8x128xf32>
    %444 = arith.mulf %435, %387 : vector<8x128xf32>
    %445 = arith.mulf %429, %437 : vector<8x128xf32>
    %446 = arith.addf %444, %445 : vector<8x128xf32>
    %447 = math.tanh %446 : vector<8x128xf32>
    %448 = arith.mulf %443, %447 : vector<8x128xf32>
    %449 = arith.truncf %423 : vector<8x128xf32> to vector<8x128xbf16>
    %450 = arith.truncf %448 : vector<8x128xf32> to vector<8x128xbf16>
    %451 = tpu.concatenate %449, %450 in 1 : vector<8x128xbf16>, vector<8x128xbf16> -> vector<8x256xbf16>
    %cst_71 = arith.constant dense<0.000000e+00> : vector<8x512xf32>
    %452 = tpu.matmul %451, %7, %cst_71 {dimension_numbers = #tpu.dot_dimension_numbers<[1], [0], [0], [1], [0, 0, 1, 1], [], []>} : vector<8x256xbf16>, vector<256x512xbf16>, vector<8x512xf32> -> vector<8x512xf32>
    %453 = vector.broadcast %8 : vector<1x512xf32> to vector<8x512xf32>
    %454 = arith.addf %452, %453 : vector<8x512xf32>
    %455 = vector.extract_strided_slice %454 {offsets = [0, 0], sizes = [8, 128], strides = [1, 1]} : vector<8x512xf32> to vector<8x128xf32>
    %456 = arith.negf %455 : vector<8x128xf32>
    %457 = math.exp %456 : vector<8x128xf32>
    %cst_72 = arith.constant 1.000000e+00 : f32
    %458 = vector.broadcast %cst_72 : f32 to vector<8x128xf32>
    %459 = arith.addf %458, %457 : vector<8x128xf32>
    %460 = arith.divf %458, %459 : vector<8x128xf32>
    %461 = vector.extract_strided_slice %454 {offsets = [0, 128], sizes = [8, 128], strides = [1, 1]} : vector<8x512xf32> to vector<8x128xf32>
    %462 = arith.negf %461 : vector<8x128xf32>
    %463 = math.exp %462 : vector<8x128xf32>
    %cst_73 = arith.constant 1.000000e+00 : f32
    %464 = vector.broadcast %cst_73 : f32 to vector<8x128xf32>
    %465 = arith.addf %464, %463 : vector<8x128xf32>
    %466 = arith.divf %464, %465 : vector<8x128xf32>
    %467 = vector.extract_strided_slice %454 {offsets = [0, 256], sizes = [8, 128], strides = [1, 1]} : vector<8x512xf32> to vector<8x128xf32>
    %468 = math.tanh %467 : vector<8x128xf32>
    %469 = vector.extract_strided_slice %454 {offsets = [0, 384], sizes = [8, 128], strides = [1, 1]} : vector<8x512xf32> to vector<8x128xf32>
    %470 = arith.negf %469 : vector<8x128xf32>
    %471 = math.exp %470 : vector<8x128xf32>
    %cst_74 = arith.constant 1.000000e+00 : f32
    %472 = vector.broadcast %cst_74 : f32 to vector<8x128xf32>
    %473 = arith.addf %472, %471 : vector<8x128xf32>
    %474 = arith.divf %472, %473 : vector<8x128xf32>
    %475 = arith.mulf %466, %446 : vector<8x128xf32>
    %476 = arith.mulf %460, %468 : vector<8x128xf32>
    %477 = arith.addf %475, %476 : vector<8x128xf32>
    %478 = math.tanh %477 : vector<8x128xf32>
    %479 = arith.mulf %474, %478 : vector<8x128xf32>
    %c0_75 = arith.constant 0 : index
    %c0_76 = arith.constant 0 : index
    %480 = vector.load %arg6[%c0_75, %c0_76] : memref<1x128xf32, #tpu.memory_space<vmem>>, vector<1x128xf32>
    %481 = vector.broadcast %480 : vector<1x128xf32> to vector<8x128xf32>
    %482 = arith.mulf %479, %481 : vector<8x128xf32>
    %cst_77 = arith.constant dense<0.000000e+00> : vector<8xf32>
    %483 = vector.multi_reduction <add>, %482, %cst_77 [1] : vector<8x128xf32> to vector<8xf32>
    %484 = vector.shape_cast %483 : vector<8xf32> to vector<8x1xf32>
    %c0_78 = arith.constant 0 : index
    %c0_79 = arith.constant 0 : index
    %485 = vector.load %arg7[%c0_78, %c0_79] : memref<1x1xf32, #tpu.memory_space<vmem>>, vector<1x1xf32>
    %486 = vector.broadcast %485 : vector<1x1xf32> to vector<8x1xf32>
    %487 = arith.addf %484, %486 : vector<8x1xf32>
    %c0_80 = arith.constant 0 : index
    %c0_81 = arith.constant 0 : index
    %488 = vector.load %arg8[%c0_80, %c0_81] : memref<8x1xf32, #tpu.memory_space<vmem>>, vector<8x1xf32>
    tpu.vector_store %arg8[%c0_80, %c0_81], %487 {strides = array<i32>} : memref<8x1xf32, #tpu.memory_space<vmem>>, vector<8x1xf32>,
    return
  }
}

</mosaic_0001>

<bundles_post_ra>
// kernel: spam_classifier_forward.1
= control target key start
LH: loop header
LB: loop body
LE: loop exit
PB: predicated region body
PF: predicated region fallthrough
CT: control target
= control target key end

     0   :  { %s6043_s0 = inlined_call_operand.vmem [shape: bf16[64,128], index: 0, kind: input, shape index: {}]   ;;  %s6044_s1 = inlined_call_operand.vmem [shape: bf16[128,512], index: 1, kind: input, shape index: {}]   ;;  %s6045_s2 = inlined_call_operand.hbm [shape: bf16[128,512], index: 2, kind: input, shape index: {}]   ;;  %s6046_s3 = inlined_call_operand.vmem [shape: f32[1,512], index: 3, kind: input, shape index: {}]   ;;  %s6047_s4 = inlined_call_operand.hbm [shape: bf16[256,512], index: 4, kind: input, shape index: {}]   ;;  %s6048_s5 = inlined_call_operand.vmem [shape: f32[1,512], index: 5, kind: input, shape index: {}]   ;;  %s6049_s6 = inlined_call_operand.vmem [shape: f32[1,128], index: 6, kind: input, shape index: {}]   ;;  %s6050_s7 = inlined_call_operand.<no memory space> [shape: f32[1,1], index: 7, kind: input, shape index: {}]   ;;  %s6051_s8 = inlined_call_operand.vmem [shape: f32[8,1], index: 8, kind: output, shape index: {}]  }
   0x1   :  { %v13_v0 = vstv %s6050_s7 }
   0x2   :  { %14 = vst [vmem:[#allocation2] sm:$0x1] %v13_v0 }
   0x3   :  { %15 = vsyncpa [#allocation4], 0  ;;  %s25_s9 = sshll.u32 %s6045_s2, 4  ;;  %s26_s9 = int_to_ptr.hbm [resolvable:$true] %s25_s9 }
   0x4   :  { %16 = vsyncpa [#allocation6], 0  ;;  %s4290_s10 = smov [#allocation3]   ;;  %s40_s14 = sshll.u32 %s6047_s4, 4  ;;  %s41_s14 = int_to_ptr.hbm [resolvable:$true] %s40_s14 }
   0x5   :  { %s27_s11 = sshll.u32 %s4290_s10, 4  ;;  %s4291_s15 = smov 256   ;;  %s28_s11 = int_to_ptr.vmem [resolvable:$true] %s27_s11 }
   0x6   :  { %s4292_s16 = smov 16   ;;  %s4293_s7 = smov [#allocation5]  }
   0x7   :  { %33 = dma.hbm_to_vmem [thread:$0]  %s26_s9, 4096, %s28_s11, [#allocation4], %s4291_s15, %s4291_s15, %s4292_s16  }
   0x8   :  { %s42_s17 = sshll.u32 %s4293_s7, 4  ;;  %s43_s17 = int_to_ptr.vmem [resolvable:$true] %s42_s17 }
   0x9   :  { %48 = dma.hbm_to_vmem [thread:$0]  %s41_s14, 8192, %s43_s17, [#allocation6], %s4291_s15, %s4291_s15, %s4292_s16  }
   0xa   :  { %4286 = dma.done.wait [#allocation4], 4096  }
   0xb   :  { %4287 = vsyncadd [#allocation4], 4294963200 }
   0xc   :  { %4288 = dma.done.wait [#allocation6], 8192  }
   0xd   :  { %4289 = vsyncadd [#allocation6], 4294959104  ;;  %v3397_v1 = vld [vmem:[%s6044_s1 + $0xe0] sm:$0xf]  ;;  %v3877_v2 = vld [vmem:[%s6044_s1 + $0xec] sm:$0xf0] }
   0xe   :  { %v3875_v3 = vld [vmem:[%s6044_s1 + $0xe4] sm:$0xf]  ;;  %v3398_v4 = vor.u32 %v3877_v2, %v3397_v1  ;;  %v3399_v5 = vld [vmem:[%s6044_s1 + $0xf0] sm:$0xf0]  ;;  %v3876_v6 = vld [vmem:[%s6044_s1 + $0xec] sm:$0xf] }
   0xf   :  { %v3407_v7 = vld [vmem:[%s6044_s1 + $0xf8] sm:$0xf0]  ;;  %v3402_v8 = vor.u32 %v3875_v3, %v3399_v5  ;;  %v3381_v10 = vld [vmem:[%s6044_s1 + $0xc0] sm:$0xf]  ;;  %v3873_v11 = vld [vmem:[%s6044_s1 + $0xcc] sm:$0xf0] }
  0x10   :  { %v3410_v9 = vor.u32 %v3876_v6, %v3407_v7  ;;  %v3871_v12 = vld [vmem:[%s6044_s1 + $0xc4] sm:$0xf]  ;;  %298 = vmatpush.bf16.msra.mxu0 %v3398_v4  ;;  %v3382_v13 = vor.u32 %v3873_v11, %v3381_v10  ;;  %v3383_v14 = vld [vmem:[%s6044_s1 + $0xd0] sm:$0xf0]  ;;  %v3872_v15 = vld [vmem:[%s6044_s1 + $0xcc] sm:$0xf] }
  0x11   :  { %v3391_v16 = vld [vmem:[%s6044_s1 + $0xd8] sm:$0xf0]  ;;  %327 = vmatpush.bf16.msra.mxu1 %v3402_v8  ;;  %v3386_v17 = vor.u32 %v3871_v12, %v3383_v14  ;;  %v3405_v19 = vld [vmem:[%s6044_s1 + $0xe8] sm:$0xf]  ;;  %v3878_v20 = vld [vmem:[%s6044_s1 + $0xf4] sm:$0xf0] }
  0x12   :  { %385 = vmatpush.bf16.msra.mxu3 %v3410_v9  ;;  %v3394_v18 = vor.u32 %v3872_v15, %v3391_v16  ;;  %v3365_v21 = vld [vmem:[%s6044_s1 + $0xa0] sm:$0xf]  ;;  %v3406_v22 = vor.u32 %v3878_v20, %v3405_v19  ;;  %v3869_v23 = vld [vmem:[%s6044_s1 + $0xac] sm:$0xf0]  ;;  %v3867_v24 = vld [vmem:[%s6044_s1 + $0xa4] sm:$0xf] }
  0x13   :  { %v3367_v25 = vld [vmem:[%s6044_s1 + $0xb0] sm:$0xf0]  ;;  %v3868_v26 = vld [vmem:[%s6044_s1 + $0xac] sm:$0xf]  ;;  %v3375_v27 = vld [vmem:[%s6044_s1 + $0xb8] sm:$0xf0]  ;;  %v3366_v29 = vor.u32 %v3869_v23, %v3365_v21 }
  0x14   :  { %v3389_v28 = vld [vmem:[%s6044_s1 + $0xc8] sm:$0xf]  ;;  %299 = vmatpush.bf16.msra.mxu0 %v3382_v13  ;;  %356 = vmatpush.bf16.msra.mxu2 %v3406_v22  ;;  %v3874_v30 = vld [vmem:[%s6044_s1 + $0xd4] sm:$0xf0]  ;;  %v3349_v31 = vld [vmem:[%s6044_s1 + $0x80] sm:$0xf]  ;;  %v3370_v33 = vor.u32 %v3867_v24, %v3367_v25  ;;  %v3378_v34 = vor.u32 %v3868_v26, %v3375_v27 }
  0x15   :  { %v3865_v32 = vld [vmem:[%s6044_s1 + $0x8c] sm:$0xf0]  ;;  %328 = vmatpush.bf16.msra.mxu1 %v3386_v17  ;;  %v3390_v35 = vor.u32 %v3874_v30, %v3389_v28  ;;  %v3863_v36 = vld [vmem:[%s6044_s1 + $0x84] sm:$0xf]  ;;  %v3351_v37 = vld [vmem:[%s6044_s1 + $0x90] sm:$0xf0] }
  0x16   :  { %386 = vmatpush.bf16.msra.mxu3 %v3394_v18  ;;  %v3864_v38 = vld [vmem:[%s6044_s1 + $0x8c] sm:$0xf]  ;;  %v3359_v39 = vld [vmem:[%s6044_s1 + $0x98] sm:$0xf0]  ;;  %v3373_v40 = vld [vmem:[%s6044_s1 + $0xa8] sm:$0xf]  ;;  %v3350_v42 = vor.u32 %v3865_v32, %v3349_v31  ;;  %v3354_v46 = vor.u32 %v3863_v36, %v3351_v37 }
  0x17   :  { %v3870_v41 = vld [vmem:[%s6044_s1 + $0xb4] sm:$0xf0]  ;;  %v3333_v44 = vld [vmem:[%s6044_s1 + $0x60] sm:$0xf]  ;;  %v3861_v45 = vld [vmem:[%s6044_s1 + $0x6c] sm:$0xf0]  ;;  %v3362_v47 = vor.u32 %v3864_v38, %v3359_v39 }
  0x18   :  { %300 = vmatpush.bf16.msra.mxu0 %v3366_v29  ;;  %357 = vmatpush.bf16.msra.mxu2 %v3390_v35  ;;  %v3374_v43 = vor.u32 %v3870_v41, %v3373_v40  ;;  %v3859_v48 = vld [vmem:[%s6044_s1 + $0x64] sm:$0xf]  ;;  %v3357_v49 = vld [vmem:[%s6044_s1 + $0x88] sm:$0xf]  ;;  %v3866_v50 = vld [vmem:[%s6044_s1 + $0x94] sm:$0xf0]  ;;  %v3334_v54 = vor.u32 %v3861_v45, %v3333_v44 }
  0x19   :  { %329 = vmatpush.bf16.msra.mxu1 %v3370_v33  ;;  %v3335_v51 = vld [vmem:[%s6044_s1 + $0x70] sm:$0xf0]  ;;  %v3860_v52 = vld [vmem:[%s6044_s1 + $0x6c] sm:$0xf]  ;;  %v3343_v53 = vld [vmem:[%s6044_s1 + $0x78] sm:$0xf0]  ;;  %v3358_v55 = vor.u32 %v3866_v50, %v3357_v49 }
  0x1a   :  { %387 = vmatpush.bf16.msra.mxu3 %v3378_v34  ;;  %v3317_v56 = vld [vmem:[%s6044_s1 + $0x40] sm:$0xf]  ;;  %v3857_v57 = vld [vmem:[%s6044_s1 + $0x4c] sm:$0xf0]  ;;  %v3338_v58 = vor.u32 %v3859_v48, %v3335_v51  ;;  %v3346_v59 = vor.u32 %v3860_v52, %v3343_v53  ;;  %v3855_v60 = vld [vmem:[%s6044_s1 + $0x44] sm:$0xf] }
  0x1b   :  { %v3341_v61 = vld [vmem:[%s6044_s1 + $0x68] sm:$0xf]  ;;  %v3862_v62 = vld [vmem:[%s6044_s1 + $0x74] sm:$0xf0]  ;;  %v3319_v63 = vld [vmem:[%s6044_s1 + $0x50] sm:$0xf0]  ;;  %v3318_v2 = vor.u32 %v3857_v57, %v3317_v56 }
  0x1c   :  { %301 = vmatpush.bf16.msra.mxu0 %v3350_v42  ;;  %358 = vmatpush.bf16.msra.mxu2 %v3374_v43  ;;  %v3856_v0 = vld [vmem:[%s6044_s1 + $0x4c] sm:$0xf]  ;;  %v3327_v1 = vld [vmem:[%s6044_s1 + $0x58] sm:$0xf0]  ;;  %v3342_v3 = vor.u32 %v3862_v62, %v3341_v61  ;;  %v3301_v4 = vld [vmem:[%s6044_s1 + $0x20] sm:$0xf]  ;;  %v3322_v6 = vor.u32 %v3855_v60, %v3319_v63 }
  0x1d   :  { %330 = vmatpush.bf16.msra.mxu1 %v3354_v46  ;;  %v3853_v5 = vld [vmem:[%s6044_s1 + $0x2c] sm:$0xf0]  ;;  %v3330_v7 = vor.u32 %v3856_v0, %v3327_v1  ;;  %v3851_v8 = vld [vmem:[%s6044_s1 + $0x24] sm:$0xf]  ;;  %v3325_v9 = vld [vmem:[%s6044_s1 + $0x48] sm:$0xf] }
  0x1e   :  { %388 = vmatpush.bf16.msra.mxu3 %v3362_v47  ;;  %v3858_v10 = vld [vmem:[%s6044_s1 + $0x54] sm:$0xf0]  ;;  %v3303_v11 = vld [vmem:[%s6044_s1 + $0x30] sm:$0xf0]  ;;  %v3852_v12 = vld [vmem:[%s6044_s1 + $0x2c] sm:$0xf]  ;;  %v3302_v14 = vor.u32 %v3853_v5, %v3301_v4 }
  0x1f   :  { %v3311_v13 = vld [vmem:[%s6044_s1 + $0x38] sm:$0xf0]  ;;  %v3326_v15 = vor.u32 %v3858_v10, %v3325_v9  ;;  %v3285_v16 = vld [vmem:[%s6044_s1] sm:$0xf]  ;;  %v3849_v17 = vld [vmem:[%s6044_s1 + $0xc] sm:$0xf0]  ;;  %v3306_v19 = vor.u32 %v3851_v8, %v3303_v11 }
  0x20   :  { %302 = vmatpush.bf16.msra.mxu0 %v3334_v54  ;;  %359 = vmatpush.bf16.msra.mxu2 %v3358_v55  ;;  %v3847_v18 = vld [vmem:[%s6044_s1 + $0x4] sm:$0xf]  ;;  %v3314_v20 = vor.u32 %v3852_v12, %v3311_v13  ;;  %v3287_v21 = vld [vmem:[%s6044_s1 + $0x10] sm:$0xf0]  ;;  %v3309_v22 = vld [vmem:[%s6044_s1 + $0x28] sm:$0xf]  ;;  %v3286_v30 = vor.u32 %v3849_v17, %v3285_v16 }
  0x21   :  { %331 = vmatpush.bf16.msra.mxu1 %v3338_v58  ;;  %v3854_v23 = vld [vmem:[%s6044_s1 + $0x34] sm:$0xf0]  ;;  %v3848_v24 = vld [vmem:[%s6044_s1 + $0xc] sm:$0xf]  ;;  %v3295_v25 = vld [vmem:[%s6044_s1 + $0x18] sm:$0xf0]  ;;  %v3290_v32 = vor.u32 %v3847_v18, %v3287_v21 }
  0x22   :  { %389 = vmatpush.bf16.msra.mxu3 %v3346_v59  ;;  %v3656_v26 = vld [vmem:[#allocation5 + $0x1e0] sm:$0xf]  ;;  %v3973_v27 = vld [vmem:[#allocation5 + $0x1ec] sm:$0xf0]  ;;  %v3971_v28 = vld [vmem:[#allocation5 + $0x1e4] sm:$0xf]  ;;  %v3310_v31 = vor.u32 %v3854_v23, %v3309_v22  ;;  %v3298_v33 = vor.u32 %v3848_v24, %v3295_v25 }
  0x23   :  { %v3658_v29 = vld [vmem:[#allocation5 + $0x1f0] sm:$0xf0]  ;;  %v3843_v34 = vld [vmem:[%s6043_s0] sm:$0xff]  ;;  %v3293_v35 = vld [vmem:[%s6044_s1 + $0x8] sm:$0xf]  ;;  %v4544_v37 = vor.u32 %v3973_v27, %v3656_v26 }
  0x24   :  { %303 = vmatpush.bf16.msra.mxu0 %v3318_v2  ;;  %360 = vmatpush.bf16.msra.mxu2 %v3342_v3  ;;  %v3850_v36 = vld [vmem:[%s6044_s1 + $0x14] sm:$0xf0]  ;;  %v4546_v38 = vor.u32 %v3971_v28, %v3658_v29  ;;  %v3640_v39 = vld [vmem:[#allocation5 + $0x1c0] sm:$0xf]  ;;  %v3969_v40 = vld [vmem:[#allocation5 + $0x1cc] sm:$0xf0] }
  0x25   :  { %332 = vmatpush.bf16.msra.mxu1 %v3322_v6  ;;  %6237 = vst [vmem:[#allocation9_spill] sm:$0xff] %v4544_v37  ;;  %v3967_v41 = vld [vmem:[#allocation5 + $0x1c4] sm:$0xf]  ;;  %v3642_v42 = vld [vmem:[#allocation5 + $0x1d0] sm:$0xf0]  ;;  %v3294_v43 = vor.u32 %v3850_v36, %v3293_v35  ;;  %v4550_v44 = vor.u32 %v3969_v40, %v3640_v39 }
  0x26   :  { %390 = vmatpush.bf16.msra.mxu3 %v3330_v7  ;;  %6238 = vst [vmem:[#allocation10_spill] sm:$0xff] %v4546_v38  ;;  %v4552_v45 = vor.u32 %v3967_v41, %v3642_v42  ;;  %v3624_v46 = vld [vmem:[#allocation5 + $0x1a0] sm:$0xf]  ;;  %v3965_v47 = vld [vmem:[#allocation5 + $0x1ac] sm:$0xf0]  ;;  %v3844_v22 = vld [vmem:[%s6043_s0 + $0x8] sm:$0xff] }
  0x27   :  { %6239 = vst [vmem:[#allocation11_spill] sm:$0xff] %v4550_v44  ;;  %v3963_v48 = vld [vmem:[#allocation5 + $0x1a4] sm:$0xf]  ;;  %v3626_v49 = vld [vmem:[#allocation5 + $0x1b0] sm:$0xf0]  ;;  %v4558_v53 = vor.u32 %v3965_v47, %v3624_v46 }
  0x28   :  { %304 = vmatpush.bf16.msra.mxu0 %v3302_v14  ;;  %361 = vmatpush.bf16.msra.mxu2 %v3326_v15  ;;  %6240 = vst [vmem:[#allocation12_spill] sm:$0xff] %v4552_v45  ;;  %v3528_v50 = vld [vmem:[#allocation5 + $0xe0] sm:$0xf]  ;;  %v3941_v51 = vld [vmem:[#allocation5 + $0xec] sm:$0xf0]  ;;  %v4560_v54 = vor.u32 %v3963_v48, %v3626_v49 }
  0x29   :  { %333 = vmatpush.bf16.msra.mxu1 %v3306_v19  ;;  %v4554_v52 = vor.u32 %v3941_v51, %v3528_v50  ;;  %6242 = vst [vmem:[#allocation14_spill] sm:$0xff] %v4558_v53  ;;  %v3608_v55 = vld [vmem:[#allocation5 + $0x180] sm:$0xf]  ;;  %v3961_v56 = vld [vmem:[#allocation5 + $0x18c] sm:$0xf0] }
  0x2a   :  { %391 = vmatpush.bf16.msra.mxu3 %v3314_v20  ;;  %6243 = vst [vmem:[#allocation15_spill] sm:$0xff] %v4560_v54  ;;  %v3959_v57 = vld [vmem:[#allocation5 + $0x184] sm:$0xf]  ;;  %v3610_v58 = vld [vmem:[#allocation5 + $0x190] sm:$0xf0]  ;;  %v4569_v1 = vor.u32 %v3961_v56, %v3608_v55 }
  0x2b   :  { %6241 = vst [vmem:[#allocation13_spill] sm:$0xff] %v4554_v52  ;;  %v3939_v59 = vld [vmem:[#allocation5 + $0xe4] sm:$0xf]  ;;  %v3530_v60 = vld [vmem:[#allocation5 + $0xf0] sm:$0xf0]  ;;  %v4571_v2 = vor.u32 %v3959_v57, %v3610_v58 }
  0x2c   :  { %305 = vmatpush.bf16.msra.mxu0 %v3286_v30  ;;  %362 = vmatpush.bf16.msra.mxu2 %v3310_v31  ;;  %v4563_v61 = vor.u32 %v3939_v59, %v3530_v60  ;;  %v3512_v62 = vld [vmem:[#allocation5 + $0xc0] sm:$0xf]  ;;  %v3937_v63 = vld [vmem:[#allocation5 + $0xcc] sm:$0xf0]  ;;  %6246 = vst [vmem:[#allocation18_spill] sm:$0xff] %v4569_v1 }
  0x2d   :  { %334 = vmatpush.bf16.msra.mxu1 %v3290_v32  ;;  %v4565_v0 = vor.u32 %v3937_v63, %v3512_v62  ;;  %6247 = vst [vmem:[#allocation19_spill] sm:$0xff] %v4571_v2  ;;  %v3592_v3 = vld [vmem:[#allocation5 + $0x160] sm:$0xf]  ;;  %v3935_v4 = vld [vmem:[#allocation5 + $0xc4] sm:$0xf]  ;;  %v3845_v51 = vld [vmem:[%s6043_s0 + $0x10] sm:$0xff] }
  0x2e   :  { %392 = vmatpush.bf16.msra.mxu3 %v3298_v33  ;;  %6244 = vst [vmem:[#allocation16_spill] sm:$0xff] %v4563_v61  ;;  %v3514_v5 = vld [vmem:[#allocation5 + $0xd0] sm:$0xf0]  ;;  %v3957_v6 = vld [vmem:[#allocation5 + $0x16c] sm:$0xf0] }
  0x2f   :  { %306 = vmatmul.bf16.vlgmr.msra.gmra.mxu0 %v3843_v34  ;;  %6245 = vst [vmem:[#allocation17_spill] sm:$0xff] %v4565_v0  ;;  %v3955_v7 = vld [vmem:[#allocation5 + $0x164] sm:$0xf]  ;;  %v3594_v8 = vld [vmem:[#allocation5 + $0x170] sm:$0xf0]  ;;  %v4575_v9 = vor.u32 %v3935_v4, %v3514_v5  ;;  %v4581_v15 = vor.u32 %v3957_v6, %v3592_v3 }
  0x30   :  { %335 = vmatmul.bf16.vlgmr.msra.gmra.mxu1 %v3843_v34  ;;  %363 = vmatpush.bf16.msra.mxu2 %v3294_v43  ;;  %v3496_v10 = vld [vmem:[#allocation5 + $0xa0] sm:$0xf]  ;;  %v3933_v11 = vld [vmem:[#allocation5 + $0xac] sm:$0xf0]  ;;  %v3931_v12 = vld [vmem:[#allocation5 + $0xa4] sm:$0xf]  ;;  %v4583_v16 = vor.u32 %v3955_v7, %v3594_v8 }
  0x31   :  { %917 = vmatpush.bf16.msrb.mxu1 %v4544_v37  ;;  %393 = vmatmul.bf16.vlgmr.msra.gmra.mxu3 %v3843_v34  ;;  %6248 = vst [vmem:[#allocation20_spill] sm:$0xff] %v4575_v9  ;;  %v4577_v13 = vor.u32 %v3933_v11, %v3496_v10  ;;  %v3498_v14 = vld [vmem:[#allocation5 + $0xb0] sm:$0xf0]  ;;  %v3576_v17 = vld [vmem:[#allocation5 + $0x140] sm:$0xf] }
  0x32   :  { %943 = vmatpush.bf16.msrb.mxu3 %v4546_v38  ;;  %904 = vmatpush.bf16.msrb.mxu0 %v4554_v52  ;;  %6250 = vst [vmem:[#allocation22_spill] sm:$0xff] %v4581_v15  ;;  %v3953_v18 = vld [vmem:[#allocation5 + $0x14c] sm:$0xf0]  ;;  %v3951_v19 = vld [vmem:[#allocation5 + $0x144] sm:$0xf]  ;;  %v4587_v21 = vor.u32 %v3931_v12, %v3498_v14  ;;  %v3846_v10 = vld [vmem:[%s6043_s0 + $0x18] sm:$0xff] }
  0x33   :  { %364 = vmatmul.bf16.vlgmr.msra.gmra.mxu2 %v3843_v34  ;;  %6249 = vst [vmem:[#allocation21_spill] sm:$0xff] %v4577_v13  ;;  %v3578_v20 = vld [vmem:[#allocation5 + $0x150] sm:$0xf0]  ;;  %v4594_v23 = vor.u32 %v3953_v18, %v3576_v17  ;;  %v3560_v25 = vld [vmem:[#allocation5 + $0x120] sm:$0xf] }
  0x34   :  { %930 = vmatpush.bf16.msrb.mxu2 %v4563_v61  ;;  %6251 = vst [vmem:[#allocation23_spill] sm:$0xff] %v4583_v16  ;;  %v4596_v24 = vor.u32 %v3951_v19, %v3578_v20  ;;  %v3949_v26 = vld [vmem:[#allocation5 + $0x12c] sm:$0xf0]  ;;  %v3947_v27 = vld [vmem:[#allocation5 + $0x124] sm:$0xf] }
  0x35   :  { %918 = vmatpush.bf16.msrb.mxu1 %v4550_v44  ;;  %6252 = vst [vmem:[#allocation24_spill] sm:$0xff] %v4587_v21  ;;  %v3562_v28 = vld [vmem:[#allocation5 + $0x130] sm:$0xf0]  ;;  %v4601_v29 = vor.u32 %v3949_v26, %v3560_v25  ;;  %v3544_v31 = vld [vmem:[#allocation5 + $0x100] sm:$0xf] }
  0x36   :  { %944 = vmatpush.bf16.msrb.mxu3 %v4552_v45  ;;  %905 = vmatpush.bf16.msrb.mxu0 %v4565_v0  ;;  %6253 = vst [vmem:[#allocation25_spill] sm:$0xff] %v4594_v23  ;;  %v4603_v30 = vor.u32 %v3947_v27, %v3562_v28  ;;  %v3945_v32 = vld [vmem:[#allocation5 + $0x10c] sm:$0xf0]  ;;  %v3943_v33 = vld [vmem:[#allocation5 + $0x104] sm:$0xf] }
  0x37   :  { %6254 = vst [vmem:[#allocation26_spill] sm:$0xff] %v4596_v24  ;;  %v3546_v34 = vld [vmem:[#allocation5 + $0x110] sm:$0xf0]  ;;  %v3664_v35 = vld [vmem:[#allocation5 + $0x1e8] sm:$0xf]  ;;  %v4607_v41 = vor.u32 %v3945_v32, %v3544_v31 }
  0x38   :  { %931 = vmatpush.bf16.msrb.mxu2 %v4575_v9  ;;  %6255 = vst [vmem:[#allocation27_spill] sm:$0xff] %v4601_v29  ;;  %v3974_v36 = vld [vmem:[#allocation5 + $0x1f4] sm:$0xf0]  ;;  %v3972_v39 = vld [vmem:[#allocation5 + $0x1ec] sm:$0xf]  ;;  %v4609_v42 = vor.u32 %v3943_v33, %v3546_v34 }
  0x39   :  { %919 = vmatpush.bf16.msrb.mxu1 %v4558_v53  ;;  %6256 = vst [vmem:[#allocation28_spill] sm:$0xff] %v4603_v30  ;;  %v3666_v40 = vld [vmem:[#allocation5 + $0x1f8] sm:$0xf0]  ;;  %v4611_v43 = vor.u32 %v3974_v36, %v3664_v35  ;;  %v3648_v47 = vld [vmem:[#allocation5 + $0x1c8] sm:$0xf] }
  0x3a   :  { %945 = vmatpush.bf16.msrb.mxu3 %v4560_v54  ;;  %906 = vmatpush.bf16.msrb.mxu0 %v4577_v13  ;;  %6257 = vst [vmem:[#allocation29_spill] sm:$0xff] %v4607_v41  ;;  %v4613_v46 = vor.u32 %v3972_v39, %v3666_v40  ;;  %v3970_v48 = vld [vmem:[#allocation5 + $0x1d4] sm:$0xf0]  ;;  %v3968_v49 = vld [vmem:[#allocation5 + $0x1cc] sm:$0xf] }
  0x3b   :  { %6258 = vst [vmem:[#allocation30_spill] sm:$0xff] %v4609_v42  ;;  %v3650_v50 = vld [vmem:[#allocation5 + $0x1d8] sm:$0xf0]  ;;  %v4622_v55 = vor.u32 %v3970_v48, %v3648_v47  ;;  %v3632_v57 = vld [vmem:[#allocation5 + $0x1a8] sm:$0xf] }
  0x3c   :  { %932 = vmatpush.bf16.msrb.mxu2 %v4587_v21  ;;  %6259 = vst [vmem:[#allocation31_spill] sm:$0xff] %v4611_v43  ;;  %v4624_v56 = vor.u32 %v3968_v49, %v3650_v50  ;;  %v3966_v58 = vld [vmem:[#allocation5 + $0x1b4] sm:$0xf0]  ;;  %v3964_v59 = vld [vmem:[#allocation5 + $0x1ac] sm:$0xf] }
  0x3d   :  { %920 = vmatpush.bf16.msrb.mxu1 %v4569_v1  ;;  %6260 = vst [vmem:[#allocation32_spill] sm:$0xff] %v4613_v46  ;;  %v3634_v60 = vld [vmem:[#allocation5 + $0x1b8] sm:$0xf0]  ;;  %v4628_v62 = vor.u32 %v3966_v58, %v3632_v57  ;;  %v3616_v3 = vld [vmem:[#allocation5 + $0x188] sm:$0xf] }
  0x3e   :  { %946 = vmatpush.bf16.msrb.mxu3 %v4571_v2  ;;  %6261 = vst [vmem:[#allocation33_spill] sm:$0xff] %v4622_v55  ;;  %v4630_v63 = vor.u32 %v3964_v59, %v3634_v60  ;;  %v3962_v4 = vld [vmem:[#allocation5 + $0x194] sm:$0xf0]  ;;  %v3960_v5 = vld [vmem:[#allocation5 + $0x18c] sm:$0xf] }
  0x3f   :  { %311 = vmatmul.bf16.gmra.mxu0 %v3844_v22  ;;  %6262 = vst [vmem:[#allocation34_spill] sm:$0xff] %v4624_v56  ;;  %v3618_v6 = vld [vmem:[#allocation5 + $0x198] sm:$0xf0]  ;;  %v4634_v7 = vor.u32 %v3962_v4, %v3616_v3  ;;  %v3480_v11 = vld [vmem:[#allocation5 + $0x80] sm:$0xf] }
  0x40   :  { %340 = vmatmul.bf16.gmra.mxu1 %v3844_v22  ;;  %6263 = vst [vmem:[#allocation35_spill] sm:$0xff] %v4628_v62  ;;  %v4636_v8 = vor.u32 %v3960_v5, %v3618_v6  ;;  %v3929_v12 = vld [vmem:[#allocation5 + $0x8c] sm:$0xf0]  ;;  %v3927_v14 = vld [vmem:[#allocation5 + $0x84] sm:$0xf] }
  0x41   :  { %921 = vmatpush.bf16.msrb.mxu1 %v4581_v15  ;;  %398 = vmatmul.bf16.gmra.mxu3 %v3844_v22  ;;  %6264 = vst [vmem:[#allocation36_spill] sm:$0xff] %v4630_v63  ;;  %v4643_v17 = vor.u32 %v3929_v12, %v3480_v11  ;;  %v3482_v18 = vld [vmem:[#allocation5 + $0x90] sm:$0xf0]  ;;  %v3600_v19 = vld [vmem:[#allocation5 + $0x168] sm:$0xf] }
  0x42   :  { %947 = vmatpush.bf16.msrb.mxu3 %v4583_v16  ;;  %6265 = vst [vmem:[#allocation37_spill] sm:$0xff] %v4634_v7  ;;  %v4645_v20 = vor.u32 %v3927_v14, %v3482_v18  ;;  %v3956_v25 = vld [vmem:[#allocation5 + $0x16c] sm:$0xf]  ;;  %v3602_v26 = vld [vmem:[#allocation5 + $0x178] sm:$0xf0] }
  0x43   :  { %369 = vmatmul.bf16.gmra.mxu2 %v3844_v22  ;;  %6266 = vst [vmem:[#allocation38_spill] sm:$0xff] %v4636_v8  ;;  %v3958_v22 = vld [vmem:[#allocation5 + $0x174] sm:$0xf0]  ;;  %907 = vmatpush.bf16.msrb.mxu0 %v4643_v17  ;;  %v4650_v28 = vor.u32 %v3956_v25, %v3602_v26  ;;  %v3464_v31 = vld [vmem:[#allocation5 + $0x60] sm:$0xf] }
  0x44   :  { %6267 = vst [vmem:[#allocation39_spill] sm:$0xff] %v4643_v17  ;;  %v4648_v27 = vor.u32 %v3958_v22, %v3600_v19  ;;  %933 = vmatpush.bf16.msrb.mxu2 %v4645_v20  ;;  %v3925_v32 = vld [vmem:[#allocation5 + $0x6c] sm:$0xf0]  ;;  %v3923_v33 = vld [vmem:[#allocation5 + $0x64] sm:$0xf] }
  0x45   :  { %922 = vmatpush.bf16.msrb.mxu1 %v4594_v23  ;;  %6268 = vst [vmem:[#allocation40_spill] sm:$0xff] %v4645_v20  ;;  %v4655_v34 = vor.u32 %v3925_v32, %v3464_v31  ;;  %v3466_v35 = vld [vmem:[#allocation5 + $0x70] sm:$0xf0]  ;;  %v3584_v36 = vld [vmem:[#allocation5 + $0x148] sm:$0xf] }
  0x46   :  { %948 = vmatpush.bf16.msrb.mxu3 %v4596_v24  ;;  %6269 = vst [vmem:[#allocation41_spill] sm:$0xff] %v4648_v27  ;;  %v3954_v39 = vld [vmem:[#allocation5 + $0x154] sm:$0xf0]  ;;  %v4657_v40 = vor.u32 %v3923_v33, %v3466_v35  ;;  %v3952_v48 = vld [vmem:[#allocation5 + $0x14c] sm:$0xf] }
  0x47   :  { %6270 = vst [vmem:[#allocation42_spill] sm:$0xff] %v4650_v28  ;;  %v4659_v47 = vor.u32 %v3954_v39, %v3584_v36  ;;  %v3586_v49 = vld [vmem:[#allocation5 + $0x158] sm:$0xf0]  ;;  %908 = vmatpush.bf16.msrb.mxu0 %v4655_v34  ;;  %v3921_v57 = vld [vmem:[#allocation5 + $0x4c] sm:$0xf0] }
  0x48   :  { %6271 = vst [vmem:[#allocation43_spill] sm:$0xff] %v4655_v34  ;;  %v4662_v50 = vor.u32 %v3952_v48, %v3586_v49  ;;  %934 = vmatpush.bf16.msrb.mxu2 %v4657_v40  ;;  %v3919_v58 = vld [vmem:[#allocation5 + $0x44] sm:$0xf]  ;;  %v3450_v60 = vld [vmem:[#allocation5 + $0x50] sm:$0xf0] }
  0x49   :  { %923 = vmatpush.bf16.msrb.mxu1 %v4601_v29  ;;  %6272 = vst [vmem:[#allocation44_spill] sm:$0xff] %v4657_v40  ;;  %v3568_v3 = vld [vmem:[#allocation5 + $0x128] sm:$0xf]  ;;  %v3950_v4 = vld [vmem:[#allocation5 + $0x134] sm:$0xf0]  ;;  %v4669_v5 = vor.u32 %v3919_v58, %v3450_v60 }
  0x4a   :  { %949 = vmatpush.bf16.msrb.mxu3 %v4603_v30  ;;  %6273 = vst [vmem:[#allocation45_spill] sm:$0xff] %v4659_v47  ;;  %v4671_v6 = vor.u32 %v3950_v4, %v3568_v3  ;;  %v3570_v11 = vld [vmem:[#allocation5 + $0x138] sm:$0xf0]  ;;  %v3432_v14 = vld [vmem:[#allocation5 + $0x20] sm:$0xf] }
  0x4b   :  { %6274 = vst [vmem:[#allocation46_spill] sm:$0xff] %v4662_v50  ;;  %v3917_v18 = vld [vmem:[#allocation5 + $0x2c] sm:$0xf0]  ;;  %v3915_v19 = vld [vmem:[#allocation5 + $0x24] sm:$0xf] }
  0x4c   :  { %6276 = vst [vmem:[#allocation48_spill] sm:$0xff] %v4669_v5  ;;  %935 = vmatpush.bf16.msrb.mxu2 %v4669_v5  ;;  %v4679_v22 = vor.u32 %v3917_v18, %v3432_v14  ;;  %v3434_v25 = vld [vmem:[#allocation5 + $0x30] sm:$0xf0]  ;;  %v3552_v26 = vld [vmem:[#allocation5 + $0x108] sm:$0xf] }
  0x4d   :  { %924 = vmatpush.bf16.msrb.mxu1 %v4607_v41  ;;  %6277 = vst [vmem:[#allocation49_spill] sm:$0xff] %v4671_v6  ;;  %v3946_v31 = vld [vmem:[#allocation5 + $0x114] sm:$0xf0]  ;;  %v4681_v32 = vor.u32 %v3915_v19, %v3434_v25  ;;  %v3944_v35 = vld [vmem:[#allocation5 + $0x10c] sm:$0xf] }
  0x4e   :  { %950 = vmatpush.bf16.msrb.mxu3 %v4609_v42  ;;  %6279 = vst [vmem:[#allocation51_spill] sm:$0xff] %v4679_v22  ;;  %v4683_v33 = vor.u32 %v3946_v31, %v3552_v26  ;;  %v3554_v36 = vld [vmem:[#allocation5 + $0x118] sm:$0xf0]  ;;  %v3907_v39 = vld [vmem:[#allocation3 + $0xe4] sm:$0xf] }
  0x4f   :  { %316 = vmatmul.bf16.gmra.mxu0 %v3845_v51  ;;  %6280 = vst [vmem:[#allocation52_spill] sm:$0xff] %v4681_v32  ;;  %v4686_v48 = vor.u32 %v3944_v35, %v3554_v36  ;;  %v3786_v49 = vld [vmem:[#allocation3 + $0xf0] sm:$0xf0]  ;;  %v3794_v60 = vld [vmem:[#allocation3 + $0xf8] sm:$0xf0] }
  0x50   :  { %345 = vmatmul.bf16.gmra.mxu1 %v3845_v51  ;;  %6281 = vst [vmem:[#allocation53_spill] sm:$0xff] %v4683_v33  ;;  %936 = vmatpush.bf16.msrb.mxu2 %v4681_v32  ;;  %v4690_v58 = vor.u32 %v3907_v39, %v3786_v49  ;;  %v3416_v3 = vld [vmem:[#allocation5] sm:$0xf]  ;;  %v3913_v4 = vld [vmem:[#allocation5 + $0xc] sm:$0xf0] }
  0x51   :  { %969 = vmatpush.bf16.msra.mxu1 %v4611_v43  ;;  %403 = vmatmul.bf16.gmra.mxu3 %v3845_v51  ;;  %6282 = vst [vmem:[#allocation54_spill] sm:$0xff] %v4686_v48  ;;  %v3911_v14 = vld [vmem:[#allocation5 + $0x4] sm:$0xf]  ;;  %v3418_v18 = vld [vmem:[#allocation5 + $0x10] sm:$0xf0] }
  0x52   :  { %995 = vmatpush.bf16.msra.mxu3 %v4613_v46  ;;  %6283 = vst [vmem:[#allocation55_spill] sm:$0xff] %v4690_v58  ;;  %v3536_v19 = vld [vmem:[#allocation5 + $0xe8] sm:$0xf]  ;;  %v4700_v25 = vor.u32 %v3911_v14, %v3418_v18  ;;  %v3942_v26 = vld [vmem:[#allocation5 + $0xf4] sm:$0xf0] }
  0x53   :  { %374 = vmatmul.bf16.gmra.mxu2 %v3845_v51  ;;  %v3448_v51 = vld [vmem:[#allocation5 + $0x40] sm:$0xf]  ;;  %v3940_v31 = vld [vmem:[#allocation5 + $0xec] sm:$0xf]  ;;  %v3538_v35 = vld [vmem:[#allocation5 + $0xf8] sm:$0xf0]  ;;  %v4704_v36 = vor.u32 %v3942_v26, %v3536_v19 }
  0x54   :  { %v4667_v59 = vor.u32 %v3921_v57, %v3448_v51  ;;  %v3908_v51 = vld [vmem:[#allocation3 + $0xec] sm:$0xf]  ;;  %v6052_v57 = vmov 0   ;;  %6286 = vst [vmem:[#allocation58_spill] sm:$0xff] %v4700_v25  ;;  %v4706_v39 = vor.u32 %v3940_v31, %v3538_v35  ;;  %v3903_v49 = vld [vmem:[#allocation3 + $0xc4] sm:$0xf]  ;;  %937 = vmatpush.bf16.msrb.mxu2 %v4700_v25 }
  0x55   :  { %970 = vmatpush.bf16.msra.mxu1 %v4622_v55  ;;  %6287 = vst [vmem:[#allocation59_spill] sm:$0xff] %v4704_v36  ;;  %v3520_v18 = vld [vmem:[#allocation5 + $0xc8] sm:$0xf]  ;;  %v3936_v26 = vld [vmem:[#allocation5 + $0xcc] sm:$0xf] }
  0x56   :  { %996 = vmatpush.bf16.msra.mxu3 %v4624_v56  ;;  %6275 = vst [vmem:[#allocation47_spill] sm:$0xff] %v4667_v59  ;;  %909 = vmatpush.bf16.msrb.mxu0 %v4667_v59  ;;  %v3522_v31 = vld [vmem:[#allocation5 + $0xd8] sm:$0xf0]  ;;  %v3899_v35 = vld [vmem:[#allocation3 + $0xa4] sm:$0xf] }
  0x57   :  { %6288 = vst [vmem:[#allocation60_spill] sm:$0xff] %v4706_v39 }
  0x58   :  { %982 = vmatpush.bf16.msra.mxu2 %v4706_v39  ;;  %v3895_v39 = vld [vmem:[#allocation3 + $0x84] sm:$0xf] }
  0x59   :  { %971 = vmatpush.bf16.msra.mxu1 %v4628_v62 }
  0x5a   :  { %997 = vmatpush.bf16.msra.mxu3 %v4630_v63  ;;  %910 = vmatpush.bf16.msrb.mxu0 %v4679_v22  ;;  %v3714_v22 = vld [vmem:[#allocation3 + $0x58] sm:$0xf0] }
  0x5d   :  { %972 = vmatpush.bf16.msra.mxu1 %v4634_v7 }
  0x5e   :  { %998 = vmatpush.bf16.msra.mxu3 %v4636_v8 }
  0x5f   :  { %321 = vmatmul.bf16.gmra.mxu0 %v3846_v10 }
  0x60   :  { %350 = vmatmul.bf16.gmra.mxu1 %v3846_v10 }
  0x61   :  { %408 = vmatmul.bf16.gmra.mxu3 %v3846_v10  ;;  %973 = vmatpush.bf16.msra.mxu1 %v4648_v27 }
  0x62   :  { %999 = vmatpush.bf16.msra.mxu3 %v4650_v28 }
  0x63   :  { %379 = vmatmul.bf16.gmra.mxu2 %v3846_v10  ;;  %v3948_v10 = vld [vmem:[#allocation5 + $0x12c] sm:$0xf] }
  0x64   :  { %v4674_v12 = vor.u32 %v3948_v10, %v3570_v11  ;;  %v4694_v10 = vor.u32 %v3908_v51, %v3794_v60  ;;  %v4696_v11 = vor.u32 %v3913_v4, %v3416_v3  ;;  %v3770_v51 = vld [vmem:[#allocation3 + $0xd0] sm:$0xf0]  ;;  %v3904_v60 = vld [vmem:[#allocation3 + $0xcc] sm:$0xf]  ;;  %v3778_v4 = vld [vmem:[#allocation3 + $0xd8] sm:$0xf0] }
  0x65   :  { %974 = vmatpush.bf16.msra.mxu1 %v4659_v47  ;;  %v4709_v3 = vor.u32 %v3903_v49, %v3770_v51  ;;  %v4713_v14 = vor.u32 %v3904_v60, %v3778_v4  ;;  %v4719_v49 = vor.u32 %v3936_v26, %v3522_v31  ;;  %v3754_v51 = vld [vmem:[#allocation3 + $0xb0] sm:$0xf0]  ;;  %v4724_v60 = vld [vmem:[%s6046_s3] sm:$0xf]  ;;  %v3932_v26 = vld [vmem:[#allocation5 + $0xac] sm:$0xf] }
  0x66   :  { %1000 = vmatpush.bf16.msra.mxu3 %v4662_v50  ;;  %6278 = vst [vmem:[#allocation50_spill] sm:$0xff] %v4674_v12  ;;  %911 = vmatpush.bf16.msrb.mxu0 %v4696_v11  ;;  %v4726_v4 = vor.u32 %v3899_v35, %v3754_v51  ;;  %v3746_v51 = vld [vmem:[#allocation3 + $0x98] sm:$0xf0] }
  0x67   :  { %6284 = vst [vmem:[#allocation56_spill] sm:$0xff] %v4694_v10  ;;  %983 = vmatpush.bf16.msra.mxu2 %v4719_v49 }
  0x68   :  { %6285 = vst [vmem:[#allocation57_spill] sm:$0xff] %v4696_v11 }
  0x69   :  { %975 = vmatpush.bf16.msra.mxu1 %v4671_v6  ;;  %6289 = vst [vmem:[#allocation61_spill] sm:$0xff] %v4709_v3 }
  0x6a   :  { %1001 = vmatpush.bf16.msra.mxu3 %v4674_v12  ;;  %956 = vmatpush.bf16.msra.mxu0 %v4704_v36  ;;  %6290 = vst [vmem:[#allocation62_spill] sm:$0xff] %v4713_v14  ;;  %v3738_v36 = vld [vmem:[#allocation3 + $0x90] sm:$0xf0] }
  0x6b   :  { %6292 = vst [vmem:[#allocation64_spill] sm:$0xff] %v4719_v49  ;;  %v4741_v49 = vperm.slane %v4724_v60, 0 }
  0x6c   :  { %6293 = vst [vmem:[#allocation65_spill] sm:$0xff] %v4726_v4 }
  0x6d   :  { %976 = vmatpush.bf16.msra.mxu1 %v4683_v33  ;;  %6298 = vst [vmem:[#allocation70_spill] sm:$0xff] %v4741_v49 }
  0x6e   :  { %1002 = vmatpush.bf16.msra.mxu3 %v4686_v48 }
  0x70   :  { %925 = vmatmul.bf16.vlgmr.msrb.gmra.mxu1 %v6052_v57 }
  0x71   :  { %951 = vmatmul.bf16.vlgmr.msrb.gmra.mxu3 %v6052_v57  ;;  %1181 = vmatpush.bf16.msrb.mxu1 %v4690_v58  ;;  %v3938_v57 = vld [vmem:[#allocation5 + $0xd4] sm:$0xf0]  ;;  %v3762_v58 = vld [vmem:[#allocation3 + $0xb8] sm:$0xf0] }
  0x72   :  { %1207 = vmatpush.bf16.msrb.mxu3 %v4694_v10  ;;  %v4716_v19 = vor.u32 %v3938_v57, %v3520_v18  ;;  %v3900_v10 = vld [vmem:[#allocation3 + $0xac] sm:$0xf]  ;;  %v3504_v57 = vld [vmem:[#allocation5 + $0xa8] sm:$0xf]  ;;  %v3934_v18 = vld [vmem:[#allocation5 + $0xb4] sm:$0xf0] }
  0x73   :  { %v4733_v31 = vor.u32 %v3934_v18, %v3504_v57  ;;  %v3488_v57 = vld [vmem:[#allocation5 + $0x88] sm:$0xf]  ;;  %v3930_v18 = vld [vmem:[#allocation5 + $0x94] sm:$0xf0] }
  0x74   :  { %6291 = vst [vmem:[#allocation63_spill] sm:$0xff] %v4716_v19  ;;  %957 = vmatpush.bf16.msra.mxu0 %v4716_v19  ;;  %v4744_v19 = vperm.slane %v4724_v60, 1 }
  0x75   :  { %1182 = vmatpush.bf16.msrb.mxu1 %v4709_v3  ;;  %v4728_v3 = vor.u32 %v3900_v10, %v3762_v58  ;;  %6295 = vst [vmem:[#allocation67_spill] sm:$0xff] %v4733_v31  ;;  %v4738_v58 = vor.u32 %v3895_v39, %v3738_v36  ;;  %v3896_v10 = vld [vmem:[#allocation3 + $0x8c] sm:$0xf]  ;;  %v4751_v36 = vor.u32 %v3930_v18, %v3488_v57  ;;  %v3490_v39 = vld [vmem:[#allocation5 + $0x98] sm:$0xf0] }
  0x76   :  { %1208 = vmatpush.bf16.msrb.mxu3 %v4713_v14  ;;  %v3506_v14 = vld [vmem:[#allocation5 + $0xb8] sm:$0xf0]  ;;  %6299 = vst [vmem:[#allocation71_spill] sm:$0xff] %v4744_v19  ;;  %v3472_v18 = vld [vmem:[#allocation5 + $0x68] sm:$0xf] }
  0x77   :  { %6294 = vst [vmem:[#allocation66_spill] sm:$0xff] %v4728_v3  ;;  %v4736_v35 = vor.u32 %v3932_v26, %v3506_v14  ;;  %v3928_v14 = vld [vmem:[#allocation5 + $0x8c] sm:$0xf]  ;;  %v3891_v26 = vld [vmem:[#allocation3 + $0x64] sm:$0xf] }
  0x78   :  { %6297 = vst [vmem:[#allocation69_spill] sm:$0xff] %v4738_v58  ;;  %958 = vmatpush.bf16.msra.mxu0 %v4733_v31  ;;  %v4754_v25 = vor.u32 %v3928_v14, %v3490_v39  ;;  %v3730_v31 = vld [vmem:[#allocation3 + $0x78] sm:$0xf0]  ;;  %v3924_v14 = vld [vmem:[#allocation5 + $0x6c] sm:$0xf] }
  0x79   :  { %1183 = vmatpush.bf16.msrb.mxu1 %v4726_v4  ;;  %6296 = vst [vmem:[#allocation68_spill] sm:$0xff] %v4736_v35  ;;  %v4746_v4 = vor.u32 %v3896_v10, %v3746_v51  ;;  %984 = vmatpush.bf16.msra.mxu2 %v4736_v35  ;;  %v3892_v51 = vld [vmem:[#allocation3 + $0x6c] sm:$0xf]  ;;  %v6304_v35 = vmov 0  }
  0x7a   :  { %1209 = vmatpush.bf16.msrb.mxu3 %v4728_v3  ;;  %6301 = vst [vmem:[#allocation73_spill] sm:$0xff] %v4751_v36  ;;  %v3722_v3 = vld [vmem:[#allocation3 + $0x70] sm:$0xf0]  ;;  %v4759_v32 = vor.u32 %v3892_v51, %v3730_v31  ;;  %v3474_v31 = vld [vmem:[#allocation5 + $0x78] sm:$0xf0] }
  0x7b   :  { %6300 = vst [vmem:[#allocation72_spill] sm:$0xff] %v4746_v4  ;;  %v4756_v10 = vor.u32 %v3891_v26, %v3722_v3  ;;  %v3887_v26 = vld [vmem:[#allocation3 + $0x44] sm:$0xf]  ;;  %v3706_v51 = vld [vmem:[#allocation3 + $0x50] sm:$0xf0] }
  0x7c   :  { %6302 = vst [vmem:[#allocation74_spill] sm:$0xff] %v4754_v25  ;;  %959 = vmatpush.bf16.msra.mxu0 %v4751_v36  ;;  %v3888_v36 = vld [vmem:[#allocation3 + $0x4c] sm:$0xf] }
  0x7d   :  { %1184 = vmatpush.bf16.msrb.mxu1 %v4738_v58  ;;  %6303 = vst [vmem:[#allocation75_spill] sm:$0xff] %v4756_v10  ;;  %985 = vmatpush.bf16.msra.mxu2 %v4754_v25  ;;  %v4772_v25 = vor.u32 %v3887_v26, %v3706_v51  ;;  %v3690_v26 = vld [vmem:[#allocation3 + $0x30] sm:$0xf0] }
  0x7e   :  { %1210 = vmatpush.bf16.msrb.mxu3 %v4746_v4  ;;  %6305 = vst [vmem:[#allocation76_spill] sm:$0xff] %v4759_v32  ;;  %v3926_v4 = vld [vmem:[#allocation5 + $0x74] sm:$0xf0] }
  0x7f   :  { %v4767_v39 = vor.u32 %v3926_v4, %v3472_v18  ;;  %6308 = vst [vmem:[#allocation79_spill] sm:$0xff] %v4772_v25  ;;  %v3456_v4 = vld [vmem:[#allocation5 + $0x48] sm:$0xf]  ;;  %v3920_v18 = vld [vmem:[#allocation5 + $0x4c] sm:$0xf] }
  0x80   :  { %977 = vmatmul.bf16.vlgmr.msra.gmra.mxu1 %v6304_v35 }
  0x81   :  { %1003 = vmatmul.bf16.vlgmr.msra.gmra.mxu3 %v6304_v35  ;;  %1185 = vmatpush.bf16.msrb.mxu1 %v4756_v10  ;;  %6306 = vst [vmem:[#allocation77_spill] sm:$0xff] %v4767_v39  ;;  %v4777_v35 = vor.u32 %v3888_v36, %v3714_v22 }
  0x82   :  { %1211 = vmatpush.bf16.msrb.mxu3 %v4759_v32  ;;  %960 = vmatpush.bf16.msra.mxu0 %v4767_v39  ;;  %v3698_v32 = vld [vmem:[#allocation3 + $0x38] sm:$0xf0] }
  0x83   :  { %6310 = vst [vmem:[#allocation81_spill] sm:$0xff] %v4777_v35 }
  0x85   :  { %1186 = vmatpush.bf16.msrb.mxu1 %v4772_v25 }
  0x86   :  { %1212 = vmatpush.bf16.msrb.mxu3 %v4777_v35  ;;  %v3682_v35 = vld [vmem:[#allocation3 + $0x18] sm:$0xf0] }
  0xac   :  { %v307_v11 = vpop.f32.mrf.mxu0 }
  0xad   :  { %v308_v58 = vadd.f32 %v307_v11, %v4741_v49  ;;  %v336_v57 = vpop.f32.mrf.mxu1  ;;  %v4770_v49 = vor.u32 %v3924_v14, %v3474_v31  ;;  %v3458_v31 = vld [vmem:[#allocation5 + $0x58] sm:$0xf0] }
  0xae   :  { %v337_v3 = vadd.f32 %v336_v57, %v4744_v19  ;;  %v4775_v57 = vperm.slane %v4724_v60, 3  ;;  %v4785_v22 = vor.u32 %v3920_v18, %v3458_v31  ;;  %v3442_v31 = vld [vmem:[#allocation5 + $0x38] sm:$0xf0] }
  0xaf   :  { %v3411_v11 = vmul.f32 -1.442695, %v308_v58  ;;  %6307 = vst [vmem:[#allocation78_spill] sm:$0xff] %v4770_v49  ;;  %986 = vmatpush.bf16.msra.mxu2 %v4770_v49  ;;  %v3922_v58 = vld [vmem:[#allocation5 + $0x54] sm:$0xf0] }
  0xb0   :  { %v3412_v5 = vmul.f32 -1.442695, %v337_v3  ;;  %6309 = vst [vmem:[#allocation80_spill] sm:$0xff] %v4775_v57  ;;  %v4782_v14 = vor.u32 %v3922_v58, %v3456_v4  ;;  %v3883_v3 = vld [vmem:[#allocation3 + $0x24] sm:$0xf] }
  0xb1   :  { %3982 = vpow2.f32 %v3411_v11  ;;  %6312 = vst [vmem:[#allocation83_spill] sm:$0xff] %v4785_v22  ;;  %v4787_v36 = vor.u32 %v3883_v3, %v3690_v26  ;;  %v3884_v11 = vld [vmem:[#allocation3 + $0x2c] sm:$0xf]  ;;  %v3918_v4 = vld [vmem:[#allocation5 + $0x34] sm:$0xf0] }
  0xb2   :  { %3984 = vpow2.f32 %v3412_v5  ;;  %6311 = vst [vmem:[#allocation82_spill] sm:$0xff] %v4782_v14  ;;  %v4790_v19 = vor.u32 %v3884_v11, %v3698_v32  ;;  %961 = vmatpush.bf16.msra.mxu0 %v4782_v14  ;;  %v3440_v5 = vld [vmem:[#allocation5 + $0x28] sm:$0xf]  ;;  %v3916_v58 = vld [vmem:[#allocation5 + $0x2c] sm:$0xf] }
  0xb3   :  { %6313 = vst [vmem:[#allocation84_spill] sm:$0xff] %v4787_v36  ;;  %987 = vmatpush.bf16.msra.mxu2 %v4785_v22  ;;  %1187 = vmatpush.bf16.msrb.mxu1 %v4787_v36  ;;  %v4795_v18 = vor.u32 %v3918_v4, %v3440_v5  ;;  %v3879_v3 = vld [vmem:[#allocation3 + $0x4] sm:$0xf]  ;;  %v3674_v32 = vld [vmem:[#allocation3 + $0x10] sm:$0xf0]  ;;  %v4803_v36 = vperm.slane %v4724_v60, 2 }
  0xb4   :  { %v394_v51 = vpop.f32.mrf.mxu3  ;;  %6314 = vst [vmem:[#allocation85_spill] sm:$0xff] %v4790_v19  ;;  %1213 = vmatpush.bf16.msrb.mxu3 %v4790_v19  ;;  %v3880_v11 = vld [vmem:[#allocation3 + $0xc] sm:$0xf]  ;;  %v4800_v14 = vor.u32 %v3879_v3, %v3674_v32  ;;  %v3424_v4 = vld [vmem:[#allocation5 + $0x8] sm:$0xf] }
  0xb5   :  { %v395_v10 = vadd.f32 %v394_v51, %v4775_v57  ;;  %6315 = vst [vmem:[#allocation86_spill] sm:$0xff] %v4795_v18  ;;  %v4798_v51 = vor.u32 %v3916_v58, %v3442_v31  ;;  %v4807_v5 = vor.u32 %v3880_v11, %v3682_v35  ;;  %v3914_v58 = vld [vmem:[#allocation5 + $0x14] sm:$0xf0]  ;;  %v3912_v31 = vld [vmem:[#allocation5 + $0xc] sm:$0xf] }
  0xb6   :  { %6317 = vst [vmem:[#allocation88_spill] sm:$0xff] %v4800_v14  ;;  %962 = vmatpush.bf16.msra.mxu0 %v4795_v18  ;;  %v365_v60 = vpop.f32.mrf.mxu2 }
  0xb7   :  { %v3413_v25 = vmul.f32 -1.442695, %v395_v10  ;;  %v3983_v26 = vpop.eup %3982  ;;  %6316 = vst [vmem:[#allocation87_spill] sm:$0xff] %v4798_v51  ;;  %988 = vmatpush.bf16.msra.mxu2 %v4798_v51  ;;  %1188 = vmatpush.bf16.msrb.mxu1 %v4800_v14 }
  0xb8   :  { %v3985_v57 = vpop.eup %3984  ;;  %v514_v22 = vadd.f32 1.0, %v3983_v26  ;;  %6318 = vst [vmem:[#allocation89_spill] sm:$0xff] %v4803_v36  ;;  %1214 = vmatpush.bf16.msrb.mxu3 %v4807_v5  ;;  %v366_v26 = vadd.f32 %v365_v60, %v4803_v36 }
  0xb9   :  { %3986 = vpow2.f32 %v3413_v25  ;;  %v533_v10 = vadd.f32 1.0, %v3985_v57  ;;  %6319 = vst [vmem:[#allocation90_spill] sm:$0xff] %v4807_v5  ;;  %v3426_v25 = vld [vmem:[#allocation5 + $0x18] sm:$0xf0]  ;;  %v4813_v57 = vor.u32 %v3914_v58, %v3424_v4 }
  0xba   :  { %3988 = vrcp.f32 %v514_v22  ;;  %v4815_v3 = vor.u32 %v3912_v31, %v3426_v25  ;;  %v526_v25 = vand.u32 2147483648, %v514_v22  ;;  %v524_v5 = vand.u32 2147483647, %v514_v22 }
  0xbb   :  { %3990 = vrcp.f32 %v533_v10  ;;  %1365 = vmatpush.bf16.msra.mxu1 %v4544_v37  ;;  %6320 = vst [vmem:[#allocation91_spill] sm:$0xff] %v4813_v57  ;;  %963 = vmatpush.bf16.msra.mxu0 %v4813_v57  ;;  %v545_v60 = vand.u32 2147483648, %v533_v10  ;;  %vm520_vm2 = vweird.f32 %v514_v22  ;;  %vm539_vm3 = vweird.f32 %v533_v10 }
  0xbc   :  { %1391 = vmatpush.bf16.msra.mxu3 %v4546_v38  ;;  %6321 = vst [vmem:[#allocation92_spill] sm:$0xff] %v4815_v3  ;;  %989 = vmatpush.bf16.msra.mxu2 %v4815_v3  ;;  %vm525_vm5 = vcmp.eq.f32.partialorder %v524_v5, 8.507059e+37 }
  0xbf   :  { %v3987_v35 = vpop.eup %3986  ;;  %1366 = vmatpush.bf16.msra.mxu1 %v4550_v44  ;;  %v543_v44 = vand.u32 2147483647, %v533_v10 }
  0xc0   :  { %v553_v32 = vadd.f32 1.0, %v3987_v35  ;;  %v3989_v11 = vpop.eup %3988  ;;  %1392 = vmatpush.bf16.msra.mxu3 %v4552_v45 }
  0xc1   :  { %v3991_v37 = vpop.eup %3990  ;;  %v516_v38 = vmul.f32 %v3989_v11, %v514_v22  ;;  %vm521_vm0 = vweird.f32 %v3989_v11  ;;  %vm544_vm7 = vcmp.eq.f32.partialorder %v543_v44, 8.507059e+37 }
  0xc2   :  { %3992 = vrcp.f32 %v553_v32  ;;  %v535_v4 = vmul.f32 %v3991_v37, %v533_v10  ;;  %vm540_vm1 = vweird.f32 %v3991_v37  ;;  %vm522_vm4 = vmor %vm520_vm2, %vm521_vm0  ;;  %vm559_vm9 = vweird.f32 %v553_v32 }
  0xc3   :  { %3994 = vtanh.f32 %v366_v26  ;;  %v517_v58 = vsub.f32 1.0, %v516_v38  ;;  %1367 = vmatpush.bf16.msra.mxu1 %v4558_v53  ;;  %v527_v38 = vor.u32 1.1754944e-38, %v526_v25  ;;  %vm541_vm6 = vmor %vm539_vm3, %vm540_vm1 }
  0xc4   :  { %v536_v31 = vsub.f32 1.0, %v535_v4  ;;  %1393 = vmatpush.bf16.msra.mxu3 %v4560_v54  ;;  %v546_v54 = vor.u32 1.1754944e-38, %v545_v60  ;;  %v3910_v60 = vld [vmem:[#allocation3 + $0xf4] sm:$0xf0] }
  0xc5   :  { %v518_v35 = vmul.f32 %v3989_v11, %v517_v58 }
  0xc6   :  { %v537_v14 = vmul.f32 %v3991_v37, %v536_v31 }
  0xc7   :  { %v519_v19 = vadd.f32 %v3989_v11, %v518_v35  ;;  %1368 = vmatpush.bf16.msra.mxu1 %v4569_v1 }
  0xc8   :  { %v3993_v45 = vpop.eup %3992  ;;  %v538_v4 = vadd.f32 %v3991_v37, %v537_v14  ;;  %1394 = vmatpush.bf16.msra.mxu3 %v4571_v2 }
  0xc9   :  { %v3995_v36 = vpop.eup %3994  ;;  %v555_v26 = vmul.f32 %v3993_v45, %v553_v32  ;;  %v523_v58 = vsel %vm522_vm4, %v3989_v11, %v519_v19  ;;  %vm560_vm8 = vweird.f32 %v3993_v45  ;;  %v565_v19 = vand.u32 2147483648, %v553_v32  ;;  %v3792_v11 = vld [vmem:[#allocation3 + $0xe8] sm:$0xf] }
  0xca   :  { %v528_v53 = vsel %vm525_vm5, %v527_v38, %v523_v58  ;;  %v542_v3 = vsel %vm541_vm6, %v3991_v37, %v538_v4  ;;  %v563_v37 = vand.u32 2147483647, %v553_v32  ;;  %vm561_vm10 = vmor %vm559_vm9, %vm560_vm8  ;;  %v4844_v38 = vor.u32 %v3910_v60, %v3792_v11  ;;  %v3768_v4 = vld [vmem:[#allocation3 + $0xc0] sm:$0xf]  ;;  %v3905_v58 = vld [vmem:[#allocation3 + $0xcc] sm:$0xf0] }
  0xcb   :  { %v556_v31 = vsub.f32 1.0, %v555_v26  ;;  %v547_v22 = vsel %vm544_vm7, %v546_v54, %v542_v3  ;;  %v570_v35 = vmul.f32 %v3995_v36, %v528_v53  ;;  %1369 = vmatpush.bf16.msra.mxu1 %v4581_v15  ;;  %v566_v53 = vor.u32 1.1754944e-38, %v565_v19  ;;  %v4836_v54 = vpop.f32.mrf.mxu1  ;;  %v3784_v36 = vld [vmem:[#allocation3 + $0xe0] sm:$0xf]  ;;  %v3909_v3 = vld [vmem:[#allocation3 + $0xec] sm:$0xf0] }
  0xcc   :  { %v569_v57 = vmul.f32 0.0, %v547_v22  ;;  %1395 = vmatpush.bf16.msra.mxu3 %v4583_v16  ;;  %vm564_vm11 = vcmp.eq.f32.partialorder %v563_v37, 8.507059e+37  ;;  %v4842_v32 = vor.u32 %v3909_v3, %v3784_v36  ;;  %v3906_v22 = vld [vmem:[#allocation3 + $0xd4] sm:$0xf0]  ;;  %v3752_v19 = vld [vmem:[#allocation3 + $0xa0] sm:$0xf] }
  0xcd   :  { %v557_v10 = vmul.f32 %v3993_v45, %v556_v31  ;;  %v3776_v31 = vld [vmem:[#allocation3 + $0xc8] sm:$0xf]  ;;  %v3902_v36 = vld [vmem:[#allocation3 + $0xb4] sm:$0xf0]  ;;  %v3736_v3 = vld [vmem:[#allocation3 + $0x80] sm:$0xf] }
  0xce   :  { %v4829_v14 = vadd.f32 %v570_v35, %v569_v57  ;;  %v4848_v35 = vpop.f32.mrf.mxu3  ;;  %v3897_v11 = vld [vmem:[#allocation3 + $0x8c] sm:$0xf0]  ;;  %v3744_v60 = vld [vmem:[#allocation3 + $0x88] sm:$0xf] }
  0xcf   :  { %v558_v25 = vadd.f32 %v3993_v45, %v557_v10  ;;  %1370 = vmatpush.bf16.msra.mxu1 %v4594_v23  ;;  %v4854_v10 = vor.u32 %v3905_v58, %v3768_v4  ;;  %v4874_v58 = vor.u32 %v3897_v11, %v3736_v3  ;;  %v3704_v11 = vld [vmem:[#allocation3 + $0x40] sm:$0xf] }
  0xd0   :  { %3996 = vtanh.f32 %v4829_v14  ;;  %1396 = vmatpush.bf16.msra.mxu3 %v4596_v24 }
  0xd1   :  { %v562_v44 = vsel %vm561_vm10, %v3993_v45, %v558_v25  ;;  %v4856_v25 = vor.u32 %v3906_v22, %v3776_v31  ;;  %v3720_v22 = vld [vmem:[#allocation3 + $0x60] sm:$0xf] }
  0xd2   :  { %v567_v57 = vsel %vm564_vm11, %v566_v53, %v562_v44  ;;  %v3901_v44 = vld [vmem:[#allocation3 + $0xac] sm:$0xf0]  ;;  %v3760_v53 = vld [vmem:[#allocation3 + $0xa8] sm:$0xf] }
  0xd3   :  { %1371 = vmatpush.bf16.msra.mxu1 %v4601_v29  ;;  %v4858_v37 = vpop.f32.mrf.mxu1 }
  0xd4   :  { %1397 = vmatpush.bf16.msra.mxu3 %v4603_v30  ;;  %6322 = vst [vmem:[#allocation93_spill] sm:$0xff] %v4858_v37  ;;  %v3890_v37 = vld [vmem:[#allocation3 + $0x54] sm:$0xf0] }
  0xd6   :  { %v3997_v5 = vpop.eup %3996  ;;  %v4870_v4 = vpop.f32.mrf.mxu3 }
  0xd7   :  { %v573_v26 = vmul.f32 %v3997_v5, %v567_v57  ;;  %1372 = vmatpush.bf16.msra.mxu1 %v4607_v41  ;;  %v4864_v5 = vor.u32 %v3901_v44, %v3752_v19  ;;  %v4866_v57 = vor.u32 %v3902_v36, %v3760_v53  ;;  %6323 = vst [vmem:[#allocation94_spill] sm:$0xff] %v4870_v4  ;;  %v3893_v19 = vld [vmem:[#allocation3 + $0x6c] sm:$0xf0]  ;;  %v3728_v44 = vld [vmem:[#allocation3 + $0x68] sm:$0xf] }
  0xd8   :  { %1398 = vmatpush.bf16.msra.mxu3 %v4609_v42  ;;  %v3894_v53 = vld [vmem:[#allocation3 + $0x74] sm:$0xf0]  ;;  %v4884_v4 = vor.u32 %v3893_v19, %v3720_v22 }
  0xd9   :  { %v4840_v45 = vpack.c.bf16 %v573_v26, %v573_v26  ;;  %v3898_v26 = vld [vmem:[#allocation3 + $0x94] sm:$0xf0]  ;;  %v4886_v3 = vor.u32 %v3894_v53, %v3728_v44  ;;  %v3688_v44 = vld [vmem:[#allocation3 + $0x20] sm:$0xf]  ;;  %v3885_v53 = vld [vmem:[#allocation3 + $0x2c] sm:$0xf0] }
  0xda   :  { %v4876_v31 = vor.u32 %v3898_v26, %v3744_v60  ;;  %v3889_v60 = vld [vmem:[#allocation3 + $0x4c] sm:$0xf0]  ;;  %v3712_v26 = vld [vmem:[#allocation3 + $0x48] sm:$0xf] }
  0xdb   :  { %912 = vmatmul.bf16.vlgmr.msrb.gmra.mxu0 %v4840_v45  ;;  %938 = vmatmul.bf16.vlgmr.msrb.gmra.mxu2 %v4840_v45  ;;  %v4880_v36 = vpop.f32.mrf.mxu1  ;;  %v4894_v22 = vor.u32 %v3889_v60, %v3704_v11  ;;  %v4896_v19 = vor.u32 %v3890_v37, %v3712_v26  ;;  %v3672_v37 = vld [vmem:[#allocation3] sm:$0xf]  ;;  %v3881_v26 = vld [vmem:[#allocation3 + $0xc] sm:$0xf0] }
  0xdc   :  { %1189 = vmatmul.bf16.vlgmr.msrb.gmra.mxu1 %v4840_v45  ;;  %1215 = vmatmul.bf16.vlgmr.msrb.gmra.mxu3 %v4840_v45  ;;  %6324 = vst [vmem:[#allocation95_spill] sm:$0xff] %v4880_v36  ;;  %v3696_v36 = vld [vmem:[#allocation3 + $0x28] sm:$0xf] }
  0xdd   :  { %1168 = vmatpush.bf16.msrb.mxu0 %v4842_v32  ;;  %1194 = vmatpush.bf16.msrb.mxu2 %v4844_v38 }
  0xde   :  { %1417 = vmatpush.bf16.msrb.mxu1 %v4611_v43  ;;  %1443 = vmatpush.bf16.msrb.mxu3 %v4613_v46 }
  0xe1   :  { %1169 = vmatpush.bf16.msrb.mxu0 %v4854_v10  ;;  %1195 = vmatpush.bf16.msrb.mxu2 %v4856_v25 }
  0xe2   :  { %1418 = vmatpush.bf16.msrb.mxu1 %v4622_v55  ;;  %1444 = vmatpush.bf16.msrb.mxu3 %v4624_v56  ;;  %v3882_v56 = vld [vmem:[#allocation3 + $0x14] sm:$0xf0] }
  0xe3   :  { %v4908_v60 = vpop.f32.mrf.mxu1 }
  0xe4   :  { %6328 = vst [vmem:[#allocation99_spill] sm:$0xff] %v4908_v60  ;;  %v6342_v60 = vld [vmem:[#allocation58_spill] sm:$0xff] }
  0xe5   :  { %1170 = vmatpush.bf16.msrb.mxu0 %v4864_v5  ;;  %1196 = vmatpush.bf16.msrb.mxu2 %v4866_v57 }
  0xe6   :  { %1419 = vmatpush.bf16.msrb.mxu1 %v4628_v62  ;;  %1445 = vmatpush.bf16.msrb.mxu3 %v4630_v63  ;;  %v3886_v63 = vld [vmem:[#allocation3 + $0x34] sm:$0xf0]  ;;  %v4898_v62 = vpop.f32.mrf.mxu3 }
  0xe7   :  { %6325 = vst [vmem:[#allocation96_spill] sm:$0xff] %v4898_v62  ;;  %v4906_v11 = vor.u32 %v3886_v63, %v3696_v36  ;;  %v4914_v62 = vor.u32 %v3881_v26, %v3672_v37  ;;  %v6338_v26 = vld [vmem:[#allocation51_spill] sm:$0xff] }
  0xe9   :  { %1171 = vmatpush.bf16.msrb.mxu0 %v4874_v58  ;;  %1197 = vmatpush.bf16.msrb.mxu2 %v4876_v31  ;;  %6327 = vst [vmem:[#allocation98_spill] sm:$0xff] %v4906_v11 }
  0xea   :  { %1420 = vmatpush.bf16.msrb.mxu1 %v4634_v7  ;;  %1446 = vmatpush.bf16.msrb.mxu3 %v4636_v8  ;;  %v4904_v8 = vor.u32 %v3885_v53, %v3688_v44  ;;  %v3680_v7 = vld [vmem:[#allocation3 + $0x8] sm:$0xf]  ;;  %6329 = vst [vmem:[#allocation100_spill] sm:$0xff] %v4914_v62  ;;  %v6336_v53 = vld [vmem:[#allocation48_spill] sm:$0xff] }
  0xeb   :  { %964 = vmatmul.bf16.vlgmr.msra.gmra.mxu0 %v4840_v45  ;;  %990 = vmatmul.bf16.vlgmr.msra.gmra.mxu2 %v4840_v45  ;;  %v4916_v44 = vor.u32 %v3882_v56, %v3680_v7  ;;  %v4926_v36 = vpop.f32.mrf.mxu1 }
  0xec   :  { %6326 = vst [vmem:[#allocation97_spill] sm:$0xff] %v4904_v8 }
  0xed   :  { %1172 = vmatpush.bf16.msrb.mxu0 %v4884_v4  ;;  %1198 = vmatpush.bf16.msrb.mxu2 %v4886_v3  ;;  %6330 = vst [vmem:[#allocation101_spill] sm:$0xff] %v4916_v44 }
  0xee   :  { %1421 = vmatpush.bf16.msrb.mxu1 %v4648_v27  ;;  %1447 = vmatpush.bf16.msrb.mxu3 %v4650_v28  ;;  %v4920_v63 = vpop.f32.mrf.mxu3  ;;  %6332 = vst [vmem:[#allocation103_spill] sm:$0xff] %v4926_v36  ;;  %v6354_v27 = vld [vmem:[#allocation82_spill] sm:$0xff] }
  0xef   :  { %6331 = vst [vmem:[#allocation102_spill] sm:$0xff] %v4920_v63  ;;  %v6341_v63 = vld [vmem:[#allocation57_spill] sm:$0xff] }
  0xf1   :  { %1173 = vmatpush.bf16.msrb.mxu0 %v4894_v22  ;;  %1199 = vmatpush.bf16.msrb.mxu2 %v4896_v19 }
  0xf2   :  { %1422 = vmatpush.bf16.msrb.mxu1 %v4659_v47  ;;  %1448 = vmatpush.bf16.msrb.mxu3 %v4662_v50  ;;  %v6348_v47 = vld [vmem:[#allocation67_spill] sm:$0xff] }
  0xf3   :  { %v4938_v7 = vpop.f32.mrf.mxu1 }
  0xf4   :  { %6334 = vst [vmem:[#allocation105_spill] sm:$0xff] %v4938_v7  ;;  %v4952_v7 = vpop.f32.mrf.mxu0 }
  0xf5   :  { %1174 = vmatpush.bf16.msrb.mxu0 %v4904_v8  ;;  %1200 = vmatpush.bf16.msrb.mxu2 %v4906_v11 }
  0xf6   :  { %1423 = vmatpush.bf16.msrb.mxu1 %v4671_v6  ;;  %1449 = vmatpush.bf16.msrb.mxu3 %v4674_v12  ;;  %v4934_v56 = vpop.f32.mrf.mxu3  ;;  %v4960_v12 = vpop.f32.mrf.mxu2  ;;  %v6346_v6 = vld [vmem:[#allocation64_spill] sm:$0xff] }
  0xf7   :  { %6333 = vst [vmem:[#allocation104_spill] sm:$0xff] %v4934_v56  ;;  %v6339_v56 = vld [vmem:[#allocation52_spill] sm:$0xff] }
  0xf9   :  { %1175 = vmatpush.bf16.msrb.mxu0 %v4914_v62  ;;  %1201 = vmatpush.bf16.msrb.mxu2 %v4916_v44 }
  0xfa   :  { %1424 = vmatpush.bf16.msrb.mxu1 %v4683_v33  ;;  %1450 = vmatpush.bf16.msrb.mxu3 %v4686_v48  ;;  %v6343_v48 = vld [vmem:[#allocation59_spill] sm:$0xff] }
  0xfb   :  { %v4948_v37 = vpop.f32.mrf.mxu1 }
  0xfc   :  { %1176 = vmatmul.bf16.vlgmr.msrb.gmra.mxu0 %v4840_v45  ;;  %1202 = vmatmul.bf16.vlgmr.msrb.gmra.mxu2 %v4840_v45  ;;  %6337 = vst [vmem:[#allocation107_spill] sm:$0xff] %v4948_v37  ;;  %v6345_v37 = vld [vmem:[#allocation63_spill] sm:$0xff]  ;;  %v4964_v50 = vpop.f32.mrf.mxu0 }
  0xfd   :  { %1352 = vmatpush.bf16.msra.mxu0 %v4554_v52  ;;  %1378 = vmatpush.bf16.msra.mxu2 %v4563_v61  ;;  %6347 = vst [vmem:[#allocation109_spill] sm:$0xff] %v4964_v50 }
  0xfe   :  { %v4944_v45 = vpop.f32.mrf.mxu3 }
  0xff   :  { %6335 = vst [vmem:[#allocation106_spill] sm:$0xff] %v4944_v45  ;;  %v6344_v45 = vld [vmem:[#allocation60_spill] sm:$0xff] }
 0x101   :  { %1353 = vmatpush.bf16.msra.mxu0 %v4565_v0  ;;  %1379 = vmatpush.bf16.msra.mxu2 %v4575_v9 }
 0x103   :  { %v926_v33 = vpop.f32.mrf.mxu1 }
 0x105   :  { %1354 = vmatpush.bf16.msra.mxu0 %v4577_v13  ;;  %1380 = vmatpush.bf16.msra.mxu2 %v4587_v21 }
 0x106   :  { %v4954_v36 = vpop.f32.mrf.mxu3 }
 0x107   :  { %6340 = vst [vmem:[#allocation108_spill] sm:$0xff] %v4954_v36  ;;  %v6349_v36 = vld [vmem:[#allocation68_spill] sm:$0xff] }
 0x109   :  { %1355 = vmatpush.bf16.msra.mxu0 %v4643_v17  ;;  %1381 = vmatpush.bf16.msra.mxu2 %v4645_v20 }
 0x10b   :  { %v928_v28 = vpop.f32.mrf.mxu1 }
 0x10d   :  { %1356 = vmatpush.bf16.msra.mxu0 %v4655_v34  ;;  %1382 = vmatpush.bf16.msra.mxu2 %v4657_v40 }
 0x111   :  { %1357 = vmatpush.bf16.msra.mxu0 %v4667_v59  ;;  %1383 = vmatpush.bf16.msra.mxu2 %v6336_v53 }
 0x113   :  { %v978_v50 = vpop.f32.mrf.mxu1 }
 0x115   :  { %1358 = vmatpush.bf16.msra.mxu0 %v6338_v26  ;;  %1384 = vmatpush.bf16.msra.mxu2 %v6339_v56  ;;  %v6369_v26 = vld [vmem:[#allocation71_spill] sm:$0xff] }
 0x116   :  { %v339_v53 = vadd.f32 %v4836_v54, %v6369_v26 }
 0x119   :  { %1359 = vmatpush.bf16.msra.mxu0 %v6341_v63  ;;  %1385 = vmatpush.bf16.msra.mxu2 %v6342_v60  ;;  %v952_v63 = vpop.f32.mrf.mxu3  ;;  %v4968_v60 = vpop.f32.mrf.mxu2 }
 0x11a   :  { %6350 = vst [vmem:[#allocation110_spill] sm:$0xff] %v4968_v60 }
 0x11b   :  { %v980_v60 = vpop.f32.mrf.mxu1 }
 0x11c   :  { %v510_v60 = vld [vmem:[%s6048_s5] sm:$0xf] }
 0x11d   :  { %1404 = vmatpush.bf16.msrb.mxu0 %v6343_v48  ;;  %1430 = vmatpush.bf16.msrb.mxu2 %v6344_v45  ;;  %v6351_v48 = vld [vmem:[#allocation73_spill] sm:$0xff]  ;;  %v6352_v45 = vld [vmem:[#allocation74_spill] sm:$0xff] }
 0x121   :  { %1405 = vmatpush.bf16.msrb.mxu0 %v6345_v37  ;;  %1431 = vmatpush.bf16.msrb.mxu2 %v6346_v6  ;;  %v4974_v37 = vpop.f32.mrf.mxu0  ;;  %v954_v6 = vpop.f32.mrf.mxu3 }
 0x122   :  { %6353 = vst [vmem:[#allocation111_spill] sm:$0xff] %v4974_v37 }
 0x125   :  { %1406 = vmatpush.bf16.msrb.mxu0 %v6348_v47  ;;  %1432 = vmatpush.bf16.msrb.mxu2 %v6349_v36  ;;  %v6355_v47 = vld [vmem:[#allocation83_spill] sm:$0xff]  ;;  %v4978_v36 = vpop.f32.mrf.mxu2 }
 0x126   :  { %6356 = vst [vmem:[#allocation112_spill] sm:$0xff] %v4978_v36 }
 0x129   :  { %1407 = vmatpush.bf16.msrb.mxu0 %v6351_v48  ;;  %1433 = vmatpush.bf16.msrb.mxu2 %v6352_v45  ;;  %v1004_v28 = vpop.f32.mrf.mxu3  ;;  %v4982_v45 = vpop.f32.mrf.mxu0 }
 0x12a   :  { %6357 = vst [vmem:[#allocation113_spill] sm:$0xff] %v4982_v45 }
 0x12d   :  { %1408 = vmatpush.bf16.msrb.mxu0 %v4767_v39  ;;  %1434 = vmatpush.bf16.msrb.mxu2 %v4770_v49  ;;  %v6358_v39 = vld [vmem:[#allocation91_spill] sm:$0xff]  ;;  %v6359_v49 = vld [vmem:[#allocation92_spill] sm:$0xff]  ;;  %v4986_v6 = vpop.f32.mrf.mxu2 }
 0x12e   :  { %6360 = vst [vmem:[#allocation114_spill] sm:$0xff] %v4986_v6 }
 0x131   :  { %1409 = vmatpush.bf16.msrb.mxu0 %v6354_v27  ;;  %1435 = vmatpush.bf16.msrb.mxu2 %v6355_v47  ;;  %v1006_v37 = vpop.f32.mrf.mxu3  ;;  %v4988_v27 = vpop.f32.mrf.mxu0 }
 0x132   :  { %6361 = vst [vmem:[#allocation115_spill] sm:$0xff] %v4988_v27 }
 0x135   :  { %1410 = vmatpush.bf16.msrb.mxu0 %v4795_v18  ;;  %1436 = vmatpush.bf16.msrb.mxu2 %v4798_v51  ;;  %v4990_v47 = vpop.f32.mrf.mxu2 }
 0x136   :  { %6362 = vst [vmem:[#allocation116_spill] sm:$0xff] %v4990_v47  ;;  %v5006_v47 = vperm.slane %v510_v60, 1 }
 0x138   :  { %6368 = vst [vmem:[#allocation122_spill] sm:$0xff] %v5006_v47 }
 0x139   :  { %1411 = vmatpush.bf16.msrb.mxu0 %v6358_v39  ;;  %1437 = vmatpush.bf16.msrb.mxu2 %v6359_v49  ;;  %v4992_v36 = vpop.f32.mrf.mxu0  ;;  %v5003_v49 = vperm.slane %v510_v60, 0 }
 0x13a   :  { %6363 = vst [vmem:[#allocation117_spill] sm:$0xff] %v4992_v36 }
 0x13b   :  { %6367 = vst [vmem:[#allocation121_spill] sm:$0xff] %v5003_v49 }
 0x13d   :  { %v4994_v18 = vpop.f32.mrf.mxu2 }
 0x13e   :  { %6364 = vst [vmem:[#allocation118_spill] sm:$0xff] %v4994_v18 }
 0x141   :  { %v4996_v51 = vpop.f32.mrf.mxu0 }
 0x142   :  { %6365 = vst [vmem:[#allocation119_spill] sm:$0xff] %v4996_v51 }
 0x145   :  { %v5001_v45 = vpop.f32.mrf.mxu2 }
 0x146   :  { %6366 = vst [vmem:[#allocation120_spill] sm:$0xff] %v5001_v45 }
 0x158   :  { %v913_v6 = vpop.f32.mrf.mxu0 }
 0x159   :  { %v914_v37 = vadd.f32 %v913_v6, %v5003_v49  ;;  %v1190_v27 = vpop.f32.mrf.mxu1 }
 0x15a   :  { %v1221_v40 = vadd.f32 %v1190_v27, %v339_v53  ;;  %v5016_v27 = vperm.slane %v510_v60, 3 }
 0x15b   :  { %v927_v39 = vadd.f32 %v926_v33, %v914_v37  ;;  %v5011_v37 = vperm.slane %v510_v60, 2 }
 0x15d   :  { %v3801_v36 = vmul.f32 -1.442695, %v927_v39  ;;  %6370 = vst [vmem:[#allocation123_spill] sm:$0xff] %v5011_v37  ;;  %v3799_v39 = vmul.f32 -1.442695, %v1221_v40 }
 0x15e   :  { %v939_v48 = vpop.f32.mrf.mxu2 }
 0x15f   :  { %3998 = vpow2.f32 %v3801_v36  ;;  %v940_v51 = vadd.f32 %v939_v48, %v5006_v47  ;;  %v1216_v18 = vpop.f32.mrf.mxu3  ;;  %v6371_v47 = vld [vmem:[#allocation80_spill] sm:$0xff] }
 0x160   :  { %v915_v56 = vpop.f32.mrf.mxu0 }
 0x161   :  { %v953_v45 = vadd.f32 %v952_v63, %v940_v51  ;;  %v1192_v59 = vpop.f32.mrf.mxu1  ;;  %v397_v51 = vadd.f32 %v4848_v35, %v6371_v47 }
 0x163   :  { %v3802_v34 = vmul.f32 -1.442695, %v953_v45 }
 0x165   :  { %v3999_v55 = vpop.eup %3998  ;;  %4000 = vpow2.f32 %v3802_v34 }
 0x166   :  { %v1290_v6 = vadd.f32 1.0, %v3999_v55  ;;  %v941_v33 = vpop.f32.mrf.mxu2  ;;  %v1223_v55 = vadd.f32 %v1216_v18, %v397_v51 }
 0x167   :  { %v1218_v49 = vpop.f32.mrf.mxu3 }
 0x168   :  { %4002 = vrcp.f32 %v1290_v6  ;;  %v965_v36 = vpop.f32.mrf.mxu0  ;;  %v1300_v35 = vand.u32 2147483647, %v1290_v6  ;;  %vm1296_vm13 = vweird.f32 %v1290_v6 }
 0x169   :  { %v966_v48 = vadd.f32 %v965_v36, %v5011_v37  ;;  %4004 = vpow2.f32 %v3799_v39  ;;  %v3800_v36 = vmul.f32 -1.442695, %v1223_v55  ;;  %v1302_v37 = vand.u32 2147483648, %v1290_v6 }
 0x16a   :  { %vm1301_vm15 = vcmp.eq.f32.partialorder %v1300_v35, 8.507059e+37 }
 0x16b   :  { %v4001_v56 = vpop.eup %4000  ;;  %v979_v34 = vadd.f32 %v978_v50, %v966_v48  ;;  %v1303_v48 = vor.u32 1.1754944e-38, %v1302_v37 }
 0x16c   :  { %v1309_v59 = vadd.f32 1.0, %v4001_v56 }
 0x16e   :  { %v4003_v54 = vpop.eup %4002  ;;  %4006 = vrcp.f32 %v1309_v59  ;;  %v991_v63 = vpop.f32.mrf.mxu2  ;;  %vm1315_vm1 = vweird.f32 %v1309_v59 }
 0x16f   :  { %v1292_v45 = vmul.f32 %v4003_v54, %v1290_v6  ;;  %v4005_v49 = vpop.eup %4004  ;;  %v992_v33 = vadd.f32 %v991_v63, %v5016_v27  ;;  %4008 = vtanh.f32 %v979_v34  ;;  %vm1297_vm12 = vweird.f32 %v4003_v54  ;;  %v6372_v34 = vld [vmem:[#allocation70_spill] sm:$0xff] }
 0x170   :  { %v967_v40 = vpop.f32.mrf.mxu0  ;;  %v5019_v47 = vadd.f32 1.0, %v4005_v49  ;;  %4010 = vpow2.f32 %v3800_v36  ;;  %vm1298_vm14 = vmor %vm1296_vm13, %vm1297_vm12  ;;  %v1319_v6 = vand.u32 2147483647, %v1309_v59 }
 0x171   :  { %v1293_v53 = vsub.f32 1.0, %v1292_v45  ;;  %v1005_v56 = vadd.f32 %v1004_v28, %v992_v33  ;;  %v310_v40 = vadd.f32 %v4952_v7, %v6372_v34  ;;  %v1321_v28 = vand.u32 2147483648, %v1309_v59 }
 0x172   :  { %vm1320_vm3 = vcmp.eq.f32.partialorder %v1319_v6, 8.507059e+37  ;;  %vm1252_vm9 = vweird.f32 %v5019_v47 }
 0x173   :  { %v1294_v39 = vmul.f32 %v4003_v54, %v1293_v53  ;;  %v3803_v50 = vmul.f32 -1.442695, %v1005_v56 }
 0x174   :  { %v4007_v60 = vpop.eup %4006 }
 0x175   :  { %v1311_v26 = vmul.f32 %v4007_v60, %v1309_v59  ;;  %v1295_v18 = vadd.f32 %v4003_v54, %v1294_v39  ;;  %4012 = vpow2.f32 %v3803_v50  ;;  %v4009_v55 = vpop.eup %4008  ;;  %vm1316_vm0 = vweird.f32 %v4007_v60 }
 0x176   :  { %v993_v51 = vpop.f32.mrf.mxu2  ;;  %4014 = vrcp.f32 %v5019_v47  ;;  %vm1317_vm2 = vmor %vm1315_vm1, %vm1316_vm0 }
 0x177   :  { %v1312_v45 = vsub.f32 1.0, %v1311_v26  ;;  %v1299_v63 = vsel %vm1298_vm14, %v4003_v54, %v1295_v18  ;;  %v4011_v26 = vpop.eup %4010  ;;  %v1322_v54 = vor.u32 1.1754944e-38, %v1321_v28 }
 0x178   :  { %v1304_v49 = vsel %vm1301_vm15, %v1303_v48, %v1299_v63 }
 0x179   :  { %v1313_v53 = vmul.f32 %v4007_v60, %v1312_v45  ;;  %v1346_v33 = vmul.f32 %v4009_v55, %v1304_v49  ;;  %v1177_v36 = vpop.f32.mrf.mxu0 }
 0x17a   :  { %v1220_v39 = vadd.f32 %v1177_v36, %v310_v40  ;;  %v5030_v40 = vadd.f32 1.0, %v4011_v26 }
 0x17b   :  { %v1314_v37 = vadd.f32 %v4007_v60, %v1313_v53  ;;  %v4013_v56 = vpop.eup %4012 }
 0x17c   :  { %v3798_v35 = vmul.f32 -1.442695, %v1220_v39  ;;  %v5024_v7 = vpop.eup %4014  ;;  %v1329_v51 = vadd.f32 1.0, %v4013_v56  ;;  %vm1272_vm1 = vweird.f32 %v5030_v40 }
 0x17d   :  { %v1318_v18 = vsel %vm1317_vm2, %v4007_v60, %v1314_v37  ;;  %v1248_v59 = vmul.f32 %v5024_v7, %v5019_v47  ;;  %vm1253_vm6 = vweird.f32 %v5024_v7 }
 0x17e   :  { %v1323_v50 = vsel %vm1320_vm3, %v1322_v54, %v1318_v18  ;;  %4016 = vpow2.f32 %v3798_v35  ;;  %v6374_v54 = vld [vmem:[#allocation89_spill] sm:$0xff]  ;;  %v1339_v56 = vand.u32 2147483647, %v1329_v51  ;;  %vm1335_vm5 = vweird.f32 %v1329_v51  ;;  %vm5046_vm10 = vmor %vm1252_vm9, %vm1253_vm6 }
 0x17f   :  { %v1345_v48 = vmul.f32 0.0, %v1323_v50  ;;  %v1203_v45 = vpop.f32.mrf.mxu2  ;;  %4018 = vrcp.f32 %v1329_v51  ;;  %v1249_v53 = vsub.f32 1.0, %v1248_v59  ;;  %v368_v35 = vadd.f32 %v4960_v12, %v6374_v54 }
 0x180   :  { %4020 = vrcp.f32 %v5030_v40  ;;  %vm1340_vm8 = vcmp.eq.f32.partialorder %v1339_v56, 8.507059e+37 }
 0x181   :  { %v5026_v63 = vadd.f32 %v1346_v33, %v1345_v48  ;;  %v1179_v55 = vpop.f32.mrf.mxu0  ;;  %v1250_v37 = vmul.f32 %v5024_v7, %v1249_v53  ;;  %v1341_v33 = vand.u32 2147483648, %v1329_v51  ;;  %v1222_v48 = vadd.f32 %v1203_v45, %v368_v35 }
 0x183   :  { %6373 = vst [vmem:[#allocation124_spill] sm:$0xff] %v5026_v63  ;;  %v1342_v53 = vor.u32 1.1754944e-38, %v1341_v33 }
 0x184   :  { %v4017_v28 = vpop.eup %4016 }
 0x185   :  { %v1227_v49 = vadd.f32 1.0, %v4017_v28  ;;  %v4019_v60 = vpop.eup %4018  ;;  %v1251_v28 = vadd.f32 %v5024_v7, %v1250_v37 }
 0x186   :  { %v1331_v6 = vmul.f32 %v4019_v60, %v1329_v51  ;;  %vm1336_vm4 = vweird.f32 %v4019_v60  ;;  %v5037_v18 = vpop.eup %4020  ;;  %v1256_v51 = vand.u32 2147483647, %v5019_v47 }
 0x187   :  { %4022 = vrcp.f32 %v1227_v49  ;;  %v1205_v36 = vpop.f32.mrf.mxu2  ;;  %vm1337_vm7 = vmor %vm1335_vm5, %vm1336_vm4  ;;  %v1268_v12 = vmul.f32 %v5037_v18, %v5030_v40  ;;  %v1239_v37 = vand.u32 2147483648, %v1227_v49  ;;  %vm1233_vm12 = vweird.f32 %v1227_v49 }
 0x188   :  { %v1332_v39 = vsub.f32 1.0, %v1331_v6  ;;  %4024 = vtanh.f32 %v5026_v63  ;;  %v1258_v6 = vand.u32 2147483648, %v5019_v47  ;;  %v1237_v63 = vand.u32 2147483647, %v1227_v49 }
 0x189   :  { %4026 = vtanh.f32 %v1222_v48  ;;  %vm1257_vm13 = vcmp.eq.f32.partialorder %v1256_v51, 8.507059e+37  ;;  %v1240_v47 = vor.u32 1.1754944e-38, %v1239_v37  ;;  %v6380_v51 = vld [vmem:[#allocation62_spill] sm:$0xff]  ;;  %vm1273_vm0 = vweird.f32 %v5037_v18 }
 0x18a   :  { %v1333_v26 = vmul.f32 %v4019_v60, %v1332_v39  ;;  %v1259_v56 = vor.u32 1.1754944e-38, %v1258_v6  ;;  %vm1238_vm15 = vcmp.eq.f32.partialorder %v1237_v63, 8.507059e+37  ;;  %v1278_v63 = vand.u32 2147483648, %v5030_v40  ;;  %vm1274_vm2 = vmor %vm1272_vm1, %vm1273_vm0 }
 0x18c   :  { %v1334_v55 = vadd.f32 %v4019_v60, %v1333_v26  ;;  %v1279_v37 = vor.u32 1.1754944e-38, %v1278_v63  ;;  %v6395_v63 = vld [vmem:[#allocation11_spill] sm:$0xff] }
 0x18d   :  { %v4023_v50 = vpop.eup %4022 }
 0x18e   :  { %v1229_v59 = vmul.f32 %v4023_v50, %v1227_v49  ;;  %v1338_v36 = vsel %vm1337_vm7, %v4019_v60, %v1334_v55  ;;  %v4025_v39 = vpop.eup %4024  ;;  %vm1234_vm11 = vweird.f32 %v4023_v50  ;;  %v1255_v60 = vsel %vm5046_vm10, %v5024_v7, %v1251_v28 }
 0x18f   :  { %v1343_v35 = vsel %vm1340_vm8, %v1342_v53, %v1338_v36  ;;  %v1269_v55 = vsub.f32 1.0, %v1268_v12  ;;  %vm1235_vm14 = vmor %vm1233_vm12, %vm1234_vm11  ;;  %v1260_v53 = vsel %vm1257_vm13, %v1259_v56, %v1255_v60  ;;  %v6377_v36 = vld [vmem:[#allocation55_spill] sm:$0xff]  ;;  %v6379_v12 = vld [vmem:[#allocation61_spill] sm:$0xff] }
 0x190   :  { %v1230_v45 = vsub.f32 1.0, %v1229_v59  ;;  %v1349_v33 = vmul.f32 %v4025_v39, %v1343_v35  ;;  %v6378_v39 = vld [vmem:[#allocation56_spill] sm:$0xff]  ;;  %v1282_v6 = vmul.f32 %v1260_v53, %v4829_v14  ;;  %v6381_v14 = vld [vmem:[#allocation65_spill] sm:$0xff]  ;;  %v6382_v35 = vld [vmem:[#allocation66_spill] sm:$0xff] }
 0x191   :  { %v1270_v7 = vmul.f32 %v5037_v18, %v1269_v55  ;;  %v6383_v56 = vld [vmem:[#allocation69_spill] sm:$0xff]  ;;  %v6384_v55 = vld [vmem:[#allocation72_spill] sm:$0xff] }
 0x192   :  { %v1231_v54 = vmul.f32 %v4023_v50, %v1230_v45  ;;  %v1351_v59 = vpack.c.bf16 %v1349_v33, %v1349_v33  ;;  %v4027_v45 = vpop.eup %4026 }
 0x194   :  { %v1232_v34 = vadd.f32 %v4023_v50, %v1231_v54  ;;  %1373 = vmatmul.bf16.vlgmr.msra.gmra.mxu1 %v1351_v59  ;;  %1399 = vmatmul.bf16.vlgmr.msra.gmra.mxu3 %v1351_v59 }
 0x195   :  { %1469 = vmatpush.bf16.msra.mxu1 %v6377_v36  ;;  %1495 = vmatpush.bf16.msra.mxu3 %v6378_v39 }
 0x196   :  { %v1236_v48 = vsel %vm1235_vm14, %v4023_v50, %v1232_v34  ;;  %v1271_v34 = vadd.f32 %v5037_v18, %v1270_v7  ;;  %v1276_v50 = vand.u32 2147483647, %v5030_v40  ;;  %v6385_v40 = vld [vmem:[#allocation75_spill] sm:$0xff]  ;;  %v6389_v7 = vld [vmem:[#allocation84_spill] sm:$0xff] }
 0x197   :  { %v1241_v28 = vsel %vm1238_vm15, %v1240_v47, %v1236_v48  ;;  %v6386_v48 = vld [vmem:[#allocation76_spill] sm:$0xff] }
 0x198   :  { %v1283_v54 = vmul.f32 %v4027_v45, %v1241_v28  ;;  %v1275_v26 = vsel %vm1274_vm2, %v5037_v18, %v1271_v34  ;;  %vm1277_vm3 = vcmp.eq.f32.partialorder %v1276_v50, 8.507059e+37  ;;  %v6387_v18 = vld [vmem:[#allocation79_spill] sm:$0xff]  ;;  %v6388_v45 = vld [vmem:[#allocation81_spill] sm:$0xff]  ;;  %v6391_v28 = vld [vmem:[#allocation88_spill] sm:$0xff] }
 0x199   :  { %1470 = vmatpush.bf16.msra.mxu1 %v6379_v12  ;;  %1496 = vmatpush.bf16.msra.mxu3 %v6380_v51  ;;  %v1280_v60 = vsel %vm1277_vm3, %v1279_v37, %v1275_v26  ;;  %v6394_v34 = vld [vmem:[#allocation10_spill] sm:$0xff]  ;;  %v6396_v50 = vld [vmem:[#allocation12_spill] sm:$0xff]  ;;  %v6398_v37 = vld [vmem:[#allocation15_spill] sm:$0xff] }
 0x19a   :  { %v5057_v49 = vadd.f32 %v1283_v54, %v1282_v6  ;;  %v6392_v6 = vld [vmem:[#allocation90_spill] sm:$0xff]  ;;  %v6393_v54 = vld [vmem:[#allocation9_spill] sm:$0xff] }
 0x19b   :  { %v6397_v26 = vld [vmem:[#allocation14_spill] sm:$0xff] }
 0x19c   :  { %4028 = vtanh.f32 %v5057_v49 }
 0x19d   :  { %1471 = vmatpush.bf16.msra.mxu1 %v6381_v14  ;;  %1497 = vmatpush.bf16.msra.mxu3 %v6382_v35 }
 0x1a1   :  { %1472 = vmatpush.bf16.msra.mxu1 %v6383_v56  ;;  %1498 = vmatpush.bf16.msra.mxu3 %v6384_v55 }
 0x1a2   :  { %v4029_v33 = vpop.eup %4028 }
 0x1a3   :  { %v1286_v47 = vmul.f32 %v4029_v33, %v1280_v60  ;;  %v6399_v33 = vld [vmem:[#allocation33_spill] sm:$0xff]  ;;  %v6400_v60 = vld [vmem:[#allocation34_spill] sm:$0xff] }
 0x1a4   :  { %1425 = vmatmul.bf16.vlgmr.msrb.gmra.mxu1 %v1351_v59  ;;  %1451 = vmatmul.bf16.vlgmr.msrb.gmra.mxu3 %v1351_v59  ;;  %v6390_v59 = vld [vmem:[#allocation85_spill] sm:$0xff] }
 0x1a5   :  { %v1350_v53 = vpack.c.bf16 %v1286_v47, %v1286_v47  ;;  %1473 = vmatpush.bf16.msra.mxu1 %v6385_v40  ;;  %1499 = vmatpush.bf16.msra.mxu3 %v6386_v48  ;;  %v6401_v47 = vld [vmem:[#allocation43_spill] sm:$0xff] }
 0x1a7   :  { %1360 = vmatmul.bf16.vlgmr.msra.gmra.mxu0 %v1350_v53  ;;  %1386 = vmatmul.bf16.vlgmr.msra.gmra.mxu2 %v1350_v53 }
 0x1a8   :  { %1456 = vmatpush.bf16.msra.mxu0 %v4842_v32  ;;  %1482 = vmatpush.bf16.msra.mxu2 %v4844_v38 }
 0x1a9   :  { %1474 = vmatpush.bf16.msra.mxu1 %v6387_v18  ;;  %1500 = vmatpush.bf16.msra.mxu3 %v6388_v45 }
 0x1ac   :  { %1457 = vmatpush.bf16.msra.mxu0 %v4854_v10  ;;  %1483 = vmatpush.bf16.msra.mxu2 %v4856_v25 }
 0x1ad   :  { %1475 = vmatpush.bf16.msra.mxu1 %v6389_v7  ;;  %1501 = vmatpush.bf16.msra.mxu3 %v6390_v59 }
 0x1b0   :  { %1458 = vmatpush.bf16.msra.mxu0 %v4864_v5  ;;  %1484 = vmatpush.bf16.msra.mxu2 %v4866_v57 }
 0x1b1   :  { %1476 = vmatpush.bf16.msra.mxu1 %v6391_v28  ;;  %1502 = vmatpush.bf16.msra.mxu3 %v6392_v6 }
 0x1b4   :  { %1459 = vmatpush.bf16.msra.mxu0 %v4874_v58  ;;  %1485 = vmatpush.bf16.msra.mxu2 %v4876_v31 }
 0x1b5   :  { %1653 = vmatpush.bf16.msrb.mxu1 %v6393_v54  ;;  %1679 = vmatpush.bf16.msrb.mxu3 %v6394_v34 }
 0x1b6   :  { %1477 = vmatmul.bf16.vlgmr.msra.gmra.mxu1 %v1350_v53  ;;  %1503 = vmatmul.bf16.vlgmr.msra.gmra.mxu3 %v1350_v53 }
 0x1b7   :  { %1412 = vmatmul.bf16.vlgmr.msrb.gmra.mxu0 %v1350_v53  ;;  %1438 = vmatmul.bf16.vlgmr.msrb.gmra.mxu2 %v1350_v53 }
 0x1b8   :  { %1460 = vmatpush.bf16.msra.mxu0 %v4884_v4  ;;  %1486 = vmatpush.bf16.msra.mxu2 %v4886_v3 }
 0x1b9   :  { %1654 = vmatpush.bf16.msrb.mxu1 %v6395_v63  ;;  %1680 = vmatpush.bf16.msrb.mxu3 %v6396_v50 }
 0x1bc   :  { %1461 = vmatpush.bf16.msra.mxu0 %v4894_v22  ;;  %1487 = vmatpush.bf16.msra.mxu2 %v4896_v19 }
 0x1bd   :  { %1655 = vmatpush.bf16.msrb.mxu1 %v6397_v26  ;;  %1681 = vmatpush.bf16.msrb.mxu3 %v6398_v37 }
 0x1c0   :  { %1462 = vmatpush.bf16.msra.mxu0 %v4904_v8  ;;  %1488 = vmatpush.bf16.msra.mxu2 %v4906_v11  ;;  %v6444_v8 = vld [vmem:[#allocation70_spill] sm:$0xff] }
 0x1c1   :  { %1656 = vmatpush.bf16.msrb.mxu1 %v4569_v1  ;;  %1682 = vmatpush.bf16.msrb.mxu3 %v4571_v2  ;;  %v6445_v2 = vld [vmem:[#allocation109_spill] sm:$0xff] }
 0x1c2   :  { %v313_v1 = vadd.f32 %v6445_v2, %v6444_v8 }
 0x1c4   :  { %1463 = vmatpush.bf16.msra.mxu0 %v4914_v62  ;;  %1489 = vmatpush.bf16.msra.mxu2 %v4916_v44  ;;  %v6439_v44 = vld [vmem:[#allocation71_spill] sm:$0xff] }
 0x1c5   :  { %1657 = vmatpush.bf16.msrb.mxu1 %v4581_v15  ;;  %1683 = vmatpush.bf16.msrb.mxu3 %v4583_v16 }
 0x1c7   :  { %1464 = vmatmul.bf16.vlgmr.msra.gmra.mxu0 %v1350_v53  ;;  %1490 = vmatmul.bf16.vlgmr.msra.gmra.mxu2 %v1350_v53  ;;  %v6402_v53 = vld [vmem:[#allocation44_spill] sm:$0xff] }
 0x1c8   :  { %1640 = vmatpush.bf16.msrb.mxu0 %v4554_v52  ;;  %1666 = vmatpush.bf16.msrb.mxu2 %v4563_v61 }
 0x1c9   :  { %1658 = vmatpush.bf16.msrb.mxu1 %v4594_v23  ;;  %1684 = vmatpush.bf16.msrb.mxu3 %v4596_v24 }
 0x1cc   :  { %1641 = vmatpush.bf16.msrb.mxu0 %v4565_v0  ;;  %1667 = vmatpush.bf16.msrb.mxu2 %v4575_v9 }
 0x1cd   :  { %1659 = vmatpush.bf16.msrb.mxu1 %v4601_v29  ;;  %1685 = vmatpush.bf16.msrb.mxu3 %v4603_v30  ;;  %v6437_v29 = vld [vmem:[#allocation121_spill] sm:$0xff] }
 0x1d0   :  { %1642 = vmatpush.bf16.msrb.mxu0 %v4577_v13  ;;  %1668 = vmatpush.bf16.msrb.mxu2 %v4587_v21  ;;  %v6403_v21 = vld [vmem:[#allocation35_spill] sm:$0xff] }
 0x1d1   :  { %1660 = vmatpush.bf16.msrb.mxu1 %v4607_v41  ;;  %1686 = vmatpush.bf16.msrb.mxu3 %v4609_v42  ;;  %v6404_v41 = vld [vmem:[#allocation36_spill] sm:$0xff]  ;;  %v6405_v42 = vld [vmem:[#allocation47_spill] sm:$0xff] }
 0x1d4   :  { %1643 = vmatpush.bf16.msrb.mxu0 %v4643_v17  ;;  %1669 = vmatpush.bf16.msrb.mxu2 %v4645_v20  ;;  %v6408_v17 = vld [vmem:[#allocation38_spill] sm:$0xff]  ;;  %v6409_v20 = vld [vmem:[#allocation51_spill] sm:$0xff] }
 0x1d5   :  { %1705 = vmatpush.bf16.msra.mxu1 %v4611_v43  ;;  %1731 = vmatpush.bf16.msra.mxu3 %v4613_v46  ;;  %v6406_v43 = vld [vmem:[#allocation48_spill] sm:$0xff]  ;;  %v6407_v46 = vld [vmem:[#allocation37_spill] sm:$0xff] }
 0x1d8   :  { %1644 = vmatpush.bf16.msrb.mxu0 %v6401_v47  ;;  %1670 = vmatpush.bf16.msrb.mxu2 %v6402_v53  ;;  %v6412_v47 = vld [vmem:[#allocation42_spill] sm:$0xff]  ;;  %v6413_v53 = vld [vmem:[#allocation57_spill] sm:$0xff] }
 0x1d9   :  { %1706 = vmatpush.bf16.msra.mxu1 %v6399_v33  ;;  %1732 = vmatpush.bf16.msra.mxu3 %v6400_v60  ;;  %v6410_v33 = vld [vmem:[#allocation52_spill] sm:$0xff]  ;;  %v6411_v60 = vld [vmem:[#allocation41_spill] sm:$0xff] }
 0x1dc   :  { %1645 = vmatpush.bf16.msrb.mxu0 %v6405_v42  ;;  %1671 = vmatpush.bf16.msrb.mxu2 %v6406_v43  ;;  %v6416_v42 = vld [vmem:[#allocation60_spill] sm:$0xff]  ;;  %v6417_v43 = vld [vmem:[#allocation45_spill] sm:$0xff] }
 0x1dd   :  { %1707 = vmatpush.bf16.msra.mxu1 %v6403_v21  ;;  %1733 = vmatpush.bf16.msra.mxu3 %v6404_v41  ;;  %v6414_v21 = vld [vmem:[#allocation58_spill] sm:$0xff]  ;;  %v6415_v41 = vld [vmem:[#allocation59_spill] sm:$0xff] }
 0x1e0   :  { %1646 = vmatpush.bf16.msrb.mxu0 %v6409_v20  ;;  %1672 = vmatpush.bf16.msrb.mxu2 %v6410_v33  ;;  %v6420_v20 = vld [vmem:[#allocation64_spill] sm:$0xff]  ;;  %v6421_v33 = vld [vmem:[#allocation49_spill] sm:$0xff] }
 0x1e1   :  { %1708 = vmatpush.bf16.msra.mxu1 %v6407_v46  ;;  %1734 = vmatpush.bf16.msra.mxu3 %v6408_v17  ;;  %v6418_v46 = vld [vmem:[#allocation46_spill] sm:$0xff]  ;;  %v6419_v17 = vld [vmem:[#allocation63_spill] sm:$0xff] }
 0x1e4   :  { %1647 = vmatpush.bf16.msrb.mxu0 %v6413_v53  ;;  %1673 = vmatpush.bf16.msrb.mxu2 %v6414_v21  ;;  %v6424_v53 = vld [vmem:[#allocation68_spill] sm:$0xff]  ;;  %v6425_v21 = vld [vmem:[#allocation53_spill] sm:$0xff] }
 0x1e5   :  { %1709 = vmatpush.bf16.msra.mxu1 %v6411_v60  ;;  %1735 = vmatpush.bf16.msra.mxu3 %v6412_v47  ;;  %v6422_v60 = vld [vmem:[#allocation50_spill] sm:$0xff]  ;;  %v6423_v47 = vld [vmem:[#allocation67_spill] sm:$0xff] }
 0x1e8   :  { %1692 = vmatpush.bf16.msra.mxu0 %v6415_v41  ;;  %1718 = vmatpush.bf16.msra.mxu2 %v6416_v42  ;;  %v6426_v41 = vld [vmem:[#allocation54_spill] sm:$0xff]  ;;  %v6427_v42 = vld [vmem:[#allocation73_spill] sm:$0xff] }
 0x1e9   :  { %1710 = vmatpush.bf16.msra.mxu1 %v6417_v43  ;;  %1736 = vmatpush.bf16.msra.mxu3 %v6418_v46  ;;  %v6428_v43 = vld [vmem:[#allocation74_spill] sm:$0xff]  ;;  %v6429_v46 = vld [vmem:[#allocation77_spill] sm:$0xff] }
 0x1ec   :  { %1693 = vmatpush.bf16.msra.mxu0 %v6419_v17  ;;  %1719 = vmatpush.bf16.msra.mxu2 %v6420_v20  ;;  %v6430_v17 = vld [vmem:[#allocation78_spill] sm:$0xff] }
 0x1ed   :  { %1711 = vmatpush.bf16.msra.mxu1 %v6421_v33  ;;  %1737 = vmatpush.bf16.msra.mxu3 %v6422_v60  ;;  %v6431_v20 = vld [vmem:[#allocation82_spill] sm:$0xff]  ;;  %v6432_v33 = vld [vmem:[#allocation83_spill] sm:$0xff] }
 0x1ee   :  { %v6433_v60 = vld [vmem:[#allocation86_spill] sm:$0xff] }
 0x1f0   :  { %1694 = vmatpush.bf16.msra.mxu0 %v6423_v47  ;;  %1720 = vmatpush.bf16.msra.mxu2 %v6424_v53  ;;  %v6434_v47 = vld [vmem:[#allocation87_spill] sm:$0xff] }
 0x1f1   :  { %1712 = vmatpush.bf16.msra.mxu1 %v6425_v21  ;;  %1738 = vmatpush.bf16.msra.mxu3 %v6426_v41  ;;  %v6435_v53 = vld [vmem:[#allocation91_spill] sm:$0xff]  ;;  %v6436_v21 = vld [vmem:[#allocation92_spill] sm:$0xff] }
 0x1f4   :  { %1695 = vmatpush.bf16.msra.mxu0 %v6427_v42  ;;  %1721 = vmatpush.bf16.msra.mxu2 %v6428_v43 }
 0x1f8   :  { %1696 = vmatpush.bf16.msra.mxu0 %v6429_v46  ;;  %1722 = vmatpush.bf16.msra.mxu2 %v6430_v17 }
 0x1fc   :  { %1697 = vmatpush.bf16.msra.mxu0 %v6431_v20  ;;  %1723 = vmatpush.bf16.msra.mxu2 %v6432_v33 }
 0x200   :  { %1698 = vmatpush.bf16.msra.mxu0 %v6433_v60  ;;  %1724 = vmatpush.bf16.msra.mxu2 %v6434_v47  ;;  %v6438_v60 = vld [vmem:[#allocation122_spill] sm:$0xff] }
 0x204   :  { %1699 = vmatpush.bf16.msra.mxu0 %v6435_v53  ;;  %1725 = vmatpush.bf16.msra.mxu2 %v6436_v21 }
 0x211   :  { %v1374_v41 = vpop.f32.mrf.mxu1 }
 0x217   :  { %v1400_v42 = vpop.f32.mrf.mxu3 }
 0x219   :  { %v1376_v13 = vpop.f32.mrf.mxu1 }
 0x21a   :  { %v6440_v13 = vld [vmem:[#allocation93_spill] sm:$0xff] }
 0x21f   :  { %v1402_v43 = vpop.f32.mrf.mxu3 }
 0x220   :  { %v342_v43 = vadd.f32 %v6440_v13, %v6439_v44 }
 0x221   :  { %v1426_v30 = vpop.f32.mrf.mxu1 }
 0x224   :  { %v1361_v46 = vpop.f32.mrf.mxu0 }
 0x225   :  { %v1362_v17 = vadd.f32 %v1361_v46, %v6437_v29 }
 0x227   :  { %v1375_v9 = vadd.f32 %v1374_v41, %v1362_v17  ;;  %v1452_v20 = vpop.f32.mrf.mxu3 }
 0x229   :  { %v3807_v0 = vmul.f32 -1.442695, %v1375_v9  ;;  %v1428_v33 = vpop.f32.mrf.mxu1 }
 0x22a   :  { %v1387_v24 = vpop.f32.mrf.mxu2 }
 0x22b   :  { %4030 = vpow2.f32 %v3807_v0  ;;  %v1388_v47 = vadd.f32 %v1387_v24, %v6438_v60 }
 0x22c   :  { %v1363_v23 = vpop.f32.mrf.mxu0 }
 0x22d   :  { %v1401_v53 = vadd.f32 %v1400_v42, %v1388_v47  ;;  %v6442_v47 = vld [vmem:[#allocation94_spill] sm:$0xff] }
 0x22f   :  { %v3808_v61 = vmul.f32 -1.442695, %v1401_v53  ;;  %v1454_v21 = vpop.f32.mrf.mxu3 }
 0x230   :  { %v6441_v21 = vld [vmem:[#allocation80_spill] sm:$0xff] }
 0x231   :  { %v4031_v52 = vpop.eup %4030  ;;  %4032 = vpow2.f32 %v3808_v61  ;;  %v400_v53 = vadd.f32 %v6442_v47, %v6441_v21 }
 0x232   :  { %v5164_v62 = vadd.f32 1.0, %v4031_v52  ;;  %v1389_v41 = vpop.f32.mrf.mxu2 }
 0x233   :  { %v1478_v46 = vpop.f32.mrf.mxu1 }
 0x234   :  { %v1509_v17 = vadd.f32 %v1478_v46, %v342_v43  ;;  %4034 = vrcp.f32 %v5164_v62  ;;  %v1413_v9 = vpop.f32.mrf.mxu0  ;;  %vm1584_vm6 = vweird.f32 %v5164_v62  ;;  %v1588_v2 = vand.u32 2147483647, %v5164_v62 }
 0x236   :  { %v3805_v0 = vmul.f32 -1.442695, %v1509_v17  ;;  %vm1589_vm11 = vcmp.eq.f32.partialorder %v1588_v2, 8.507059e+37 }
 0x237   :  { %v4033_v33 = vpop.eup %4032 }
 0x238   :  { %4036 = vpow2.f32 %v3805_v0  ;;  %v1597_v23 = vadd.f32 1.0, %v4033_v33  ;;  %v6443_v0 = vld [vmem:[#allocation123_spill] sm:$0xff] }
 0x239   :  { %v1504_v24 = vpop.f32.mrf.mxu3  ;;  %v1414_v33 = vadd.f32 %v1413_v9, %v6443_v0 }
 0x23a   :  { %v4035_v42 = vpop.eup %4034  ;;  %4038 = vrcp.f32 %v1597_v23  ;;  %v1439_v61 = vpop.f32.mrf.mxu2  ;;  %v1511_v43 = vadd.f32 %v1504_v24, %v400_v53  ;;  %vm1603_vm7 = vweird.f32 %v1597_v23 }
 0x23b   :  { %v1480_v13 = vpop.f32.mrf.mxu1  ;;  %v1580_v52 = vmul.f32 %v4035_v42, %v5164_v62  ;;  %v1440_v41 = vadd.f32 %v1439_v61, %v5016_v27  ;;  %v1427_v53 = vadd.f32 %v1426_v30, %v1414_v33  ;;  %vm1585_vm4 = vweird.f32 %v4035_v42 }
 0x23c   :  { %v1415_v46 = vpop.f32.mrf.mxu0  ;;  %v3806_v47 = vmul.f32 -1.442695, %v1511_v43  ;;  %vm5180_vm8 = vmor %vm1584_vm6, %vm1585_vm4 }
 0x23d   :  { %v1581_v60 = vsub.f32 1.0, %v1580_v52  ;;  %v1453_v17 = vadd.f32 %v1452_v20, %v1440_v41  ;;  %v1590_v20 = vand.u32 2147483648, %v5164_v62 }
 0x23e   :  { %v4037_v44 = vpop.eup %4036 }
 0x23f   :  { %v5171_v29 = vadd.f32 1.0, %v4037_v44  ;;  %v3809_v16 = vmul.f32 -1.442695, %v1453_v17  ;;  %v1582_v11 = vmul.f32 %v4035_v42, %v1581_v60  ;;  %v1609_v44 = vand.u32 2147483648, %v1597_v23 }
 0x240   :  { %v4039_v15 = vpop.eup %4038 }
 0x241   :  { %v1506_v21 = vpop.f32.mrf.mxu3  ;;  %v1599_v13 = vmul.f32 %v4039_v15, %v1597_v23  ;;  %4040 = vpow2.f32 %v3809_v16  ;;  %v1583_v52 = vadd.f32 %v4035_v42, %v1582_v11  ;;  %vm1604_vm5 = vweird.f32 %v4039_v15 }
 0x242   :  { %v1441_v61 = vpop.f32.mrf.mxu2  ;;  %4042 = vrcp.f32 %v5171_v29  ;;  %v1607_v21 = vand.u32 2147483647, %v1597_v23  ;;  %vm1605_vm9 = vmor %vm1603_vm7, %vm1604_vm5  ;;  %v1610_v46 = vor.u32 1.1754944e-38, %v1609_v44  ;;  %v6448_v44 = vld [vmem:[#allocation124_spill] sm:$0xff]  ;;  %vm1540_vm1 = vweird.f32 %v5171_v29 }
 0x243   :  { %v1600_v24 = vsub.f32 1.0, %v1599_v13  ;;  %4044 = vpow2.f32 %v3806_v47  ;;  %v1587_v17 = vsel %vm5180_vm8, %v4035_v42, %v1583_v52  ;;  %v1591_v47 = vor.u32 1.1754944e-38, %v1590_v20 }
 0x244   :  { %v1465_v9 = vpop.f32.mrf.mxu0  ;;  %4046 = vtanh.f32 %v1427_v53  ;;  %vm1608_vm10 = vcmp.eq.f32.partialorder %v1607_v21, 8.507059e+37 }
 0x245   :  { %v1601_v60 = vmul.f32 %v4039_v15, %v1600_v24  ;;  %v1508_v41 = vadd.f32 %v1465_v9, %v313_v1  ;;  %v1592_v24 = vsel %vm1589_vm11, %v1591_v47, %v1587_v17 }
 0x247   :  { %v4041_v16 = vpop.eup %4040  ;;  %v1602_v30 = vadd.f32 %v4039_v15, %v1601_v60  ;;  %v3804_v11 = vmul.f32 -1.442695, %v1508_v41 }
 0x248   :  { %v1617_v33 = vadd.f32 1.0, %v4041_v16  ;;  %v5186_v1 = vpop.eup %4042 }
 0x249   :  { %v1606_v13 = vsel %vm1605_vm9, %v4039_v15, %v1602_v30  ;;  %4048 = vpow2.f32 %v3804_v11  ;;  %v4045_v62 = vpop.eup %4044  ;;  %v1536_v53 = vmul.f32 %v5186_v1, %v5171_v29  ;;  %vm1541_vm14 = vweird.f32 %v5186_v1 }
 0x24a   :  { %v1611_v23 = vsel %vm1608_vm10, %v1610_v46, %v1606_v13  ;;  %4050 = vrcp.f32 %v1617_v33  ;;  %v1491_v61 = vpop.f32.mrf.mxu2  ;;  %v4047_v42 = vpop.eup %4046  ;;  %v5191_v52 = vadd.f32 1.0, %v4045_v62  ;;  %v1629_v17 = vand.u32 2147483648, %v1617_v33  ;;  %v6449_v62 = vld [vmem:[#allocation89_spill] sm:$0xff]  ;;  %vm5208_vm2 = vmor %vm1540_vm1, %vm1541_vm14 }
 0x24b   :  { %v1633_v9 = vmul.f32 %v1611_v23, %v6448_v44  ;;  %v1634_v41 = vmul.f32 %v4047_v42, %v1592_v24  ;;  %v1537_v21 = vsub.f32 1.0, %v1536_v53  ;;  %v1627_v13 = vand.u32 2147483647, %v1617_v33  ;;  %v6450_v23 = vld [vmem:[#allocation110_spill] sm:$0xff] }
 0x24c   :  { %v1467_v60 = vpop.f32.mrf.mxu0  ;;  %4052 = vrcp.f32 %v5191_v52  ;;  %v371_v24 = vadd.f32 %v6450_v23, %v6449_v62  ;;  %vm1623_vm13 = vweird.f32 %v1617_v33  ;;  %vm1560_vm9 = vweird.f32 %v5191_v52 }
 0x24d   :  { %v5193_v16 = vadd.f32 %v1634_v41, %v1633_v9  ;;  %v1538_v46 = vmul.f32 %v5186_v1, %v1537_v21  ;;  %v1630_v41 = vor.u32 1.1754944e-38, %v1629_v17  ;;  %vm1628_vm0 = vcmp.eq.f32.partialorder %v1627_v13, 8.507059e+37 }
 0x24e   :  { %v1510_v60 = vadd.f32 %v1491_v61, %v371_v24 }
 0x24f   :  { %v4049_v20 = vpop.eup %4048  ;;  %v1539_v42 = vadd.f32 %v5186_v1, %v1538_v46  ;;  %v1544_v46 = vand.u32 2147483647, %v5171_v29 }
 0x250   :  { %v4051_v15 = vpop.eup %4050  ;;  %v1515_v2 = vadd.f32 1.0, %v4049_v20 }
 0x251   :  { %v1619_v43 = vmul.f32 %v4051_v15, %v1617_v33  ;;  %vm1624_vm12 = vweird.f32 %v4051_v15  ;;  %vm1545_vm5 = vcmp.eq.f32.partialorder %v1544_v46, 8.507059e+37 }
 0x252   :  { %4054 = vrcp.f32 %v1515_v2  ;;  %v1493_v30 = vpop.f32.mrf.mxu2  ;;  %v5200_v53 = vpop.eup %4052  ;;  %vm1625_vm15 = vmor %vm1623_vm13, %vm1624_vm12  ;;  %v1527_v23 = vand.u32 2147483648, %v1515_v2  ;;  %v1525_v24 = vand.u32 2147483647, %v1515_v2  ;;  %vm1521_vm4 = vweird.f32 %v1515_v2 }
 0x253   :  { %v1620_v11 = vsub.f32 1.0, %v1619_v43  ;;  %4056 = vtanh.f32 %v5193_v16  ;;  %v1546_v30 = vand.u32 2147483648, %v5171_v29  ;;  %vm1561_vm8 = vweird.f32 %v5200_v53 }
 0x254   :  { %4058 = vtanh.f32 %v1510_v60  ;;  %v1528_v29 = vor.u32 1.1754944e-38, %v1527_v23  ;;  %vm1526_vm7 = vcmp.eq.f32.partialorder %v1525_v24, 8.507059e+37  ;;  %vm1562_vm10 = vmor %vm1560_vm9, %vm1561_vm8  ;;  %v6457_v24 = vld [vmem:[#allocation22_spill] sm:$0xff] }
 0x255   :  { %v1621_v47 = vmul.f32 %v4051_v15, %v1620_v11  ;;  %v1556_v11 = vmul.f32 %v5200_v53, %v5191_v52  ;;  %v1547_v62 = vor.u32 1.1754944e-38, %v1546_v30 }
 0x257   :  { %v1622_v44 = vadd.f32 %v4051_v15, %v1621_v47 }
 0x258   :  { %v4055_v9 = vpop.eup %4054 }
 0x259   :  { %v1517_v20 = vmul.f32 %v4055_v9, %v1515_v2  ;;  %v1626_v21 = vsel %vm1625_vm15, %v4051_v15, %v1622_v44  ;;  %v4057_v43 = vpop.eup %4056  ;;  %v1543_v15 = vsel %vm5208_vm2, %v5186_v1, %v1539_v42  ;;  %vm1522_vm3 = vweird.f32 %v4055_v9 }
 0x25a   :  { %v1631_v33 = vsel %vm1628_vm0, %v1630_v41, %v1626_v21  ;;  %v1557_v41 = vsub.f32 1.0, %v1556_v11  ;;  %vm1523_vm6 = vmor %vm1521_vm4, %vm1522_vm3  ;;  %v4059_v60 = vpop.eup %4058 }
 0x25b   :  { %v1518_v61 = vsub.f32 1.0, %v1517_v20  ;;  %v1637_v17 = vmul.f32 %v4057_v43, %v1631_v33  ;;  %v1548_v20 = vsel %vm1545_vm5, %v1547_v62, %v1543_v15  ;;  %v1564_v33 = vand.u32 2147483647, %v5191_v52  ;;  %v6455_v15 = vld [vmem:[#allocation97_spill] sm:$0xff] }
 0x25c   :  { %v1558_v42 = vmul.f32 %v5200_v53, %v1557_v41  ;;  %v1570_v30 = vmul.f32 %v1548_v20, %v5057_v49  ;;  %v6459_v41 = vld [vmem:[#allocation100_spill] sm:$0xff] }
 0x25d   :  { %v1519_v13 = vmul.f32 %v4055_v9, %v1518_v61  ;;  %v1639_v44 = vpack.c.bf16 %v1637_v17, %v1637_v17  ;;  %vm1565_vm11 = vcmp.eq.f32.partialorder %v1564_v33, 8.507059e+37  ;;  %v6462_v20 = vld [vmem:[#allocation16_spill] sm:$0xff]  ;;  %v6471_v33 = vld [vmem:[#allocation29_spill] sm:$0xff] }
 0x25e   :  { %v1559_v62 = vadd.f32 %v5200_v53, %v1558_v42  ;;  %v6465_v42 = vld [vmem:[#allocation17_spill] sm:$0xff] }
 0x25f   :  { %v1520_v21 = vadd.f32 %v4055_v9, %v1519_v13  ;;  %1661 = vmatmul.bf16.vlgmr.msrb.gmra.mxu1 %v1639_v44  ;;  %1687 = vmatmul.bf16.vlgmr.msrb.gmra.mxu3 %v1639_v44  ;;  %v6456_v13 = vld [vmem:[#allocation98_spill] sm:$0xff] }
 0x260   :  { %1757 = vmatpush.bf16.msrb.mxu1 %v6377_v36  ;;  %1783 = vmatpush.bf16.msrb.mxu3 %v6378_v39  ;;  %v1563_v49 = vsel %vm1562_vm10, %v5200_v53, %v1559_v62  ;;  %v6454_v53 = vld [vmem:[#allocation19_spill] sm:$0xff]  ;;  %v6469_v62 = vld [vmem:[#allocation21_spill] sm:$0xff] }
 0x261   :  { %v1524_v1 = vsel %vm1523_vm6, %v4055_v9, %v1520_v21  ;;  %v1566_v9 = vand.u32 2147483648, %v5191_v52  ;;  %v6453_v52 = vld [vmem:[#allocation18_spill] sm:$0xff]  ;;  %v6460_v21 = vld [vmem:[#allocation101_spill] sm:$0xff] }
 0x262   :  { %v1529_v43 = vsel %vm1526_vm7, %v1528_v29, %v1524_v1  ;;  %v6461_v29 = vld [vmem:[#allocation13_spill] sm:$0xff] }
 0x263   :  { %v1571_v11 = vmul.f32 %v4059_v60, %v1529_v43  ;;  %v1567_v47 = vor.u32 1.1754944e-38, %v1566_v9  ;;  %v6463_v1 = vld [vmem:[#allocation25_spill] sm:$0xff]  ;;  %v6464_v60 = vld [vmem:[#allocation26_spill] sm:$0xff]  ;;  %v6466_v43 = vld [vmem:[#allocation20_spill] sm:$0xff] }
 0x264   :  { %1758 = vmatpush.bf16.msrb.mxu1 %v6379_v12  ;;  %1784 = vmatpush.bf16.msrb.mxu3 %v6380_v51  ;;  %v6470_v9 = vld [vmem:[#allocation24_spill] sm:$0xff] }
 0x265   :  { %v5222_v2 = vadd.f32 %v1571_v11, %v1570_v30  ;;  %v1568_v46 = vsel %vm1565_vm11, %v1567_v47, %v1563_v49  ;;  %v6467_v30 = vld [vmem:[#allocation27_spill] sm:$0xff]  ;;  %v6468_v11 = vld [vmem:[#allocation28_spill] sm:$0xff]  ;;  %v6472_v49 = vld [vmem:[#allocation30_spill] sm:$0xff] }
 0x266   :  { %v6473_v47 = vld [vmem:[#allocation31_spill] sm:$0xff] }
 0x267   :  { %4060 = vtanh.f32 %v5222_v2 }
 0x268   :  { %1759 = vmatpush.bf16.msrb.mxu1 %v6381_v14  ;;  %1785 = vmatpush.bf16.msrb.mxu3 %v6382_v35 }
 0x26c   :  { %1760 = vmatpush.bf16.msrb.mxu1 %v6383_v56  ;;  %1786 = vmatpush.bf16.msrb.mxu3 %v6384_v55 }
 0x26d   :  { %v4061_v61 = vpop.eup %4060 }
 0x26e   :  { %v1574_v17 = vmul.f32 %v4061_v61, %v1568_v46  ;;  %v6474_v61 = vld [vmem:[#allocation32_spill] sm:$0xff]  ;;  %v6475_v46 = vld [vmem:[#allocation39_spill] sm:$0xff] }
 0x26f   :  { %1713 = vmatmul.bf16.vlgmr.msra.gmra.mxu1 %v1639_v44  ;;  %1739 = vmatmul.bf16.vlgmr.msra.gmra.mxu3 %v1639_v44  ;;  %v6458_v44 = vld [vmem:[#allocation23_spill] sm:$0xff] }
 0x270   :  { %v1638_v23 = vpack.c.bf16 %v1574_v17, %v1574_v17  ;;  %1761 = vmatpush.bf16.msrb.mxu1 %v6385_v40  ;;  %1787 = vmatpush.bf16.msrb.mxu3 %v6386_v48  ;;  %v6476_v17 = vld [vmem:[#allocation40_spill] sm:$0xff] }
 0x272   :  { %1648 = vmatmul.bf16.vlgmr.msrb.gmra.mxu0 %v1638_v23  ;;  %1674 = vmatmul.bf16.vlgmr.msrb.gmra.mxu2 %v1638_v23 }
 0x273   :  { %1744 = vmatpush.bf16.msrb.mxu0 %v4842_v32  ;;  %1770 = vmatpush.bf16.msrb.mxu2 %v4844_v38 }
 0x274   :  { %1762 = vmatpush.bf16.msrb.mxu1 %v6387_v18  ;;  %1788 = vmatpush.bf16.msrb.mxu3 %v6388_v45 }
 0x277   :  { %1745 = vmatpush.bf16.msrb.mxu0 %v4854_v10  ;;  %1771 = vmatpush.bf16.msrb.mxu2 %v4856_v25 }
 0x278   :  { %1763 = vmatpush.bf16.msrb.mxu1 %v6389_v7  ;;  %1789 = vmatpush.bf16.msrb.mxu3 %v6390_v59 }
 0x27b   :  { %1746 = vmatpush.bf16.msrb.mxu0 %v4864_v5  ;;  %1772 = vmatpush.bf16.msrb.mxu2 %v4866_v57 }
 0x27c   :  { %1764 = vmatpush.bf16.msrb.mxu1 %v6391_v28  ;;  %1790 = vmatpush.bf16.msrb.mxu3 %v6392_v6 }
 0x27f   :  { %1747 = vmatpush.bf16.msrb.mxu0 %v4874_v58  ;;  %1765 = vmatmul.bf16.vlgmr.msrb.gmra.mxu1 %v1638_v23 }
 0x280   :  { %1941 = vmatpush.bf16.msra.mxu1 %v6393_v54  ;;  %1967 = vmatpush.bf16.msra.mxu3 %v6394_v34 }
 0x281   :  { %1773 = vmatpush.bf16.msrb.mxu2 %v4876_v31  ;;  %1791 = vmatmul.bf16.vlgmr.msrb.gmra.mxu3 %v1638_v23 }
 0x282   :  { %1700 = vmatmul.bf16.vlgmr.msra.gmra.mxu0 %v1638_v23  ;;  %1726 = vmatmul.bf16.vlgmr.msra.gmra.mxu2 %v1638_v23 }
 0x283   :  { %1748 = vmatpush.bf16.msrb.mxu0 %v4884_v4 }
 0x284   :  { %1942 = vmatpush.bf16.msra.mxu1 %v6395_v63  ;;  %1968 = vmatpush.bf16.msra.mxu3 %v6396_v50 }
 0x285   :  { %1774 = vmatpush.bf16.msrb.mxu2 %v4886_v3 }
 0x287   :  { %1749 = vmatpush.bf16.msrb.mxu0 %v4894_v22 }
 0x288   :  { %1943 = vmatpush.bf16.msra.mxu1 %v6397_v26  ;;  %1969 = vmatpush.bf16.msra.mxu3 %v6398_v37 }
 0x289   :  { %1775 = vmatpush.bf16.msrb.mxu2 %v4896_v19 }
 0x28b   :  { %1750 = vmatpush.bf16.msrb.mxu0 %v6455_v15 }
 0x28c   :  { %1944 = vmatpush.bf16.msra.mxu1 %v6453_v52  ;;  %1970 = vmatpush.bf16.msra.mxu3 %v6454_v53 }
 0x28d   :  { %1776 = vmatpush.bf16.msrb.mxu2 %v6456_v13 }
 0x28f   :  { %1751 = vmatpush.bf16.msrb.mxu0 %v6459_v41 }
 0x290   :  { %1945 = vmatpush.bf16.msra.mxu1 %v6457_v24  ;;  %1971 = vmatpush.bf16.msra.mxu3 %v6458_v44  ;;  %v6517_v44 = vld [vmem:[#allocation71_spill] sm:$0xff] }
 0x291   :  { %1777 = vmatpush.bf16.msrb.mxu2 %v6460_v21  ;;  %v6518_v24 = vld [vmem:[#allocation95_spill] sm:$0xff] }
 0x292   :  { %1752 = vmatmul.bf16.vlgmr.msrb.gmra.mxu0 %v1638_v23 }
 0x293   :  { %1928 = vmatpush.bf16.msra.mxu0 %v6461_v29 }
 0x294   :  { %1946 = vmatpush.bf16.msra.mxu1 %v6463_v1  ;;  %1972 = vmatpush.bf16.msra.mxu3 %v6464_v60  ;;  %v6515_v60 = vld [vmem:[#allocation121_spill] sm:$0xff] }
 0x295   :  { %1954 = vmatpush.bf16.msra.mxu2 %v6462_v20 }
 0x296   :  { %1778 = vmatmul.bf16.vlgmr.msrb.gmra.mxu2 %v1638_v23  ;;  %v6477_v23 = vld [vmem:[#allocation33_spill] sm:$0xff] }
 0x297   :  { %1929 = vmatpush.bf16.msra.mxu0 %v6465_v42 }
 0x298   :  { %1947 = vmatpush.bf16.msra.mxu1 %v6467_v30  ;;  %1973 = vmatpush.bf16.msra.mxu3 %v6468_v11  ;;  %v6478_v30 = vld [vmem:[#allocation34_spill] sm:$0xff]  ;;  %v6479_v11 = vld [vmem:[#allocation43_spill] sm:$0xff] }
 0x299   :  { %1955 = vmatpush.bf16.msra.mxu2 %v6466_v43 }
 0x29b   :  { %1930 = vmatpush.bf16.msra.mxu0 %v6469_v62  ;;  %v6480_v62 = vld [vmem:[#allocation44_spill] sm:$0xff] }
 0x29c   :  { %1948 = vmatpush.bf16.msra.mxu1 %v6471_v33  ;;  %1974 = vmatpush.bf16.msra.mxu3 %v6472_v49  ;;  %v6482_v33 = vld [vmem:[#allocation36_spill] sm:$0xff]  ;;  %v6483_v49 = vld [vmem:[#allocation47_spill] sm:$0xff] }
 0x29d   :  { %1956 = vmatpush.bf16.msra.mxu2 %v6470_v9  ;;  %v6481_v9 = vld [vmem:[#allocation35_spill] sm:$0xff] }
 0x29f   :  { %1931 = vmatpush.bf16.msra.mxu0 %v6475_v46  ;;  %v6486_v46 = vld [vmem:[#allocation38_spill] sm:$0xff] }
 0x2a0   :  { %1993 = vmatpush.bf16.msrb.mxu1 %v6473_v47  ;;  %2019 = vmatpush.bf16.msrb.mxu3 %v6474_v61  ;;  %v6484_v47 = vld [vmem:[#allocation48_spill] sm:$0xff]  ;;  %v6485_v61 = vld [vmem:[#allocation37_spill] sm:$0xff] }
 0x2a1   :  { %1957 = vmatpush.bf16.msra.mxu2 %v6476_v17  ;;  %v6487_v17 = vld [vmem:[#allocation51_spill] sm:$0xff] }
 0x2a3   :  { %1932 = vmatpush.bf16.msra.mxu0 %v6479_v11  ;;  %v6490_v11 = vld [vmem:[#allocation42_spill] sm:$0xff] }
 0x2a4   :  { %1994 = vmatpush.bf16.msrb.mxu1 %v6477_v23  ;;  %2020 = vmatpush.bf16.msrb.mxu3 %v6478_v30  ;;  %v6488_v23 = vld [vmem:[#allocation52_spill] sm:$0xff]  ;;  %v6489_v30 = vld [vmem:[#allocation41_spill] sm:$0xff] }
 0x2a5   :  { %1958 = vmatpush.bf16.msra.mxu2 %v6480_v62  ;;  %v6491_v62 = vld [vmem:[#allocation57_spill] sm:$0xff] }
 0x2a7   :  { %1933 = vmatpush.bf16.msra.mxu0 %v6483_v49  ;;  %v6494_v49 = vld [vmem:[#allocation60_spill] sm:$0xff] }
 0x2a8   :  { %1995 = vmatpush.bf16.msrb.mxu1 %v6481_v9  ;;  %2021 = vmatpush.bf16.msrb.mxu3 %v6482_v33  ;;  %v6492_v9 = vld [vmem:[#allocation58_spill] sm:$0xff]  ;;  %v6493_v33 = vld [vmem:[#allocation59_spill] sm:$0xff] }
 0x2a9   :  { %1959 = vmatpush.bf16.msra.mxu2 %v6484_v47  ;;  %v6495_v47 = vld [vmem:[#allocation45_spill] sm:$0xff] }
 0x2ab   :  { %1934 = vmatpush.bf16.msra.mxu0 %v6487_v17  ;;  %v6498_v17 = vld [vmem:[#allocation64_spill] sm:$0xff] }
 0x2ac   :  { %1996 = vmatpush.bf16.msrb.mxu1 %v6485_v61  ;;  %2022 = vmatpush.bf16.msrb.mxu3 %v6486_v46  ;;  %v6496_v61 = vld [vmem:[#allocation46_spill] sm:$0xff]  ;;  %v6497_v46 = vld [vmem:[#allocation63_spill] sm:$0xff] }
 0x2ad   :  { %1960 = vmatpush.bf16.msra.mxu2 %v6488_v23  ;;  %v6499_v23 = vld [vmem:[#allocation49_spill] sm:$0xff] }
 0x2af   :  { %1935 = vmatpush.bf16.msra.mxu0 %v6491_v62  ;;  %v6502_v62 = vld [vmem:[#allocation68_spill] sm:$0xff] }
 0x2b0   :  { %1997 = vmatpush.bf16.msrb.mxu1 %v6489_v30  ;;  %2023 = vmatpush.bf16.msrb.mxu3 %v6490_v11  ;;  %v6500_v30 = vld [vmem:[#allocation50_spill] sm:$0xff]  ;;  %v6501_v11 = vld [vmem:[#allocation67_spill] sm:$0xff] }
 0x2b1   :  { %1961 = vmatpush.bf16.msra.mxu2 %v6492_v9  ;;  %v6503_v9 = vld [vmem:[#allocation53_spill] sm:$0xff] }
 0x2b3   :  { %1980 = vmatpush.bf16.msrb.mxu0 %v6493_v33  ;;  %v6504_v33 = vld [vmem:[#allocation54_spill] sm:$0xff] }
 0x2b4   :  { %1998 = vmatpush.bf16.msrb.mxu1 %v6495_v47  ;;  %2024 = vmatpush.bf16.msrb.mxu3 %v6496_v61  ;;  %v6506_v47 = vld [vmem:[#allocation74_spill] sm:$0xff]  ;;  %v6507_v61 = vld [vmem:[#allocation77_spill] sm:$0xff] }
 0x2b5   :  { %2006 = vmatpush.bf16.msrb.mxu2 %v6494_v49  ;;  %v6505_v49 = vld [vmem:[#allocation73_spill] sm:$0xff] }
 0x2b7   :  { %1981 = vmatpush.bf16.msrb.mxu0 %v6497_v46  ;;  %v6508_v46 = vld [vmem:[#allocation78_spill] sm:$0xff] }
 0x2b8   :  { %1999 = vmatpush.bf16.msrb.mxu1 %v6499_v23  ;;  %2025 = vmatpush.bf16.msrb.mxu3 %v6500_v30  ;;  %v6510_v23 = vld [vmem:[#allocation83_spill] sm:$0xff]  ;;  %v6511_v30 = vld [vmem:[#allocation86_spill] sm:$0xff] }
 0x2b9   :  { %2007 = vmatpush.bf16.msrb.mxu2 %v6498_v17  ;;  %v6509_v17 = vld [vmem:[#allocation82_spill] sm:$0xff] }
 0x2bb   :  { %1982 = vmatpush.bf16.msrb.mxu0 %v6501_v11  ;;  %v6512_v11 = vld [vmem:[#allocation87_spill] sm:$0xff] }
 0x2bc   :  { %2000 = vmatpush.bf16.msrb.mxu1 %v6503_v9  ;;  %2026 = vmatpush.bf16.msrb.mxu3 %v6504_v33  ;;  %v6514_v9 = vld [vmem:[#allocation92_spill] sm:$0xff] }
 0x2bd   :  { %2008 = vmatpush.bf16.msrb.mxu2 %v6502_v62  ;;  %v6513_v62 = vld [vmem:[#allocation91_spill] sm:$0xff] }
 0x2bf   :  { %1983 = vmatpush.bf16.msrb.mxu0 %v6505_v49 }
 0x2c1   :  { %2009 = vmatpush.bf16.msrb.mxu2 %v6506_v47 }
 0x2c3   :  { %1984 = vmatpush.bf16.msrb.mxu0 %v6507_v61 }
 0x2c5   :  { %2010 = vmatpush.bf16.msrb.mxu2 %v6508_v46 }
 0x2c7   :  { %1985 = vmatpush.bf16.msrb.mxu0 %v6509_v17 }
 0x2c9   :  { %2011 = vmatpush.bf16.msrb.mxu2 %v6510_v23 }
 0x2cb   :  { %1986 = vmatpush.bf16.msrb.mxu0 %v6511_v30  ;;  %v6516_v30 = vld [vmem:[#allocation122_spill] sm:$0xff] }
 0x2cd   :  { %2012 = vmatpush.bf16.msrb.mxu2 %v6512_v11 }
 0x2cf   :  { %1987 = vmatpush.bf16.msrb.mxu0 %v6513_v62 }
 0x2d1   :  { %2013 = vmatpush.bf16.msrb.mxu2 %v6514_v9 }
 0x2dc   :  { %v1662_v33 = vpop.f32.mrf.mxu1 }
 0x2e2   :  { %v1688_v49 = vpop.f32.mrf.mxu3 }
 0x2e4   :  { %v1664_v43 = vpop.f32.mrf.mxu1 }
 0x2e5   :  { %v344_v43 = vadd.f32 %v6518_v24, %v6517_v44 }
 0x2ea   :  { %v1690_v47 = vpop.f32.mrf.mxu3 }
 0x2ec   :  { %v1714_v42 = vpop.f32.mrf.mxu1 }
 0x2ef   :  { %v1649_v61 = vpop.f32.mrf.mxu0 }
 0x2f0   :  { %v1650_v46 = vadd.f32 %v1649_v61, %v6515_v60 }
 0x2f2   :  { %v1663_v1 = vadd.f32 %v1662_v33, %v1650_v46  ;;  %v1740_v17 = vpop.f32.mrf.mxu3 }
 0x2f4   :  { %v3813_v20 = vmul.f32 -1.442695, %v1663_v1  ;;  %v1716_v23 = vpop.f32.mrf.mxu1 }
 0x2f5   :  { %v1675_v29 = vpop.f32.mrf.mxu2 }
 0x2f6   :  { %4062 = vpow2.f32 %v3813_v20  ;;  %v1676_v11 = vadd.f32 %v1675_v29, %v6516_v30 }
 0x2f7   :  { %v1651_v21 = vpop.f32.mrf.mxu0 }
 0x2f8   :  { %v1689_v62 = vadd.f32 %v1688_v49, %v1676_v11  ;;  %v6519_v11 = vld [vmem:[#allocation80_spill] sm:$0xff] }
 0x2fa   :  { %v3814_v41 = vmul.f32 -1.442695, %v1689_v62  ;;  %v1742_v9 = vpop.f32.mrf.mxu3  ;;  %v6520_v62 = vld [vmem:[#allocation96_spill] sm:$0xff] }
 0x2fb   :  { %v402_v9 = vadd.f32 %v6520_v62, %v6519_v11 }
 0x2fc   :  { %v4063_v47 = vpop.eup %4062  ;;  %4064 = vpow2.f32 %v3814_v41  ;;  %v1766_v13 = vpop.f32.mrf.mxu1 }
 0x2fd   :  { %v5327_v15 = vadd.f32 1.0, %v4063_v47  ;;  %v1797_v33 = vadd.f32 %v1766_v13, %v344_v43  ;;  %v1677_v61 = vpop.f32.mrf.mxu2 }
 0x2ff   :  { %4066 = vrcp.f32 %v5327_v15  ;;  %v3811_v1 = vmul.f32 -1.442695, %v1797_v33  ;;  %v1701_v20 = vpop.f32.mrf.mxu0  ;;  %vm1872_vm14 = vweird.f32 %v5327_v15 }
 0x301   :  { %4068 = vpow2.f32 %v3811_v1  ;;  %v1702_v1 = vadd.f32 %v1701_v20, %v6443_v0 }
 0x302   :  { %v4065_v46 = vpop.eup %4064 }
 0x303   :  { %v1885_v21 = vadd.f32 1.0, %v4065_v46 }
 0x304   :  { %v1792_v29 = vpop.f32.mrf.mxu3  ;;  %v1768_v49 = vpop.f32.mrf.mxu1 }
 0x305   :  { %v4067_v24 = vpop.eup %4066  ;;  %4070 = vrcp.f32 %v1885_v21  ;;  %v1727_v41 = vpop.f32.mrf.mxu2  ;;  %v1799_v47 = vadd.f32 %v1792_v29, %v402_v9  ;;  %v6521_v29 = vld [vmem:[#allocation111_spill] sm:$0xff]  ;;  %vm1891_vm15 = vweird.f32 %v1885_v21 }
 0x306   :  { %v1868_v23 = vmul.f32 %v4067_v24, %v5327_v15  ;;  %v1728_v13 = vadd.f32 %v1727_v41, %v5016_v27  ;;  %v315_v9 = vadd.f32 %v6521_v29, %v6444_v8  ;;  %vm1873_vm12 = vweird.f32 %v4067_v24 }
 0x307   :  { %v1703_v43 = vpop.f32.mrf.mxu0  ;;  %v4069_v61 = vpop.eup %4068  ;;  %v3812_v46 = vmul.f32 -1.442695, %v1799_v47  ;;  %vm5342_vm0 = vmor %vm1872_vm14, %vm1873_vm12 }
 0x308   :  { %v1869_v33 = vsub.f32 1.0, %v1868_v23  ;;  %v1741_v44 = vadd.f32 %v1740_v17, %v1728_v13  ;;  %v5335_v60 = vadd.f32 1.0, %v4069_v61  ;;  %v1715_v43 = vadd.f32 %v1714_v42, %v1702_v1 }
 0x309   :  { %v1897_v23 = vand.u32 2147483648, %v1885_v21  ;;  %v1895_v17 = vand.u32 2147483647, %v1885_v21  ;;  %v1876_v42 = vand.u32 2147483647, %v5327_v15 }
 0x30a   :  { %v3815_v62 = vmul.f32 -1.442695, %v1741_v44  ;;  %v1870_v53 = vmul.f32 %v4067_v24, %v1869_v33  ;;  %vm1828_vm9 = vweird.f32 %v5335_v60 }
 0x30b   :  { %v4071_v30 = vpop.eup %4070  ;;  %vm1896_vm2 = vcmp.eq.f32.partialorder %v1895_v17, 8.507059e+37  ;;  %vm1877_vm3 = vcmp.eq.f32.partialorder %v1876_v42, 8.507059e+37 }
 0x30c   :  { %v1794_v49 = vpop.f32.mrf.mxu3  ;;  %v1887_v11 = vmul.f32 %v4071_v30, %v1885_v21  ;;  %4072 = vpow2.f32 %v3815_v62  ;;  %vm1892_vm13 = vweird.f32 %v4071_v30  ;;  %v1871_v44 = vadd.f32 %v4067_v24, %v1870_v53 }
 0x30d   :  { %v1729_v52 = vpop.f32.mrf.mxu2  ;;  %4074 = vpow2.f32 %v3812_v46  ;;  %vm1893_vm1 = vmor %vm1891_vm15, %vm1892_vm13  ;;  %v1898_v46 = vor.u32 1.1754944e-38, %v1897_v23 }
 0x30e   :  { %v1888_v41 = vsub.f32 1.0, %v1887_v11  ;;  %4076 = vrcp.f32 %v5335_v60  ;;  %v1878_v52 = vand.u32 2147483648, %v5327_v15  ;;  %v1875_v53 = vsel %vm5342_vm0, %v4067_v24, %v1871_v44 }
 0x30f   :  { %v1753_v20 = vpop.f32.mrf.mxu0  ;;  %4078 = vtanh.f32 %v1715_v43 }
 0x310   :  { %v1889_v47 = vmul.f32 %v4071_v30, %v1888_v41  ;;  %v1796_v13 = vadd.f32 %v1753_v20, %v315_v9  ;;  %v1879_v9 = vor.u32 1.1754944e-38, %v1878_v52 }
 0x312   :  { %v1890_v11 = vadd.f32 %v4071_v30, %v1889_v47  ;;  %v3810_v33 = vmul.f32 -1.442695, %v1796_v13  ;;  %v4073_v1 = vpop.eup %4072  ;;  %v1880_v20 = vsel %vm1877_vm3, %v1879_v9, %v1875_v53  ;;  %v6525_v9 = vld [vmem:[#allocation112_spill] sm:$0xff] }
 0x313   :  { %v4075_v62 = vpop.eup %4074  ;;  %v1905_v29 = vadd.f32 1.0, %v4073_v1 }
 0x314   :  { %v1894_v49 = vsel %vm1893_vm1, %v4071_v30, %v1890_v11  ;;  %v5349_v21 = vpop.eup %4076  ;;  %4080 = vpow2.f32 %v3810_v33  ;;  %v5354_v24 = vadd.f32 1.0, %v4075_v62 }
 0x315   :  { %v1899_v41 = vsel %vm1896_vm2, %v1898_v46, %v1894_v49  ;;  %4082 = vrcp.f32 %v1905_v29  ;;  %v1824_v43 = vmul.f32 %v5349_v21, %v5335_v60  ;;  %v4079_v13 = vpop.eup %4078  ;;  %v1915_v53 = vand.u32 2147483647, %v1905_v29  ;;  %v6524_v49 = vld [vmem:[#allocation89_spill] sm:$0xff] }
 0x316   :  { %v1921_v23 = vmul.f32 %v1899_v41, %v5193_v16  ;;  %v1922_v30 = vmul.f32 %v4079_v13, %v1880_v20  ;;  %4084 = vrcp.f32 %v5354_v24  ;;  %v1917_v16 = vand.u32 2147483648, %v1905_v29 }
 0x317   :  { %v1755_v47 = vpop.f32.mrf.mxu0  ;;  %v1825_v61 = vsub.f32 1.0, %v1824_v43  ;;  %v373_v41 = vadd.f32 %v6525_v9, %v6524_v49  ;;  %vm1911_vm5 = vweird.f32 %v1905_v29  ;;  %vm1829_vm6 = vweird.f32 %v5349_v21 }
 0x318   :  { %v5356_v52 = vadd.f32 %v1922_v30, %v1921_v23  ;;  %v1918_v30 = vor.u32 1.1754944e-38, %v1917_v16  ;;  %vm1916_vm8 = vcmp.eq.f32.partialorder %v1915_v53, 8.507059e+37  ;;  %vm5371_vm10 = vmor %vm1828_vm9, %vm1829_vm6  ;;  %vm1848_vm1 = vweird.f32 %v5354_v24 }
 0x319   :  { %v1779_v15 = vpop.f32.mrf.mxu2  ;;  %v1826_v46 = vmul.f32 %v5349_v21, %v1825_v61 }
 0x31a   :  { %v4081_v17 = vpop.eup %4080  ;;  %v1798_v23 = vadd.f32 %v1779_v15, %v373_v41 }
 0x31b   :  { %v4083_v44 = vpop.eup %4082  ;;  %v1803_v11 = vadd.f32 1.0, %v4081_v17  ;;  %v1827_v13 = vadd.f32 %v5349_v21, %v1826_v46  ;;  %v1832_v46 = vand.u32 2147483647, %v5335_v60 }
 0x31c   :  { %v1907_v42 = vmul.f32 %v4083_v44, %v1905_v29  ;;  %vm1912_vm4 = vweird.f32 %v4083_v44  ;;  %v5363_v20 = vpop.eup %4084 }
 0x31d   :  { %4086 = vrcp.f32 %v1803_v11  ;;  %vm1913_vm7 = vmor %vm1911_vm5, %vm1912_vm4  ;;  %v1844_v29 = vmul.f32 %v5363_v20, %v5354_v24  ;;  %v1815_v9 = vand.u32 2147483648, %v1803_v11  ;;  %v1813_v41 = vand.u32 2147483647, %v1803_v11 }
 0x31e   :  { %v1908_v1 = vsub.f32 1.0, %v1907_v42  ;;  %4088 = vtanh.f32 %v5356_v52  ;;  %vm1809_vm12 = vweird.f32 %v1803_v11  ;;  %vm1833_vm13 = vcmp.eq.f32.partialorder %v1832_v46, 8.507059e+37 }
 0x31f   :  { %4090 = vtanh.f32 %v1798_v23  ;;  %vm1814_vm15 = vcmp.eq.f32.partialorder %v1813_v41, 8.507059e+37  ;;  %vm1849_vm0 = vweird.f32 %v5363_v20  ;;  %v6532_v41 = vld [vmem:[#allocation22_spill] sm:$0xff] }
 0x320   :  { %v1909_v62 = vmul.f32 %v4083_v44, %v1908_v1  ;;  %vm1850_vm2 = vmor %vm1848_vm1, %vm1849_vm0 }
 0x321   :  { %v1781_v33 = vpop.f32.mrf.mxu2 }
 0x322   :  { %v1910_v47 = vadd.f32 %v4083_v44, %v1909_v62  ;;  %v1834_v33 = vand.u32 2147483648, %v5335_v60  ;;  %v1816_v60 = vor.u32 1.1754944e-38, %v1815_v9 }
 0x323   :  { %v4087_v43 = vpop.eup %4086 }
 0x324   :  { %v1805_v17 = vmul.f32 %v4087_v43, %v1803_v11  ;;  %v1914_v61 = vsel %vm1913_vm7, %v4083_v44, %v1910_v47  ;;  %v4089_v42 = vpop.eup %4088  ;;  %v1831_v44 = vsel %vm5371_vm10, %v5349_v21, %v1827_v13  ;;  %vm1810_vm11 = vweird.f32 %v4087_v43 }
 0x325   :  { %v1919_v1 = vsel %vm1916_vm8, %v1918_v30, %v1914_v61  ;;  %v1835_v49 = vor.u32 1.1754944e-38, %v1834_v33  ;;  %v1845_v30 = vsub.f32 1.0, %v1844_v29  ;;  %vm1811_vm14 = vmor %vm1809_vm12, %vm1810_vm11  ;;  %v4091_v23 = vpop.eup %4090 }
 0x326   :  { %v1806_v15 = vsub.f32 1.0, %v1805_v17  ;;  %v1925_v16 = vmul.f32 %v4089_v42, %v1919_v1  ;;  %v1852_v1 = vand.u32 2147483647, %v5354_v24 }
 0x327   :  { %v1836_v17 = vsel %vm1833_vm13, %v1835_v49, %v1831_v44  ;;  %v1846_v13 = vmul.f32 %v5363_v20, %v1845_v30  ;;  %v6530_v44 = vld [vmem:[#allocation97_spill] sm:$0xff]  ;;  %v6534_v30 = vld [vmem:[#allocation100_spill] sm:$0xff] }
 0x328   :  { %v1807_v53 = vmul.f32 %v4087_v43, %v1806_v15  ;;  %v1927_v47 = vpack.c.bf16 %v1925_v16, %v1925_v16  ;;  %v1858_v33 = vmul.f32 %v1836_v17, %v5222_v2  ;;  %vm1853_vm3 = vcmp.eq.f32.partialorder %v1852_v1, 8.507059e+37  ;;  %v6537_v17 = vld [vmem:[#allocation16_spill] sm:$0xff]  ;;  %v6546_v1 = vld [vmem:[#allocation29_spill] sm:$0xff] }
 0x329   :  { %v1847_v49 = vadd.f32 %v5363_v20, %v1846_v13  ;;  %v6540_v13 = vld [vmem:[#allocation17_spill] sm:$0xff] }
 0x32a   :  { %v1808_v61 = vadd.f32 %v4087_v43, %v1807_v53  ;;  %1949 = vmatmul.bf16.vlgmr.msra.gmra.mxu1 %v1927_v47  ;;  %1975 = vmatmul.bf16.vlgmr.msra.gmra.mxu3 %v1927_v47  ;;  %v6531_v53 = vld [vmem:[#allocation98_spill] sm:$0xff] }
 0x32b   :  { %2045 = vmatpush.bf16.msra.mxu1 %v6377_v36  ;;  %2071 = vmatpush.bf16.msra.mxu3 %v6378_v39  ;;  %v1851_v2 = vsel %vm1850_vm2, %v5363_v20, %v1847_v49  ;;  %v6529_v20 = vld [vmem:[#allocation19_spill] sm:$0xff]  ;;  %v6544_v49 = vld [vmem:[#allocation21_spill] sm:$0xff] }
 0x32c   :  { %v1812_v21 = vsel %vm1811_vm14, %v4087_v43, %v1808_v61  ;;  %v1854_v43 = vand.u32 2147483648, %v5354_v24  ;;  %v6528_v24 = vld [vmem:[#allocation18_spill] sm:$0xff]  ;;  %v6535_v61 = vld [vmem:[#allocation101_spill] sm:$0xff] }
 0x32d   :  { %v1817_v42 = vsel %vm1814_vm15, %v1816_v60, %v1812_v21  ;;  %v6536_v60 = vld [vmem:[#allocation13_spill] sm:$0xff] }
 0x32e   :  { %v1859_v29 = vmul.f32 %v4091_v23, %v1817_v42  ;;  %v1855_v62 = vor.u32 1.1754944e-38, %v1854_v43  ;;  %v6538_v21 = vld [vmem:[#allocation25_spill] sm:$0xff]  ;;  %v6539_v23 = vld [vmem:[#allocation26_spill] sm:$0xff]  ;;  %v6541_v42 = vld [vmem:[#allocation20_spill] sm:$0xff] }
 0x32f   :  { %2046 = vmatpush.bf16.msra.mxu1 %v6379_v12  ;;  %2072 = vmatpush.bf16.msra.mxu3 %v6380_v51  ;;  %v6545_v43 = vld [vmem:[#allocation24_spill] sm:$0xff] }
 0x330   :  { %v5385_v11 = vadd.f32 %v1859_v29, %v1858_v33  ;;  %v1856_v46 = vsel %vm1853_vm3, %v1855_v62, %v1851_v2  ;;  %v6542_v33 = vld [vmem:[#allocation27_spill] sm:$0xff]  ;;  %v6543_v29 = vld [vmem:[#allocation28_spill] sm:$0xff]  ;;  %v6547_v2 = vld [vmem:[#allocation30_spill] sm:$0xff] }
 0x331   :  { %v6548_v62 = vld [vmem:[#allocation31_spill] sm:$0xff] }
 0x332   :  { %4092 = vtanh.f32 %v5385_v11 }
 0x333   :  { %2047 = vmatpush.bf16.msra.mxu1 %v6381_v14  ;;  %2073 = vmatpush.bf16.msra.mxu3 %v6382_v35 }
 0x337   :  { %2048 = vmatpush.bf16.msra.mxu1 %v6383_v56  ;;  %2074 = vmatpush.bf16.msra.mxu3 %v6384_v55 }
 0x338   :  { %v4093_v15 = vpop.eup %4092 }
 0x339   :  { %v1862_v16 = vmul.f32 %v4093_v15, %v1856_v46  ;;  %v6549_v15 = vld [vmem:[#allocation32_spill] sm:$0xff]  ;;  %v6550_v46 = vld [vmem:[#allocation39_spill] sm:$0xff] }
 0x33a   :  { %2001 = vmatmul.bf16.vlgmr.msrb.gmra.mxu1 %v1927_v47  ;;  %2027 = vmatmul.bf16.vlgmr.msrb.gmra.mxu3 %v1927_v47  ;;  %v6533_v47 = vld [vmem:[#allocation23_spill] sm:$0xff] }
 0x33b   :  { %v1926_v9 = vpack.c.bf16 %v1862_v16, %v1862_v16  ;;  %2049 = vmatpush.bf16.msra.mxu1 %v6385_v40  ;;  %2075 = vmatpush.bf16.msra.mxu3 %v6386_v48  ;;  %v6551_v16 = vld [vmem:[#allocation40_spill] sm:$0xff] }
 0x33d   :  { %1936 = vmatmul.bf16.vlgmr.msra.gmra.mxu0 %v1926_v9  ;;  %1962 = vmatmul.bf16.vlgmr.msra.gmra.mxu2 %v1926_v9 }
 0x33e   :  { %2032 = vmatpush.bf16.msra.mxu0 %v4842_v32  ;;  %2058 = vmatpush.bf16.msra.mxu2 %v4844_v38 }
 0x33f   :  { %2050 = vmatpush.bf16.msra.mxu1 %v6387_v18  ;;  %2076 = vmatpush.bf16.msra.mxu3 %v6388_v45 }
 0x342   :  { %2033 = vmatpush.bf16.msra.mxu0 %v4854_v10  ;;  %2059 = vmatpush.bf16.msra.mxu2 %v4856_v25 }
 0x343   :  { %2051 = vmatpush.bf16.msra.mxu1 %v6389_v7  ;;  %2077 = vmatpush.bf16.msra.mxu3 %v6390_v59 }
 0x346   :  { %2034 = vmatpush.bf16.msra.mxu0 %v4864_v5  ;;  %2060 = vmatpush.bf16.msra.mxu2 %v4866_v57 }
 0x347   :  { %2052 = vmatpush.bf16.msra.mxu1 %v6391_v28  ;;  %2078 = vmatpush.bf16.msra.mxu3 %v6392_v6 }
 0x34a   :  { %2035 = vmatpush.bf16.msra.mxu0 %v4874_v58  ;;  %2053 = vmatmul.bf16.vlgmr.msra.gmra.mxu1 %v1926_v9 }
 0x34b   :  { %2229 = vmatpush.bf16.msrb.mxu1 %v6393_v54  ;;  %2255 = vmatpush.bf16.msrb.mxu3 %v6394_v34 }
 0x34c   :  { %2061 = vmatpush.bf16.msra.mxu2 %v4876_v31  ;;  %2079 = vmatmul.bf16.vlgmr.msra.gmra.mxu3 %v1926_v9 }
 0x34d   :  { %1988 = vmatmul.bf16.vlgmr.msrb.gmra.mxu0 %v1926_v9  ;;  %2014 = vmatmul.bf16.vlgmr.msrb.gmra.mxu2 %v1926_v9 }
 0x34e   :  { %2036 = vmatpush.bf16.msra.mxu0 %v4884_v4 }
 0x34f   :  { %2230 = vmatpush.bf16.msrb.mxu1 %v6395_v63  ;;  %2256 = vmatpush.bf16.msrb.mxu3 %v6396_v50 }
 0x350   :  { %2062 = vmatpush.bf16.msra.mxu2 %v4886_v3 }
 0x352   :  { %2037 = vmatpush.bf16.msra.mxu0 %v4894_v22 }
 0x353   :  { %2231 = vmatpush.bf16.msrb.mxu1 %v6397_v26  ;;  %2257 = vmatpush.bf16.msrb.mxu3 %v6398_v37 }
 0x354   :  { %2063 = vmatpush.bf16.msra.mxu2 %v4896_v19 }
 0x356   :  { %2038 = vmatpush.bf16.msra.mxu0 %v6530_v44 }
 0x357   :  { %2232 = vmatpush.bf16.msrb.mxu1 %v6528_v24  ;;  %2258 = vmatpush.bf16.msrb.mxu3 %v6529_v20 }
 0x358   :  { %2064 = vmatpush.bf16.msra.mxu2 %v6531_v53 }
 0x35a   :  { %2039 = vmatpush.bf16.msra.mxu0 %v6534_v30 }
 0x35b   :  { %2233 = vmatpush.bf16.msrb.mxu1 %v6532_v41  ;;  %2259 = vmatpush.bf16.msrb.mxu3 %v6533_v47  ;;  %v6592_v47 = vld [vmem:[#allocation71_spill] sm:$0xff] }
 0x35c   :  { %2065 = vmatpush.bf16.msra.mxu2 %v6535_v61  ;;  %v6593_v41 = vld [vmem:[#allocation99_spill] sm:$0xff] }
 0x35d   :  { %2040 = vmatmul.bf16.vlgmr.msra.gmra.mxu0 %v1926_v9 }
 0x35e   :  { %2216 = vmatpush.bf16.msrb.mxu0 %v6536_v60 }
 0x35f   :  { %2234 = vmatpush.bf16.msrb.mxu1 %v6538_v21  ;;  %2260 = vmatpush.bf16.msrb.mxu3 %v6539_v23  ;;  %v6590_v23 = vld [vmem:[#allocation121_spill] sm:$0xff] }
 0x360   :  { %2242 = vmatpush.bf16.msrb.mxu2 %v6537_v17 }
 0x361   :  { %2066 = vmatmul.bf16.vlgmr.msra.gmra.mxu2 %v1926_v9  ;;  %v6552_v9 = vld [vmem:[#allocation33_spill] sm:$0xff] }
 0x362   :  { %2217 = vmatpush.bf16.msrb.mxu0 %v6540_v13 }
 0x363   :  { %2235 = vmatpush.bf16.msrb.mxu1 %v6542_v33  ;;  %2261 = vmatpush.bf16.msrb.mxu3 %v6543_v29  ;;  %v6553_v33 = vld [vmem:[#allocation34_spill] sm:$0xff]  ;;  %v6554_v29 = vld [vmem:[#allocation43_spill] sm:$0xff] }
 0x364   :  { %2243 = vmatpush.bf16.msrb.mxu2 %v6541_v42 }
 0x366   :  { %2218 = vmatpush.bf16.msrb.mxu0 %v6544_v49  ;;  %v6555_v49 = vld [vmem:[#allocation44_spill] sm:$0xff] }
 0x367   :  { %2236 = vmatpush.bf16.msrb.mxu1 %v6546_v1  ;;  %2262 = vmatpush.bf16.msrb.mxu3 %v6547_v2  ;;  %v6557_v1 = vld [vmem:[#allocation36_spill] sm:$0xff]  ;;  %v6558_v2 = vld [vmem:[#allocation47_spill] sm:$0xff] }
 0x368   :  { %2244 = vmatpush.bf16.msrb.mxu2 %v6545_v43  ;;  %v6556_v43 = vld [vmem:[#allocation35_spill] sm:$0xff] }
 0x36a   :  { %2219 = vmatpush.bf16.msrb.mxu0 %v6550_v46  ;;  %v6561_v46 = vld [vmem:[#allocation38_spill] sm:$0xff] }
 0x36b   :  { %2281 = vmatpush.bf16.msra.mxu1 %v6548_v62  ;;  %2307 = vmatpush.bf16.msra.mxu3 %v6549_v15  ;;  %v6559_v62 = vld [vmem:[#allocation48_spill] sm:$0xff]  ;;  %v6560_v15 = vld [vmem:[#allocation37_spill] sm:$0xff] }
 0x36c   :  { %2245 = vmatpush.bf16.msrb.mxu2 %v6551_v16  ;;  %v6562_v16 = vld [vmem:[#allocation51_spill] sm:$0xff] }
 0x36e   :  { %2220 = vmatpush.bf16.msrb.mxu0 %v6554_v29  ;;  %v6565_v29 = vld [vmem:[#allocation42_spill] sm:$0xff] }
 0x36f   :  { %2282 = vmatpush.bf16.msra.mxu1 %v6552_v9  ;;  %2308 = vmatpush.bf16.msra.mxu3 %v6553_v33  ;;  %v6563_v9 = vld [vmem:[#allocation52_spill] sm:$0xff]  ;;  %v6564_v33 = vld [vmem:[#allocation41_spill] sm:$0xff] }
 0x370   :  { %2246 = vmatpush.bf16.msrb.mxu2 %v6555_v49  ;;  %v6566_v49 = vld [vmem:[#allocation57_spill] sm:$0xff] }
 0x372   :  { %2221 = vmatpush.bf16.msrb.mxu0 %v6558_v2  ;;  %v6569_v2 = vld [vmem:[#allocation60_spill] sm:$0xff] }
 0x373   :  { %2283 = vmatpush.bf16.msra.mxu1 %v6556_v43  ;;  %2309 = vmatpush.bf16.msra.mxu3 %v6557_v1  ;;  %v6567_v43 = vld [vmem:[#allocation58_spill] sm:$0xff]  ;;  %v6568_v1 = vld [vmem:[#allocation59_spill] sm:$0xff] }
 0x374   :  { %2247 = vmatpush.bf16.msrb.mxu2 %v6559_v62  ;;  %v6570_v62 = vld [vmem:[#allocation45_spill] sm:$0xff] }
 0x376   :  { %2222 = vmatpush.bf16.msrb.mxu0 %v6562_v16  ;;  %v6573_v16 = vld [vmem:[#allocation64_spill] sm:$0xff] }
 0x377   :  { %2284 = vmatpush.bf16.msra.mxu1 %v6560_v15  ;;  %2310 = vmatpush.bf16.msra.mxu3 %v6561_v46  ;;  %v6571_v15 = vld [vmem:[#allocation46_spill] sm:$0xff]  ;;  %v6572_v46 = vld [vmem:[#allocation63_spill] sm:$0xff] }
 0x378   :  { %2248 = vmatpush.bf16.msrb.mxu2 %v6563_v9  ;;  %v6574_v9 = vld [vmem:[#allocation49_spill] sm:$0xff] }
 0x37a   :  { %2223 = vmatpush.bf16.msrb.mxu0 %v6566_v49  ;;  %v6577_v49 = vld [vmem:[#allocation68_spill] sm:$0xff] }
 0x37b   :  { %2285 = vmatpush.bf16.msra.mxu1 %v6564_v33  ;;  %2311 = vmatpush.bf16.msra.mxu3 %v6565_v29  ;;  %v6575_v33 = vld [vmem:[#allocation50_spill] sm:$0xff]  ;;  %v6576_v29 = vld [vmem:[#allocation67_spill] sm:$0xff] }
 0x37c   :  { %2249 = vmatpush.bf16.msrb.mxu2 %v6567_v43  ;;  %v6578_v43 = vld [vmem:[#allocation53_spill] sm:$0xff] }
 0x37e   :  { %2268 = vmatpush.bf16.msra.mxu0 %v6568_v1  ;;  %v6579_v1 = vld [vmem:[#allocation54_spill] sm:$0xff] }
 0x37f   :  { %2286 = vmatpush.bf16.msra.mxu1 %v6570_v62  ;;  %2312 = vmatpush.bf16.msra.mxu3 %v6571_v15  ;;  %v6581_v62 = vld [vmem:[#allocation74_spill] sm:$0xff]  ;;  %v6582_v15 = vld [vmem:[#allocation77_spill] sm:$0xff] }
 0x380   :  { %2294 = vmatpush.bf16.msra.mxu2 %v6569_v2  ;;  %v6580_v2 = vld [vmem:[#allocation73_spill] sm:$0xff] }
 0x382   :  { %2269 = vmatpush.bf16.msra.mxu0 %v6572_v46  ;;  %v6583_v46 = vld [vmem:[#allocation78_spill] sm:$0xff] }
 0x383   :  { %2287 = vmatpush.bf16.msra.mxu1 %v6574_v9  ;;  %2313 = vmatpush.bf16.msra.mxu3 %v6575_v33  ;;  %v6585_v9 = vld [vmem:[#allocation83_spill] sm:$0xff]  ;;  %v6586_v33 = vld [vmem:[#allocation86_spill] sm:$0xff] }
 0x384   :  { %2295 = vmatpush.bf16.msra.mxu2 %v6573_v16  ;;  %v6584_v16 = vld [vmem:[#allocation82_spill] sm:$0xff] }
 0x386   :  { %2270 = vmatpush.bf16.msra.mxu0 %v6576_v29  ;;  %v6587_v29 = vld [vmem:[#allocation87_spill] sm:$0xff] }
 0x387   :  { %2288 = vmatpush.bf16.msra.mxu1 %v6578_v43  ;;  %2314 = vmatpush.bf16.msra.mxu3 %v6579_v1  ;;  %v6589_v43 = vld [vmem:[#allocation92_spill] sm:$0xff] }
 0x388   :  { %2296 = vmatpush.bf16.msra.mxu2 %v6577_v49  ;;  %v6588_v49 = vld [vmem:[#allocation91_spill] sm:$0xff] }
 0x38a   :  { %2271 = vmatpush.bf16.msra.mxu0 %v6580_v2 }
 0x38c   :  { %2297 = vmatpush.bf16.msra.mxu2 %v6581_v62 }
 0x38e   :  { %2272 = vmatpush.bf16.msra.mxu0 %v6582_v15 }
 0x390   :  { %2298 = vmatpush.bf16.msra.mxu2 %v6583_v46 }
 0x392   :  { %2273 = vmatpush.bf16.msra.mxu0 %v6584_v16 }
 0x394   :  { %2299 = vmatpush.bf16.msra.mxu2 %v6585_v9 }
 0x396   :  { %2274 = vmatpush.bf16.msra.mxu0 %v6586_v33  ;;  %v6591_v33 = vld [vmem:[#allocation122_spill] sm:$0xff] }
 0x398   :  { %2300 = vmatpush.bf16.msra.mxu2 %v6587_v29 }
 0x39a   :  { %2275 = vmatpush.bf16.msra.mxu0 %v6588_v49 }
 0x39c   :  { %2301 = vmatpush.bf16.msra.mxu2 %v6589_v43 }
 0x3a7   :  { %v1950_v1 = vpop.f32.mrf.mxu1 }
 0x3ad   :  { %v1976_v2 = vpop.f32.mrf.mxu3 }
 0x3af   :  { %v1952_v42 = vpop.f32.mrf.mxu1 }
 0x3b0   :  { %v347_v42 = vadd.f32 %v6593_v41, %v6592_v47 }
 0x3b5   :  { %v1978_v62 = vpop.f32.mrf.mxu3 }
 0x3b7   :  { %v2002_v13 = vpop.f32.mrf.mxu1 }
 0x3ba   :  { %v1937_v15 = vpop.f32.mrf.mxu0 }
 0x3bb   :  { %v1938_v46 = vadd.f32 %v1937_v15, %v6590_v23 }
 0x3bd   :  { %v1951_v21 = vadd.f32 %v1950_v1, %v1938_v46  ;;  %v2028_v16 = vpop.f32.mrf.mxu3 }
 0x3bf   :  { %v3819_v17 = vmul.f32 -1.442695, %v1951_v21  ;;  %v2004_v9 = vpop.f32.mrf.mxu1 }
 0x3c0   :  { %v1963_v60 = vpop.f32.mrf.mxu2 }
 0x3c1   :  { %4094 = vpow2.f32 %v3819_v17  ;;  %v1964_v29 = vadd.f32 %v1963_v60, %v6591_v33 }
 0x3c2   :  { %v1939_v61 = vpop.f32.mrf.mxu0 }
 0x3c3   :  { %v1977_v49 = vadd.f32 %v1976_v2, %v1964_v29  ;;  %v6594_v29 = vld [vmem:[#allocation80_spill] sm:$0xff] }
 0x3c5   :  { %v3820_v30 = vmul.f32 -1.442695, %v1977_v49  ;;  %v2030_v43 = vpop.f32.mrf.mxu3  ;;  %v6595_v49 = vld [vmem:[#allocation102_spill] sm:$0xff] }
 0x3c6   :  { %v405_v43 = vadd.f32 %v6595_v49, %v6594_v29 }
 0x3c7   :  { %v4095_v62 = vpop.eup %4094  ;;  %4096 = vpow2.f32 %v3820_v30  ;;  %v2054_v53 = vpop.f32.mrf.mxu1 }
 0x3c8   :  { %v5490_v44 = vadd.f32 1.0, %v4095_v62  ;;  %v2085_v1 = vadd.f32 %v2054_v53, %v347_v42  ;;  %v1965_v15 = vpop.f32.mrf.mxu2 }
 0x3ca   :  { %4098 = vrcp.f32 %v5490_v44  ;;  %v3817_v21 = vmul.f32 -1.442695, %v2085_v1  ;;  %v1989_v17 = vpop.f32.mrf.mxu0  ;;  %vm2160_vm6 = vweird.f32 %v5490_v44 }
 0x3cc   :  { %4100 = vpow2.f32 %v3817_v21  ;;  %v1990_v21 = vadd.f32 %v1989_v17, %v6443_v0 }
 0x3cd   :  { %v4097_v46 = vpop.eup %4096 }
 0x3ce   :  { %v2173_v61 = vadd.f32 1.0, %v4097_v46 }
 0x3cf   :  { %v2080_v60 = vpop.f32.mrf.mxu3  ;;  %v2056_v2 = vpop.f32.mrf.mxu1 }
 0x3d0   :  { %v4099_v41 = vpop.eup %4098  ;;  %4102 = vrcp.f32 %v2173_v61  ;;  %v2015_v30 = vpop.f32.mrf.mxu2  ;;  %v2087_v62 = vadd.f32 %v2080_v60, %v405_v43  ;;  %v6596_v60 = vld [vmem:[#allocation113_spill] sm:$0xff]  ;;  %vm2179_vm7 = vweird.f32 %v2173_v61 }
 0x3d1   :  { %v2156_v9 = vmul.f32 %v4099_v41, %v5490_v44  ;;  %v2016_v53 = vadd.f32 %v2015_v30, %v5016_v27  ;;  %v318_v43 = vadd.f32 %v6596_v60, %v6444_v8  ;;  %vm2161_vm4 = vweird.f32 %v4099_v41 }
 0x3d2   :  { %v1991_v42 = vpop.f32.mrf.mxu0  ;;  %v4101_v15 = vpop.eup %4100  ;;  %v3818_v46 = vmul.f32 -1.442695, %v2087_v62  ;;  %vm5505_vm8 = vmor %vm2160_vm6, %vm2161_vm4 }
 0x3d3   :  { %v2157_v1 = vsub.f32 1.0, %v2156_v9  ;;  %v2029_v47 = vadd.f32 %v2028_v16, %v2016_v53  ;;  %v5498_v23 = vadd.f32 1.0, %v4101_v15  ;;  %v2003_v42 = vadd.f32 %v2002_v13, %v1990_v21 }
 0x3d4   :  { %v2185_v9 = vand.u32 2147483648, %v2173_v61  ;;  %v2183_v16 = vand.u32 2147483647, %v2173_v61  ;;  %v2164_v13 = vand.u32 2147483647, %v5490_v44 }
 0x3d5   :  { %v3821_v49 = vmul.f32 -1.442695, %v2029_v47  ;;  %v2158_v20 = vmul.f32 %v4099_v41, %v2157_v1  ;;  %vm2116_vm1 = vweird.f32 %v5498_v23 }
 0x3d6   :  { %v4103_v33 = vpop.eup %4102  ;;  %vm2184_vm10 = vcmp.eq.f32.partialorder %v2183_v16, 8.507059e+37  ;;  %vm2165_vm11 = vcmp.eq.f32.partialorder %v2164_v13, 8.507059e+37 }
 0x3d7   :  { %v2082_v2 = vpop.f32.mrf.mxu3  ;;  %v2175_v29 = vmul.f32 %v4103_v33, %v2173_v61  ;;  %4104 = vpow2.f32 %v3821_v49  ;;  %vm2180_vm5 = vweird.f32 %v4103_v33  ;;  %v2159_v47 = vadd.f32 %v4099_v41, %v2158_v20 }
 0x3d8   :  { %v2017_v24 = vpop.f32.mrf.mxu2  ;;  %4106 = vpow2.f32 %v3818_v46  ;;  %vm2181_vm9 = vmor %vm2179_vm7, %vm2180_vm5  ;;  %v2186_v46 = vor.u32 1.1754944e-38, %v2185_v9 }
 0x3d9   :  { %v2176_v30 = vsub.f32 1.0, %v2175_v29  ;;  %4108 = vrcp.f32 %v5498_v23  ;;  %v2166_v24 = vand.u32 2147483648, %v5490_v44  ;;  %v2163_v20 = vsel %vm5505_vm8, %v4099_v41, %v2159_v47 }
 0x3da   :  { %v2041_v17 = vpop.f32.mrf.mxu0  ;;  %4110 = vtanh.f32 %v2003_v42 }
 0x3db   :  { %v2177_v62 = vmul.f32 %v4103_v33, %v2176_v30  ;;  %v2084_v53 = vadd.f32 %v2041_v17, %v318_v43  ;;  %v2167_v43 = vor.u32 1.1754944e-38, %v2166_v24 }
 0x3dd   :  { %v2178_v29 = vadd.f32 %v4103_v33, %v2177_v62  ;;  %v3816_v1 = vmul.f32 -1.442695, %v2084_v53  ;;  %v4105_v21 = vpop.eup %4104  ;;  %v2168_v17 = vsel %vm2165_vm11, %v2167_v43, %v2163_v20  ;;  %v6600_v43 = vld [vmem:[#allocation114_spill] sm:$0xff] }
 0x3de   :  { %v4107_v49 = vpop.eup %4106  ;;  %v2193_v60 = vadd.f32 1.0, %v4105_v21 }
 0x3df   :  { %v2182_v2 = vsel %vm2181_vm9, %v4103_v33, %v2178_v29  ;;  %v5512_v61 = vpop.eup %4108  ;;  %4112 = vpow2.f32 %v3816_v1  ;;  %v5517_v41 = vadd.f32 1.0, %v4107_v49 }
 0x3e0   :  { %v2187_v30 = vsel %vm2184_vm10, %v2186_v46, %v2182_v2  ;;  %4114 = vrcp.f32 %v2193_v60  ;;  %v2112_v42 = vmul.f32 %v5512_v61, %v5498_v23  ;;  %v4111_v53 = vpop.eup %4110  ;;  %v2203_v20 = vand.u32 2147483647, %v2193_v60  ;;  %v6599_v2 = vld [vmem:[#allocation89_spill] sm:$0xff] }
 0x3e1   :  { %v2209_v9 = vmul.f32 %v2187_v30, %v5356_v52  ;;  %v2210_v33 = vmul.f32 %v4111_v53, %v2168_v17  ;;  %4116 = vrcp.f32 %v5517_v41  ;;  %v2205_v52 = vand.u32 2147483648, %v2193_v60 }
 0x3e2   :  { %v2043_v62 = vpop.f32.mrf.mxu0  ;;  %v2113_v15 = vsub.f32 1.0, %v2112_v42  ;;  %v376_v30 = vadd.f32 %v6600_v43, %v6599_v2  ;;  %vm2199_vm13 = vweird.f32 %v2193_v60  ;;  %vm2117_vm14 = vweird.f32 %v5512_v61 }
 0x3e3   :  { %v5519_v24 = vadd.f32 %v2210_v33, %v2209_v9  ;;  %v2206_v33 = vor.u32 1.1754944e-38, %v2205_v52  ;;  %vm2204_vm0 = vcmp.eq.f32.partialorder %v2203_v20, 8.507059e+37  ;;  %vm5534_vm2 = vmor %vm2116_vm1, %vm2117_vm14  ;;  %vm2136_vm9 = vweird.f32 %v5517_v41 }
 0x3e4   :  { %v2067_v44 = vpop.f32.mrf.mxu2  ;;  %v2114_v46 = vmul.f32 %v5512_v61, %v2113_v15 }
 0x3e5   :  { %v4113_v16 = vpop.eup %4112  ;;  %v2086_v9 = vadd.f32 %v2067_v44, %v376_v30 }
 0x3e6   :  { %v4115_v47 = vpop.eup %4114  ;;  %v2091_v29 = vadd.f32 1.0, %v4113_v16  ;;  %v2115_v53 = vadd.f32 %v5512_v61, %v2114_v46  ;;  %v2120_v46 = vand.u32 2147483647, %v5498_v23 }
 0x3e7   :  { %v2195_v13 = vmul.f32 %v4115_v47, %v2193_v60  ;;  %vm2200_vm12 = vweird.f32 %v4115_v47  ;;  %v5526_v17 = vpop.eup %4116 }
 0x3e8   :  { %4118 = vrcp.f32 %v2091_v29  ;;  %vm2201_vm15 = vmor %vm2199_vm13, %vm2200_vm12  ;;  %v2132_v60 = vmul.f32 %v5526_v17, %v5517_v41  ;;  %v2103_v43 = vand.u32 2147483648, %v2091_v29  ;;  %v2101_v30 = vand.u32 2147483647, %v2091_v29 }
 0x3e9   :  { %v2196_v21 = vsub.f32 1.0, %v2195_v13  ;;  %4120 = vtanh.f32 %v5519_v24  ;;  %vm2097_vm4 = vweird.f32 %v2091_v29  ;;  %vm2121_vm5 = vcmp.eq.f32.partialorder %v2120_v46, 8.507059e+37 }
 0x3ea   :  { %4122 = vtanh.f32 %v2086_v9  ;;  %vm2102_vm7 = vcmp.eq.f32.partialorder %v2101_v30, 8.507059e+37  ;;  %vm2137_vm8 = vweird.f32 %v5526_v17  ;;  %v6607_v30 = vld [vmem:[#allocation22_spill] sm:$0xff] }
 0x3eb   :  { %v2197_v49 = vmul.f32 %v4115_v47, %v2196_v21  ;;  %vm2138_vm10 = vmor %vm2136_vm9, %vm2137_vm8 }
 0x3ec   :  { %v2069_v1 = vpop.f32.mrf.mxu2 }
 0x3ed   :  { %v2198_v62 = vadd.f32 %v4115_v47, %v2197_v49  ;;  %v2122_v1 = vand.u32 2147483648, %v5498_v23  ;;  %v2104_v23 = vor.u32 1.1754944e-38, %v2103_v43 }
 0x3ee   :  { %v4119_v42 = vpop.eup %4118 }
 0x3ef   :  { %v2093_v16 = vmul.f32 %v4119_v42, %v2091_v29  ;;  %v2202_v15 = vsel %vm2201_vm15, %v4115_v47, %v2198_v62  ;;  %v4121_v13 = vpop.eup %4120  ;;  %v2119_v47 = vsel %vm5534_vm2, %v5512_v61, %v2115_v53  ;;  %vm2098_vm3 = vweird.f32 %v4119_v42 }
 0x3f0   :  { %v2207_v21 = vsel %vm2204_vm0, %v2206_v33, %v2202_v15  ;;  %v2123_v2 = vor.u32 1.1754944e-38, %v2122_v1  ;;  %v2133_v33 = vsub.f32 1.0, %v2132_v60  ;;  %vm2099_vm6 = vmor %vm2097_vm4, %vm2098_vm3  ;;  %v4123_v9 = vpop.eup %4122 }
 0x3f1   :  { %v2094_v44 = vsub.f32 1.0, %v2093_v16  ;;  %v2213_v52 = vmul.f32 %v4121_v13, %v2207_v21  ;;  %v2140_v21 = vand.u32 2147483647, %v5517_v41 }
 0x3f2   :  { %v2124_v16 = vsel %vm2121_vm5, %v2123_v2, %v2119_v47  ;;  %v2134_v53 = vmul.f32 %v5526_v17, %v2133_v33  ;;  %v6605_v47 = vld [vmem:[#allocation97_spill] sm:$0xff]  ;;  %v6609_v33 = vld [vmem:[#allocation100_spill] sm:$0xff] }
 0x3f3   :  { %v2095_v20 = vmul.f32 %v4119_v42, %v2094_v44  ;;  %v2215_v62 = vpack.c.bf16 %v2213_v52, %v2213_v52  ;;  %v2146_v1 = vmul.f32 %v2124_v16, %v5385_v11  ;;  %vm2141_vm11 = vcmp.eq.f32.partialorder %v2140_v21, 8.507059e+37  ;;  %v6612_v16 = vld [vmem:[#allocation16_spill] sm:$0xff]  ;;  %v6621_v21 = vld [vmem:[#allocation29_spill] sm:$0xff] }
 0x3f4   :  { %v2135_v2 = vadd.f32 %v5526_v17, %v2134_v53  ;;  %v6615_v53 = vld [vmem:[#allocation17_spill] sm:$0xff] }
 0x3f5   :  { %v2096_v15 = vadd.f32 %v4119_v42, %v2095_v20  ;;  %2237 = vmatmul.bf16.vlgmr.msrb.gmra.mxu1 %v2215_v62  ;;  %2263 = vmatmul.bf16.vlgmr.msrb.gmra.mxu3 %v2215_v62  ;;  %v6606_v20 = vld [vmem:[#allocation98_spill] sm:$0xff] }
 0x3f6   :  { %2333 = vmatpush.bf16.msrb.mxu1 %v6377_v36  ;;  %2359 = vmatpush.bf16.msrb.mxu3 %v6378_v39  ;;  %v2139_v11 = vsel %vm2138_vm10, %v5526_v17, %v2135_v2  ;;  %v6604_v17 = vld [vmem:[#allocation19_spill] sm:$0xff]  ;;  %v6619_v2 = vld [vmem:[#allocation21_spill] sm:$0xff] }
 0x3f7   :  { %v2100_v61 = vsel %vm2099_vm6, %v4119_v42, %v2096_v15  ;;  %v2142_v42 = vand.u32 2147483648, %v5517_v41  ;;  %v6603_v41 = vld [vmem:[#allocation18_spill] sm:$0xff]  ;;  %v6610_v15 = vld [vmem:[#allocation101_spill] sm:$0xff] }
 0x3f8   :  { %v2105_v13 = vsel %vm2102_vm7, %v2104_v23, %v2100_v61  ;;  %v6611_v23 = vld [vmem:[#allocation13_spill] sm:$0xff] }
 0x3f9   :  { %v2147_v60 = vmul.f32 %v4123_v9, %v2105_v13  ;;  %v2143_v49 = vor.u32 1.1754944e-38, %v2142_v42  ;;  %v6613_v61 = vld [vmem:[#allocation25_spill] sm:$0xff]  ;;  %v6614_v9 = vld [vmem:[#allocation26_spill] sm:$0xff]  ;;  %v6616_v13 = vld [vmem:[#allocation20_spill] sm:$0xff] }
 0x3fa   :  { %2334 = vmatpush.bf16.msrb.mxu1 %v6379_v12  ;;  %2360 = vmatpush.bf16.msrb.mxu3 %v6380_v51  ;;  %v6620_v42 = vld [vmem:[#allocation24_spill] sm:$0xff] }
 0x3fb   :  { %v5548_v29 = vadd.f32 %v2147_v60, %v2146_v1  ;;  %v2144_v46 = vsel %vm2141_vm11, %v2143_v49, %v2139_v11  ;;  %v6617_v1 = vld [vmem:[#allocation27_spill] sm:$0xff]  ;;  %v6618_v60 = vld [vmem:[#allocation28_spill] sm:$0xff]  ;;  %v6622_v11 = vld [vmem:[#allocation30_spill] sm:$0xff] }
 0x3fc   :  { %v6623_v49 = vld [vmem:[#allocation31_spill] sm:$0xff] }
 0x3fd   :  { %4124 = vtanh.f32 %v5548_v29 }
 0x3fe   :  { %2335 = vmatpush.bf16.msrb.mxu1 %v6381_v14  ;;  %2361 = vmatpush.bf16.msrb.mxu3 %v6382_v35 }
 0x402   :  { %2336 = vmatpush.bf16.msrb.mxu1 %v6383_v56  ;;  %2362 = vmatpush.bf16.msrb.mxu3 %v6384_v55 }
 0x403   :  { %v4125_v44 = vpop.eup %4124 }
 0x404   :  { %v2150_v52 = vmul.f32 %v4125_v44, %v2144_v46  ;;  %v6624_v44 = vld [vmem:[#allocation32_spill] sm:$0xff]  ;;  %v6625_v46 = vld [vmem:[#allocation39_spill] sm:$0xff] }
 0x405   :  { %2289 = vmatmul.bf16.vlgmr.msra.gmra.mxu1 %v2215_v62  ;;  %2315 = vmatmul.bf16.vlgmr.msra.gmra.mxu3 %v2215_v62  ;;  %v6608_v62 = vld [vmem:[#allocation23_spill] sm:$0xff] }
 0x406   :  { %v2214_v43 = vpack.c.bf16 %v2150_v52, %v2150_v52  ;;  %2337 = vmatpush.bf16.msrb.mxu1 %v6385_v40  ;;  %2363 = vmatpush.bf16.msrb.mxu3 %v6386_v48  ;;  %v6626_v52 = vld [vmem:[#allocation40_spill] sm:$0xff] }
 0x408   :  { %2224 = vmatmul.bf16.vlgmr.msrb.gmra.mxu0 %v2214_v43  ;;  %2250 = vmatmul.bf16.vlgmr.msrb.gmra.mxu2 %v2214_v43 }
 0x409   :  { %2320 = vmatpush.bf16.msrb.mxu0 %v4842_v32  ;;  %2346 = vmatpush.bf16.msrb.mxu2 %v4844_v38 }
 0x40a   :  { %2338 = vmatpush.bf16.msrb.mxu1 %v6387_v18  ;;  %2364 = vmatpush.bf16.msrb.mxu3 %v6388_v45 }
 0x40d   :  { %2321 = vmatpush.bf16.msrb.mxu0 %v4854_v10  ;;  %2347 = vmatpush.bf16.msrb.mxu2 %v4856_v25 }
 0x40e   :  { %2339 = vmatpush.bf16.msrb.mxu1 %v6389_v7  ;;  %2365 = vmatpush.bf16.msrb.mxu3 %v6390_v59 }
 0x411   :  { %2322 = vmatpush.bf16.msrb.mxu0 %v4864_v5  ;;  %2348 = vmatpush.bf16.msrb.mxu2 %v4866_v57 }
 0x412   :  { %2340 = vmatpush.bf16.msrb.mxu1 %v6391_v28  ;;  %2366 = vmatpush.bf16.msrb.mxu3 %v6392_v6 }
 0x415   :  { %2323 = vmatpush.bf16.msrb.mxu0 %v4874_v58  ;;  %2341 = vmatmul.bf16.vlgmr.msrb.gmra.mxu1 %v2214_v43 }
 0x416   :  { %2517 = vmatpush.bf16.msra.mxu1 %v6393_v54  ;;  %2543 = vmatpush.bf16.msra.mxu3 %v6394_v34 }
 0x417   :  { %2349 = vmatpush.bf16.msrb.mxu2 %v4876_v31  ;;  %2367 = vmatmul.bf16.vlgmr.msrb.gmra.mxu3 %v2214_v43 }
 0x418   :  { %2276 = vmatmul.bf16.vlgmr.msra.gmra.mxu0 %v2214_v43  ;;  %2302 = vmatmul.bf16.vlgmr.msra.gmra.mxu2 %v2214_v43 }
 0x419   :  { %2324 = vmatpush.bf16.msrb.mxu0 %v4884_v4 }
 0x41a   :  { %2518 = vmatpush.bf16.msra.mxu1 %v6395_v63  ;;  %2544 = vmatpush.bf16.msra.mxu3 %v6396_v50 }
 0x41b   :  { %2350 = vmatpush.bf16.msrb.mxu2 %v4886_v3 }
 0x41d   :  { %2325 = vmatpush.bf16.msrb.mxu0 %v4894_v22 }
 0x41e   :  { %2519 = vmatpush.bf16.msra.mxu1 %v6397_v26  ;;  %2545 = vmatpush.bf16.msra.mxu3 %v6398_v37 }
 0x41f   :  { %2351 = vmatpush.bf16.msrb.mxu2 %v4896_v19 }
 0x421   :  { %2326 = vmatpush.bf16.msrb.mxu0 %v6605_v47 }
 0x422   :  { %2520 = vmatpush.bf16.msra.mxu1 %v6603_v41  ;;  %2546 = vmatpush.bf16.msra.mxu3 %v6604_v17 }
 0x423   :  { %2352 = vmatpush.bf16.msrb.mxu2 %v6606_v20 }
 0x425   :  { %2327 = vmatpush.bf16.msrb.mxu0 %v6609_v33 }
 0x426   :  { %2521 = vmatpush.bf16.msra.mxu1 %v6607_v30  ;;  %2547 = vmatpush.bf16.msra.mxu3 %v6608_v62  ;;  %v6667_v62 = vld [vmem:[#allocation71_spill] sm:$0xff] }
 0x427   :  { %2353 = vmatpush.bf16.msrb.mxu2 %v6610_v15  ;;  %v6668_v30 = vld [vmem:[#allocation103_spill] sm:$0xff] }
 0x428   :  { %2328 = vmatmul.bf16.vlgmr.msrb.gmra.mxu0 %v2214_v43 }
 0x429   :  { %2504 = vmatpush.bf16.msra.mxu0 %v6611_v23 }
 0x42a   :  { %2522 = vmatpush.bf16.msra.mxu1 %v6613_v61  ;;  %2548 = vmatpush.bf16.msra.mxu3 %v6614_v9  ;;  %v6665_v9 = vld [vmem:[#allocation121_spill] sm:$0xff] }
 0x42b   :  { %2530 = vmatpush.bf16.msra.mxu2 %v6612_v16 }
 0x42c   :  { %2354 = vmatmul.bf16.vlgmr.msrb.gmra.mxu2 %v2214_v43  ;;  %v6627_v43 = vld [vmem:[#allocation33_spill] sm:$0xff] }
 0x42d   :  { %2505 = vmatpush.bf16.msra.mxu0 %v6615_v53 }
 0x42e   :  { %2523 = vmatpush.bf16.msra.mxu1 %v6617_v1  ;;  %2549 = vmatpush.bf16.msra.mxu3 %v6618_v60  ;;  %v6628_v1 = vld [vmem:[#allocation34_spill] sm:$0xff]  ;;  %v6629_v60 = vld [vmem:[#allocation43_spill] sm:$0xff] }
 0x42f   :  { %2531 = vmatpush.bf16.msra.mxu2 %v6616_v13 }
 0x431   :  { %2506 = vmatpush.bf16.msra.mxu0 %v6619_v2  ;;  %v6630_v2 = vld [vmem:[#allocation44_spill] sm:$0xff] }
 0x432   :  { %2524 = vmatpush.bf16.msra.mxu1 %v6621_v21  ;;  %2550 = vmatpush.bf16.msra.mxu3 %v6622_v11  ;;  %v6632_v21 = vld [vmem:[#allocation36_spill] sm:$0xff]  ;;  %v6633_v11 = vld [vmem:[#allocation47_spill] sm:$0xff] }
 0x433   :  { %2532 = vmatpush.bf16.msra.mxu2 %v6620_v42  ;;  %v6631_v42 = vld [vmem:[#allocation35_spill] sm:$0xff] }
 0x435   :  { %2507 = vmatpush.bf16.msra.mxu0 %v6625_v46  ;;  %v6636_v46 = vld [vmem:[#allocation38_spill] sm:$0xff] }
 0x436   :  { %2569 = vmatpush.bf16.msrb.mxu1 %v6623_v49  ;;  %2595 = vmatpush.bf16.msrb.mxu3 %v6624_v44  ;;  %v6634_v49 = vld [vmem:[#allocation48_spill] sm:$0xff]  ;;  %v6635_v44 = vld [vmem:[#allocation37_spill] sm:$0xff] }
 0x437   :  { %2533 = vmatpush.bf16.msra.mxu2 %v6626_v52  ;;  %v6637_v52 = vld [vmem:[#allocation51_spill] sm:$0xff] }
 0x439   :  { %2508 = vmatpush.bf16.msra.mxu0 %v6629_v60  ;;  %v6640_v60 = vld [vmem:[#allocation42_spill] sm:$0xff] }
 0x43a   :  { %2570 = vmatpush.bf16.msrb.mxu1 %v6627_v43  ;;  %2596 = vmatpush.bf16.msrb.mxu3 %v6628_v1  ;;  %v6638_v43 = vld [vmem:[#allocation52_spill] sm:$0xff]  ;;  %v6639_v1 = vld [vmem:[#allocation41_spill] sm:$0xff] }
 0x43b   :  { %2534 = vmatpush.bf16.msra.mxu2 %v6630_v2  ;;  %v6641_v2 = vld [vmem:[#allocation57_spill] sm:$0xff] }
 0x43d   :  { %2509 = vmatpush.bf16.msra.mxu0 %v6633_v11  ;;  %v6644_v11 = vld [vmem:[#allocation60_spill] sm:$0xff] }
 0x43e   :  { %2571 = vmatpush.bf16.msrb.mxu1 %v6631_v42  ;;  %2597 = vmatpush.bf16.msrb.mxu3 %v6632_v21  ;;  %v6642_v42 = vld [vmem:[#allocation58_spill] sm:$0xff]  ;;  %v6643_v21 = vld [vmem:[#allocation59_spill] sm:$0xff] }
 0x43f   :  { %2535 = vmatpush.bf16.msra.mxu2 %v6634_v49  ;;  %v6645_v49 = vld [vmem:[#allocation45_spill] sm:$0xff] }
 0x441   :  { %2510 = vmatpush.bf16.msra.mxu0 %v6637_v52  ;;  %v6648_v52 = vld [vmem:[#allocation64_spill] sm:$0xff] }
 0x442   :  { %2572 = vmatpush.bf16.msrb.mxu1 %v6635_v44  ;;  %2598 = vmatpush.bf16.msrb.mxu3 %v6636_v46  ;;  %v6646_v44 = vld [vmem:[#allocation46_spill] sm:$0xff]  ;;  %v6647_v46 = vld [vmem:[#allocation63_spill] sm:$0xff] }
 0x443   :  { %2536 = vmatpush.bf16.msra.mxu2 %v6638_v43  ;;  %v6649_v43 = vld [vmem:[#allocation49_spill] sm:$0xff] }
 0x445   :  { %2511 = vmatpush.bf16.msra.mxu0 %v6641_v2  ;;  %v6652_v2 = vld [vmem:[#allocation68_spill] sm:$0xff] }
 0x446   :  { %2573 = vmatpush.bf16.msrb.mxu1 %v6639_v1  ;;  %2599 = vmatpush.bf16.msrb.mxu3 %v6640_v60  ;;  %v6650_v1 = vld [vmem:[#allocation50_spill] sm:$0xff]  ;;  %v6651_v60 = vld [vmem:[#allocation67_spill] sm:$0xff] }
 0x447   :  { %2537 = vmatpush.bf16.msra.mxu2 %v6642_v42  ;;  %v6653_v42 = vld [vmem:[#allocation53_spill] sm:$0xff] }
 0x449   :  { %2556 = vmatpush.bf16.msrb.mxu0 %v6643_v21  ;;  %v6654_v21 = vld [vmem:[#allocation54_spill] sm:$0xff] }
 0x44a   :  { %2574 = vmatpush.bf16.msrb.mxu1 %v6645_v49  ;;  %2600 = vmatpush.bf16.msrb.mxu3 %v6646_v44  ;;  %v6656_v49 = vld [vmem:[#allocation74_spill] sm:$0xff]  ;;  %v6657_v44 = vld [vmem:[#allocation77_spill] sm:$0xff] }
 0x44b   :  { %2582 = vmatpush.bf16.msrb.mxu2 %v6644_v11  ;;  %v6655_v11 = vld [vmem:[#allocation73_spill] sm:$0xff] }
 0x44d   :  { %2557 = vmatpush.bf16.msrb.mxu0 %v6647_v46  ;;  %v6658_v46 = vld [vmem:[#allocation78_spill] sm:$0xff] }
 0x44e   :  { %2575 = vmatpush.bf16.msrb.mxu1 %v6649_v43  ;;  %2601 = vmatpush.bf16.msrb.mxu3 %v6650_v1  ;;  %v6660_v43 = vld [vmem:[#allocation83_spill] sm:$0xff]  ;;  %v6661_v1 = vld [vmem:[#allocation86_spill] sm:$0xff] }
 0x44f   :  { %2583 = vmatpush.bf16.msrb.mxu2 %v6648_v52  ;;  %v6659_v52 = vld [vmem:[#allocation82_spill] sm:$0xff] }
 0x451   :  { %2558 = vmatpush.bf16.msrb.mxu0 %v6651_v60  ;;  %v6662_v60 = vld [vmem:[#allocation87_spill] sm:$0xff] }
 0x452   :  { %2576 = vmatpush.bf16.msrb.mxu1 %v6653_v42  ;;  %2602 = vmatpush.bf16.msrb.mxu3 %v6654_v21  ;;  %v6664_v42 = vld [vmem:[#allocation92_spill] sm:$0xff] }
 0x453   :  { %2584 = vmatpush.bf16.msrb.mxu2 %v6652_v2  ;;  %v6663_v2 = vld [vmem:[#allocation91_spill] sm:$0xff] }
 0x455   :  { %2559 = vmatpush.bf16.msrb.mxu0 %v6655_v11 }
 0x457   :  { %2585 = vmatpush.bf16.msrb.mxu2 %v6656_v49 }
 0x459   :  { %2560 = vmatpush.bf16.msrb.mxu0 %v6657_v44 }
 0x45b   :  { %2586 = vmatpush.bf16.msrb.mxu2 %v6658_v46 }
 0x45d   :  { %2561 = vmatpush.bf16.msrb.mxu0 %v6659_v52 }
 0x45f   :  { %2587 = vmatpush.bf16.msrb.mxu2 %v6660_v43 }
 0x461   :  { %2562 = vmatpush.bf16.msrb.mxu0 %v6661_v1  ;;  %v6666_v1 = vld [vmem:[#allocation122_spill] sm:$0xff] }
 0x463   :  { %2588 = vmatpush.bf16.msrb.mxu2 %v6662_v60 }
 0x465   :  { %2563 = vmatpush.bf16.msrb.mxu0 %v6663_v2 }
 0x467   :  { %2589 = vmatpush.bf16.msrb.mxu2 %v6664_v42 }
 0x472   :  { %v2238_v21 = vpop.f32.mrf.mxu1 }
 0x478   :  { %v2264_v11 = vpop.f32.mrf.mxu3 }
 0x47a   :  { %v2240_v13 = vpop.f32.mrf.mxu1 }
 0x47b   :  { %v349_v13 = vadd.f32 %v6668_v30, %v6667_v62 }
 0x480   :  { %v2266_v49 = vpop.f32.mrf.mxu3 }
 0x482   :  { %v2290_v53 = vpop.f32.mrf.mxu1 }
 0x485   :  { %v2225_v44 = vpop.f32.mrf.mxu0 }
 0x486   :  { %v2226_v46 = vadd.f32 %v2225_v44, %v6665_v9 }
 0x488   :  { %v2239_v61 = vadd.f32 %v2238_v21, %v2226_v46  ;;  %v2316_v52 = vpop.f32.mrf.mxu3 }
 0x48a   :  { %v3825_v16 = vmul.f32 -1.442695, %v2239_v61  ;;  %v2292_v43 = vpop.f32.mrf.mxu1 }
 0x48b   :  { %v2251_v23 = vpop.f32.mrf.mxu2 }
 0x48c   :  { %4126 = vpow2.f32 %v3825_v16  ;;  %v2252_v60 = vadd.f32 %v2251_v23, %v6666_v1 }
 0x48d   :  { %v2227_v15 = vpop.f32.mrf.mxu0 }
 0x48e   :  { %v2265_v2 = vadd.f32 %v2264_v11, %v2252_v60  ;;  %v6669_v60 = vld [vmem:[#allocation80_spill] sm:$0xff] }
 0x490   :  { %v3826_v33 = vmul.f32 -1.442695, %v2265_v2  ;;  %v2318_v42 = vpop.f32.mrf.mxu3  ;;  %v6670_v2 = vld [vmem:[#allocation104_spill] sm:$0xff] }
 0x491   :  { %v407_v42 = vadd.f32 %v6670_v2, %v6669_v60 }
 0x492   :  { %v4127_v49 = vpop.eup %4126  ;;  %4128 = vpow2.f32 %v3826_v33  ;;  %v2342_v20 = vpop.f32.mrf.mxu1 }
 0x493   :  { %v5653_v47 = vadd.f32 1.0, %v4127_v49  ;;  %v2373_v21 = vadd.f32 %v2342_v20, %v349_v13  ;;  %v2253_v44 = vpop.f32.mrf.mxu2 }
 0x495   :  { %4130 = vrcp.f32 %v5653_v47  ;;  %v3823_v61 = vmul.f32 -1.442695, %v2373_v21  ;;  %v2277_v16 = vpop.f32.mrf.mxu0  ;;  %vm2448_vm14 = vweird.f32 %v5653_v47 }
 0x497   :  { %4132 = vpow2.f32 %v3823_v61  ;;  %v2278_v61 = vadd.f32 %v2277_v16, %v6443_v0 }
 0x498   :  { %v4129_v46 = vpop.eup %4128 }
 0x499   :  { %v2461_v15 = vadd.f32 1.0, %v4129_v46 }
 0x49a   :  { %v2368_v23 = vpop.f32.mrf.mxu3  ;;  %v2344_v11 = vpop.f32.mrf.mxu1 }
 0x49b   :  { %v4131_v30 = vpop.eup %4130  ;;  %4134 = vrcp.f32 %v2461_v15  ;;  %v2303_v33 = vpop.f32.mrf.mxu2  ;;  %v2375_v49 = vadd.f32 %v2368_v23, %v407_v42  ;;  %v6671_v23 = vld [vmem:[#allocation115_spill] sm:$0xff]  ;;  %vm2467_vm15 = vweird.f32 %v2461_v15 }
 0x49c   :  { %v2444_v43 = vmul.f32 %v4131_v30, %v5653_v47  ;;  %v2304_v20 = vadd.f32 %v2303_v33, %v5016_v27  ;;  %v320_v42 = vadd.f32 %v6671_v23, %v6444_v8  ;;  %vm2449_vm12 = vweird.f32 %v4131_v30 }
 0x49d   :  { %v2279_v13 = vpop.f32.mrf.mxu0  ;;  %v4133_v44 = vpop.eup %4132  ;;  %v3824_v46 = vmul.f32 -1.442695, %v2375_v49  ;;  %vm5668_vm0 = vmor %vm2448_vm14, %vm2449_vm12 }
 0x49e   :  { %v2445_v21 = vsub.f32 1.0, %v2444_v43  ;;  %v2317_v62 = vadd.f32 %v2316_v52, %v2304_v20  ;;  %v5661_v9 = vadd.f32 1.0, %v4133_v44  ;;  %v2291_v13 = vadd.f32 %v2290_v53, %v2278_v61 }
 0x49f   :  { %v2473_v43 = vand.u32 2147483648, %v2461_v15  ;;  %v2471_v52 = vand.u32 2147483647, %v2461_v15  ;;  %v2452_v53 = vand.u32 2147483647, %v5653_v47 }
 0x4a0   :  { %v3827_v2 = vmul.f32 -1.442695, %v2317_v62  ;;  %v2446_v17 = vmul.f32 %v4131_v30, %v2445_v21  ;;  %vm2404_vm9 = vweird.f32 %v5661_v9 }
 0x4a1   :  { %v4135_v1 = vpop.eup %4134  ;;  %vm2472_vm2 = vcmp.eq.f32.partialorder %v2471_v52, 8.507059e+37  ;;  %vm2453_vm3 = vcmp.eq.f32.partialorder %v2452_v53, 8.507059e+37 }
 0x4a2   :  { %v2370_v11 = vpop.f32.mrf.mxu3  ;;  %v2463_v60 = vmul.f32 %v4135_v1, %v2461_v15  ;;  %4136 = vpow2.f32 %v3827_v2  ;;  %vm2468_vm13 = vweird.f32 %v4135_v1  ;;  %v2447_v62 = vadd.f32 %v4131_v30, %v2446_v17 }
 0x4a3   :  { %v2305_v41 = vpop.f32.mrf.mxu2  ;;  %4138 = vpow2.f32 %v3824_v46  ;;  %vm2469_vm1 = vmor %vm2467_vm15, %vm2468_vm13  ;;  %v2474_v46 = vor.u32 1.1754944e-38, %v2473_v43 }
 0x4a4   :  { %v2464_v33 = vsub.f32 1.0, %v2463_v60  ;;  %4140 = vrcp.f32 %v5661_v9  ;;  %v2454_v41 = vand.u32 2147483648, %v5653_v47  ;;  %v2451_v17 = vsel %vm5668_vm0, %v4131_v30, %v2447_v62 }
 0x4a5   :  { %v2329_v16 = vpop.f32.mrf.mxu0  ;;  %4142 = vtanh.f32 %v2291_v13 }
 0x4a6   :  { %v2465_v49 = vmul.f32 %v4135_v1, %v2464_v33  ;;  %v2372_v20 = vadd.f32 %v2329_v16, %v320_v42  ;;  %v2455_v42 = vor.u32 1.1754944e-38, %v2454_v41 }
 0x4a8   :  { %v2466_v60 = vadd.f32 %v4135_v1, %v2465_v49  ;;  %v3822_v21 = vmul.f32 -1.442695, %v2372_v20  ;;  %v4137_v61 = vpop.eup %4136  ;;  %v2456_v16 = vsel %vm2453_vm3, %v2455_v42, %v2451_v17  ;;  %v6675_v42 = vld [vmem:[#allocation116_spill] sm:$0xff] }
 0x4a9   :  { %v4139_v2 = vpop.eup %4138  ;;  %v2481_v23 = vadd.f32 1.0, %v4137_v61 }
 0x4aa   :  { %v2470_v11 = vsel %vm2469_vm1, %v4135_v1, %v2466_v60  ;;  %v5675_v15 = vpop.eup %4140  ;;  %4144 = vpow2.f32 %v3822_v21  ;;  %v5680_v30 = vadd.f32 1.0, %v4139_v2 }
 0x4ab   :  { %v2475_v33 = vsel %vm2472_vm2, %v2474_v46, %v2470_v11  ;;  %4146 = vrcp.f32 %v2481_v23  ;;  %v2400_v13 = vmul.f32 %v5675_v15, %v5661_v9  ;;  %v4143_v20 = vpop.eup %4142  ;;  %v2491_v17 = vand.u32 2147483647, %v2481_v23  ;;  %v6674_v11 = vld [vmem:[#allocation89_spill] sm:$0xff] }
 0x4ac   :  { %v2497_v43 = vmul.f32 %v2475_v33, %v5519_v24  ;;  %v2498_v1 = vmul.f32 %v4143_v20, %v2456_v16  ;;  %4148 = vrcp.f32 %v5680_v30  ;;  %v2493_v24 = vand.u32 2147483648, %v2481_v23 }
 0x4ad   :  { %v2331_v49 = vpop.f32.mrf.mxu0  ;;  %v2401_v44 = vsub.f32 1.0, %v2400_v13  ;;  %v378_v33 = vadd.f32 %v6675_v42, %v6674_v11  ;;  %vm2487_vm5 = vweird.f32 %v2481_v23  ;;  %vm2405_vm6 = vweird.f32 %v5675_v15 }
 0x4ae   :  { %v5682_v41 = vadd.f32 %v2498_v1, %v2497_v43  ;;  %v2494_v1 = vor.u32 1.1754944e-38, %v2493_v24  ;;  %vm2492_vm8 = vcmp.eq.f32.partialorder %v2491_v17, 8.507059e+37  ;;  %vm5697_vm10 = vmor %vm2404_vm9, %vm2405_vm6  ;;  %vm2424_vm1 = vweird.f32 %v5680_v30 }
 0x4af   :  { %v2355_v47 = vpop.f32.mrf.mxu2  ;;  %v2402_v46 = vmul.f32 %v5675_v15, %v2401_v44 }
 0x4b0   :  { %v4145_v52 = vpop.eup %4144  ;;  %v2374_v43 = vadd.f32 %v2355_v47, %v378_v33 }
 0x4b1   :  { %v4147_v62 = vpop.eup %4146  ;;  %v2379_v60 = vadd.f32 1.0, %v4145_v52  ;;  %v2403_v20 = vadd.f32 %v5675_v15, %v2402_v46  ;;  %v2408_v46 = vand.u32 2147483647, %v5661_v9 }
 0x4b2   :  { %v2483_v53 = vmul.f32 %v4147_v62, %v2481_v23  ;;  %vm2488_vm4 = vweird.f32 %v4147_v62  ;;  %v5689_v16 = vpop.eup %4148 }
 0x4b3   :  { %4150 = vrcp.f32 %v2379_v60  ;;  %vm2489_vm7 = vmor %vm2487_vm5, %vm2488_vm4  ;;  %v2420_v23 = vmul.f32 %v5689_v16, %v5680_v30  ;;  %v2391_v42 = vand.u32 2147483648, %v2379_v60  ;;  %v2389_v33 = vand.u32 2147483647, %v2379_v60 }
 0x4b4   :  { %v2484_v61 = vsub.f32 1.0, %v2483_v53  ;;  %4152 = vtanh.f32 %v5682_v41  ;;  %vm2385_vm12 = vweird.f32 %v2379_v60  ;;  %vm2409_vm13 = vcmp.eq.f32.partialorder %v2408_v46, 8.507059e+37 }
 0x4b5   :  { %4154 = vtanh.f32 %v2374_v43  ;;  %vm2390_vm15 = vcmp.eq.f32.partialorder %v2389_v33, 8.507059e+37  ;;  %vm2425_vm0 = vweird.f32 %v5689_v16  ;;  %v6682_v33 = vld [vmem:[#allocation22_spill] sm:$0xff] }
 0x4b6   :  { %v2485_v2 = vmul.f32 %v4147_v62, %v2484_v61  ;;  %vm2426_vm2 = vmor %vm2424_vm1, %vm2425_vm0 }
 0x4b7   :  { %v2357_v21 = vpop.f32.mrf.mxu2 }
 0x4b8   :  { %v2486_v49 = vadd.f32 %v4147_v62, %v2485_v2  ;;  %v2410_v21 = vand.u32 2147483648, %v5661_v9  ;;  %v2392_v9 = vor.u32 1.1754944e-38, %v2391_v42 }
 0x4b9   :  { %v4151_v13 = vpop.eup %4150 }
 0x4ba   :  { %v2381_v52 = vmul.f32 %v4151_v13, %v2379_v60  ;;  %v2490_v44 = vsel %vm2489_vm7, %v4147_v62, %v2486_v49  ;;  %v4153_v53 = vpop.eup %4152  ;;  %v2407_v62 = vsel %vm5697_vm10, %v5675_v15, %v2403_v20  ;;  %vm2386_vm11 = vweird.f32 %v4151_v13 }
 0x4bb   :  { %v2495_v61 = vsel %vm2492_vm8, %v2494_v1, %v2490_v44  ;;  %v2411_v11 = vor.u32 1.1754944e-38, %v2410_v21  ;;  %v2421_v1 = vsub.f32 1.0, %v2420_v23  ;;  %vm2387_vm14 = vmor %vm2385_vm12, %vm2386_vm11  ;;  %v4155_v43 = vpop.eup %4154 }
 0x4bc   :  { %v2382_v47 = vsub.f32 1.0, %v2381_v52  ;;  %v2501_v24 = vmul.f32 %v4153_v53, %v2495_v61  ;;  %v2428_v61 = vand.u32 2147483647, %v5680_v30 }
 0x4bd   :  { %v2412_v52 = vsel %vm2409_vm13, %v2411_v11, %v2407_v62  ;;  %v2422_v20 = vmul.f32 %v5689_v16, %v2421_v1  ;;  %v6680_v62 = vld [vmem:[#allocation97_spill] sm:$0xff]  ;;  %v6684_v1 = vld [vmem:[#allocation100_spill] sm:$0xff] }
 0x4be   :  { %v2383_v17 = vmul.f32 %v4151_v13, %v2382_v47  ;;  %v2503_v49 = vpack.c.bf16 %v2501_v24, %v2501_v24  ;;  %v2434_v21 = vmul.f32 %v2412_v52, %v5548_v29  ;;  %vm2429_vm3 = vcmp.eq.f32.partialorder %v2428_v61, 8.507059e+37  ;;  %v6687_v52 = vld [vmem:[#allocation16_spill] sm:$0xff]  ;;  %v6696_v61 = vld [vmem:[#allocation29_spill] sm:$0xff] }
 0x4bf   :  { %v2423_v11 = vadd.f32 %v5689_v16, %v2422_v20  ;;  %v6690_v20 = vld [vmem:[#allocation17_spill] sm:$0xff] }
 0x4c0   :  { %v2384_v44 = vadd.f32 %v4151_v13, %v2383_v17  ;;  %2525 = vmatmul.bf16.vlgmr.msra.gmra.mxu1 %v2503_v49  ;;  %2551 = vmatmul.bf16.vlgmr.msra.gmra.mxu3 %v2503_v49  ;;  %v6681_v17 = vld [vmem:[#allocation98_spill] sm:$0xff] }
 0x4c1   :  { %2621 = vmatpush.bf16.msra.mxu1 %v6377_v36  ;;  %2647 = vmatpush.bf16.msra.mxu3 %v6378_v39  ;;  %v2427_v29 = vsel %vm2426_vm2, %v5689_v16, %v2423_v11  ;;  %v6679_v16 = vld [vmem:[#allocation19_spill] sm:$0xff]  ;;  %v6694_v11 = vld [vmem:[#allocation21_spill] sm:$0xff] }
 0x4c2   :  { %v2388_v15 = vsel %vm2387_vm14, %v4151_v13, %v2384_v44  ;;  %v2430_v13 = vand.u32 2147483648, %v5680_v30  ;;  %v6678_v30 = vld [vmem:[#allocation18_spill] sm:$0xff]  ;;  %v6685_v44 = vld [vmem:[#allocation101_spill] sm:$0xff] }
 0x4c3   :  { %v2393_v53 = vsel %vm2390_vm15, %v2392_v9, %v2388_v15  ;;  %v6686_v9 = vld [vmem:[#allocation13_spill] sm:$0xff] }
 0x4c4   :  { %v2435_v23 = vmul.f32 %v4155_v43, %v2393_v53  ;;  %v2431_v2 = vor.u32 1.1754944e-38, %v2430_v13  ;;  %v6688_v15 = vld [vmem:[#allocation25_spill] sm:$0xff]  ;;  %v6689_v43 = vld [vmem:[#allocation26_spill] sm:$0xff]  ;;  %v6691_v53 = vld [vmem:[#allocation20_spill] sm:$0xff] }
 0x4c5   :  { %2622 = vmatpush.bf16.msra.mxu1 %v6379_v12  ;;  %2648 = vmatpush.bf16.msra.mxu3 %v6380_v51  ;;  %v6695_v13 = vld [vmem:[#allocation24_spill] sm:$0xff] }
 0x4c6   :  { %v5711_v60 = vadd.f32 %v2435_v23, %v2434_v21  ;;  %v2432_v46 = vsel %vm2429_vm3, %v2431_v2, %v2427_v29  ;;  %v6692_v21 = vld [vmem:[#allocation27_spill] sm:$0xff]  ;;  %v6693_v23 = vld [vmem:[#allocation28_spill] sm:$0xff]  ;;  %v6697_v29 = vld [vmem:[#allocation30_spill] sm:$0xff] }
 0x4c7   :  { %v6698_v2 = vld [vmem:[#allocation31_spill] sm:$0xff] }
 0x4c8   :  { %4156 = vtanh.f32 %v5711_v60 }
 0x4c9   :  { %2623 = vmatpush.bf16.msra.mxu1 %v6381_v14  ;;  %2649 = vmatpush.bf16.msra.mxu3 %v6382_v35 }
 0x4cd   :  { %2624 = vmatpush.bf16.msra.mxu1 %v6383_v56  ;;  %2650 = vmatpush.bf16.msra.mxu3 %v6384_v55 }
 0x4ce   :  { %v4157_v47 = vpop.eup %4156 }
 0x4cf   :  { %v2438_v24 = vmul.f32 %v4157_v47, %v2432_v46  ;;  %v6699_v47 = vld [vmem:[#allocation32_spill] sm:$0xff]  ;;  %v6700_v46 = vld [vmem:[#allocation39_spill] sm:$0xff] }
 0x4d0   :  { %2577 = vmatmul.bf16.vlgmr.msrb.gmra.mxu1 %v2503_v49  ;;  %2603 = vmatmul.bf16.vlgmr.msrb.gmra.mxu3 %v2503_v49  ;;  %v6683_v49 = vld [vmem:[#allocation23_spill] sm:$0xff] }
 0x4d1   :  { %v2502_v42 = vpack.c.bf16 %v2438_v24, %v2438_v24  ;;  %2625 = vmatpush.bf16.msra.mxu1 %v6385_v40  ;;  %2651 = vmatpush.bf16.msra.mxu3 %v6386_v48  ;;  %v6701_v24 = vld [vmem:[#allocation40_spill] sm:$0xff] }
 0x4d3   :  { %2512 = vmatmul.bf16.vlgmr.msra.gmra.mxu0 %v2502_v42  ;;  %2538 = vmatmul.bf16.vlgmr.msra.gmra.mxu2 %v2502_v42 }
 0x4d4   :  { %2608 = vmatpush.bf16.msra.mxu0 %v4842_v32  ;;  %2634 = vmatpush.bf16.msra.mxu2 %v4844_v38 }
 0x4d5   :  { %2626 = vmatpush.bf16.msra.mxu1 %v6387_v18  ;;  %2652 = vmatpush.bf16.msra.mxu3 %v6388_v45 }
 0x4d8   :  { %2609 = vmatpush.bf16.msra.mxu0 %v4854_v10  ;;  %2635 = vmatpush.bf16.msra.mxu2 %v4856_v25 }
 0x4d9   :  { %2627 = vmatpush.bf16.msra.mxu1 %v6389_v7  ;;  %2653 = vmatpush.bf16.msra.mxu3 %v6390_v59 }
 0x4dc   :  { %2610 = vmatpush.bf16.msra.mxu0 %v4864_v5  ;;  %2636 = vmatpush.bf16.msra.mxu2 %v4866_v57 }
 0x4dd   :  { %2628 = vmatpush.bf16.msra.mxu1 %v6391_v28  ;;  %2654 = vmatpush.bf16.msra.mxu3 %v6392_v6 }
 0x4e0   :  { %2611 = vmatpush.bf16.msra.mxu0 %v4874_v58  ;;  %2629 = vmatmul.bf16.vlgmr.msra.gmra.mxu1 %v2502_v42 }
 0x4e1   :  { %2805 = vmatpush.bf16.msrb.mxu1 %v6393_v54  ;;  %2831 = vmatpush.bf16.msrb.mxu3 %v6394_v34 }
 0x4e2   :  { %2637 = vmatpush.bf16.msra.mxu2 %v4876_v31  ;;  %2655 = vmatmul.bf16.vlgmr.msra.gmra.mxu3 %v2502_v42 }
 0x4e3   :  { %2564 = vmatmul.bf16.vlgmr.msrb.gmra.mxu0 %v2502_v42  ;;  %2590 = vmatmul.bf16.vlgmr.msrb.gmra.mxu2 %v2502_v42 }
 0x4e4   :  { %2612 = vmatpush.bf16.msra.mxu0 %v4884_v4 }
 0x4e5   :  { %2806 = vmatpush.bf16.msrb.mxu1 %v6395_v63  ;;  %2832 = vmatpush.bf16.msrb.mxu3 %v6396_v50 }
 0x4e6   :  { %2638 = vmatpush.bf16.msra.mxu2 %v4886_v3 }
 0x4e8   :  { %2613 = vmatpush.bf16.msra.mxu0 %v4894_v22 }
 0x4e9   :  { %2807 = vmatpush.bf16.msrb.mxu1 %v6397_v26  ;;  %2833 = vmatpush.bf16.msrb.mxu3 %v6398_v37 }
 0x4ea   :  { %2639 = vmatpush.bf16.msra.mxu2 %v4896_v19 }
 0x4ec   :  { %2614 = vmatpush.bf16.msra.mxu0 %v6680_v62 }
 0x4ed   :  { %2808 = vmatpush.bf16.msrb.mxu1 %v6678_v30  ;;  %2834 = vmatpush.bf16.msrb.mxu3 %v6679_v16 }
 0x4ee   :  { %2640 = vmatpush.bf16.msra.mxu2 %v6681_v17 }
 0x4f0   :  { %2615 = vmatpush.bf16.msra.mxu0 %v6684_v1 }
 0x4f1   :  { %2809 = vmatpush.bf16.msrb.mxu1 %v6682_v33  ;;  %2835 = vmatpush.bf16.msrb.mxu3 %v6683_v49  ;;  %v6742_v49 = vld [vmem:[#allocation71_spill] sm:$0xff]  ;;  %v6743_v33 = vld [vmem:[#allocation105_spill] sm:$0xff] }
 0x4f2   :  { %2641 = vmatpush.bf16.msra.mxu2 %v6685_v44 }
 0x4f3   :  { %2616 = vmatmul.bf16.vlgmr.msra.gmra.mxu0 %v2502_v42 }
 0x4f4   :  { %2792 = vmatpush.bf16.msrb.mxu0 %v6686_v9 }
 0x4f5   :  { %2810 = vmatpush.bf16.msrb.mxu1 %v6688_v15  ;;  %2836 = vmatpush.bf16.msrb.mxu3 %v6689_v43  ;;  %v6740_v43 = vld [vmem:[#allocation121_spill] sm:$0xff] }
 0x4f6   :  { %2818 = vmatpush.bf16.msrb.mxu2 %v6687_v52 }
 0x4f7   :  { %2642 = vmatmul.bf16.vlgmr.msra.gmra.mxu2 %v2502_v42  ;;  %v6702_v42 = vld [vmem:[#allocation33_spill] sm:$0xff] }
 0x4f8   :  { %2793 = vmatpush.bf16.msrb.mxu0 %v6690_v20 }
 0x4f9   :  { %2811 = vmatpush.bf16.msrb.mxu1 %v6692_v21  ;;  %2837 = vmatpush.bf16.msrb.mxu3 %v6693_v23  ;;  %v6703_v21 = vld [vmem:[#allocation34_spill] sm:$0xff]  ;;  %v6704_v23 = vld [vmem:[#allocation43_spill] sm:$0xff] }
 0x4fa   :  { %2819 = vmatpush.bf16.msrb.mxu2 %v6691_v53 }
 0x4fc   :  { %2794 = vmatpush.bf16.msrb.mxu0 %v6694_v11  ;;  %v6705_v11 = vld [vmem:[#allocation44_spill] sm:$0xff] }
 0x4fd   :  { %2812 = vmatpush.bf16.msrb.mxu1 %v6696_v61  ;;  %2838 = vmatpush.bf16.msrb.mxu3 %v6697_v29  ;;  %v6707_v61 = vld [vmem:[#allocation36_spill] sm:$0xff]  ;;  %v6708_v29 = vld [vmem:[#allocation47_spill] sm:$0xff] }
 0x4fe   :  { %2820 = vmatpush.bf16.msrb.mxu2 %v6695_v13  ;;  %v6706_v13 = vld [vmem:[#allocation35_spill] sm:$0xff] }
 0x500   :  { %2795 = vmatpush.bf16.msrb.mxu0 %v6700_v46  ;;  %v6711_v46 = vld [vmem:[#allocation38_spill] sm:$0xff] }
 0x501   :  { %2857 = vmatpush.bf16.msra.mxu1 %v6698_v2  ;;  %2883 = vmatpush.bf16.msra.mxu3 %v6699_v47  ;;  %v6709_v2 = vld [vmem:[#allocation48_spill] sm:$0xff]  ;;  %v6710_v47 = vld [vmem:[#allocation37_spill] sm:$0xff] }
 0x502   :  { %2821 = vmatpush.bf16.msrb.mxu2 %v6701_v24  ;;  %v6712_v24 = vld [vmem:[#allocation51_spill] sm:$0xff] }
 0x504   :  { %2796 = vmatpush.bf16.msrb.mxu0 %v6704_v23  ;;  %v6715_v23 = vld [vmem:[#allocation42_spill] sm:$0xff] }
 0x505   :  { %2858 = vmatpush.bf16.msra.mxu1 %v6702_v42  ;;  %2884 = vmatpush.bf16.msra.mxu3 %v6703_v21  ;;  %v6713_v42 = vld [vmem:[#allocation52_spill] sm:$0xff]  ;;  %v6714_v21 = vld [vmem:[#allocation41_spill] sm:$0xff] }
 0x506   :  { %2822 = vmatpush.bf16.msrb.mxu2 %v6705_v11  ;;  %v6716_v11 = vld [vmem:[#allocation57_spill] sm:$0xff] }
 0x508   :  { %2797 = vmatpush.bf16.msrb.mxu0 %v6708_v29  ;;  %v6719_v29 = vld [vmem:[#allocation60_spill] sm:$0xff] }
 0x509   :  { %2859 = vmatpush.bf16.msra.mxu1 %v6706_v13  ;;  %2885 = vmatpush.bf16.msra.mxu3 %v6707_v61  ;;  %v6717_v13 = vld [vmem:[#allocation58_spill] sm:$0xff]  ;;  %v6718_v61 = vld [vmem:[#allocation59_spill] sm:$0xff] }
 0x50a   :  { %2823 = vmatpush.bf16.msrb.mxu2 %v6709_v2  ;;  %v6720_v2 = vld [vmem:[#allocation45_spill] sm:$0xff] }
 0x50c   :  { %2798 = vmatpush.bf16.msrb.mxu0 %v6712_v24  ;;  %v6723_v24 = vld [vmem:[#allocation64_spill] sm:$0xff] }
 0x50d   :  { %2860 = vmatpush.bf16.msra.mxu1 %v6710_v47  ;;  %2886 = vmatpush.bf16.msra.mxu3 %v6711_v46  ;;  %v6721_v47 = vld [vmem:[#allocation46_spill] sm:$0xff]  ;;  %v6722_v46 = vld [vmem:[#allocation63_spill] sm:$0xff] }
 0x50e   :  { %2824 = vmatpush.bf16.msrb.mxu2 %v6713_v42  ;;  %v6724_v42 = vld [vmem:[#allocation49_spill] sm:$0xff] }
 0x510   :  { %2799 = vmatpush.bf16.msrb.mxu0 %v6716_v11  ;;  %v6727_v11 = vld [vmem:[#allocation68_spill] sm:$0xff] }
 0x511   :  { %2861 = vmatpush.bf16.msra.mxu1 %v6714_v21  ;;  %2887 = vmatpush.bf16.msra.mxu3 %v6715_v23  ;;  %v6725_v21 = vld [vmem:[#allocation50_spill] sm:$0xff]  ;;  %v6726_v23 = vld [vmem:[#allocation67_spill] sm:$0xff] }
 0x512   :  { %2825 = vmatpush.bf16.msrb.mxu2 %v6717_v13  ;;  %v6728_v13 = vld [vmem:[#allocation53_spill] sm:$0xff] }
 0x514   :  { %2844 = vmatpush.bf16.msra.mxu0 %v6718_v61  ;;  %v6729_v61 = vld [vmem:[#allocation54_spill] sm:$0xff] }
 0x515   :  { %2862 = vmatpush.bf16.msra.mxu1 %v6720_v2  ;;  %2888 = vmatpush.bf16.msra.mxu3 %v6721_v47  ;;  %v6731_v2 = vld [vmem:[#allocation74_spill] sm:$0xff]  ;;  %v6732_v47 = vld [vmem:[#allocation77_spill] sm:$0xff] }
 0x516   :  { %2870 = vmatpush.bf16.msra.mxu2 %v6719_v29  ;;  %v6730_v29 = vld [vmem:[#allocation73_spill] sm:$0xff] }
 0x518   :  { %2845 = vmatpush.bf16.msra.mxu0 %v6722_v46  ;;  %v6733_v46 = vld [vmem:[#allocation78_spill] sm:$0xff] }
 0x519   :  { %2863 = vmatpush.bf16.msra.mxu1 %v6724_v42  ;;  %2889 = vmatpush.bf16.msra.mxu3 %v6725_v21  ;;  %v6735_v42 = vld [vmem:[#allocation83_spill] sm:$0xff]  ;;  %v6736_v21 = vld [vmem:[#allocation86_spill] sm:$0xff] }
 0x51a   :  { %2871 = vmatpush.bf16.msra.mxu2 %v6723_v24  ;;  %v6734_v24 = vld [vmem:[#allocation82_spill] sm:$0xff] }
 0x51c   :  { %2846 = vmatpush.bf16.msra.mxu0 %v6726_v23  ;;  %v6737_v23 = vld [vmem:[#allocation87_spill] sm:$0xff] }
 0x51d   :  { %2864 = vmatpush.bf16.msra.mxu1 %v6728_v13  ;;  %2890 = vmatpush.bf16.msra.mxu3 %v6729_v61  ;;  %v6739_v13 = vld [vmem:[#allocation92_spill] sm:$0xff] }
 0x51e   :  { %2872 = vmatpush.bf16.msra.mxu2 %v6727_v11  ;;  %v6738_v11 = vld [vmem:[#allocation91_spill] sm:$0xff] }
 0x520   :  { %2847 = vmatpush.bf16.msra.mxu0 %v6730_v29 }
 0x522   :  { %2873 = vmatpush.bf16.msra.mxu2 %v6731_v2 }
 0x524   :  { %2848 = vmatpush.bf16.msra.mxu0 %v6732_v47 }
 0x526   :  { %2874 = vmatpush.bf16.msra.mxu2 %v6733_v46 }
 0x528   :  { %2849 = vmatpush.bf16.msra.mxu0 %v6734_v24 }
 0x52a   :  { %2875 = vmatpush.bf16.msra.mxu2 %v6735_v42 }
 0x52c   :  { %2850 = vmatpush.bf16.msra.mxu0 %v6736_v21  ;;  %v6741_v21 = vld [vmem:[#allocation122_spill] sm:$0xff] }
 0x52e   :  { %2876 = vmatpush.bf16.msra.mxu2 %v6737_v23 }
 0x530   :  { %2851 = vmatpush.bf16.msra.mxu0 %v6738_v11 }
 0x532   :  { %2877 = vmatpush.bf16.msra.mxu2 %v6739_v13 }
 0x53d   :  { %v2526_v61 = vpop.f32.mrf.mxu1 }
 0x543   :  { %v2552_v29 = vpop.f32.mrf.mxu3 }
 0x545   :  { %v2528_v53 = vpop.f32.mrf.mxu1 }
 0x546   :  { %v352_v53 = vadd.f32 %v6743_v33, %v6742_v49 }
 0x54b   :  { %v2554_v2 = vpop.f32.mrf.mxu3 }
 0x54d   :  { %v2578_v20 = vpop.f32.mrf.mxu1 }
 0x550   :  { %v2513_v47 = vpop.f32.mrf.mxu0 }
 0x551   :  { %v2514_v46 = vadd.f32 %v2513_v47, %v6740_v43 }
 0x553   :  { %v2527_v15 = vadd.f32 %v2526_v61, %v2514_v46  ;;  %v2604_v24 = vpop.f32.mrf.mxu3 }
 0x555   :  { %v3831_v52 = vmul.f32 -1.442695, %v2527_v15  ;;  %v2580_v42 = vpop.f32.mrf.mxu1 }
 0x556   :  { %v2539_v9 = vpop.f32.mrf.mxu2 }
 0x557   :  { %4158 = vpow2.f32 %v3831_v52  ;;  %v2540_v23 = vadd.f32 %v2539_v9, %v6741_v21 }
 0x558   :  { %v2515_v44 = vpop.f32.mrf.mxu0 }
 0x559   :  { %v2553_v11 = vadd.f32 %v2552_v29, %v2540_v23  ;;  %v6744_v23 = vld [vmem:[#allocation80_spill] sm:$0xff] }
 0x55b   :  { %v3832_v1 = vmul.f32 -1.442695, %v2553_v11  ;;  %v2606_v13 = vpop.f32.mrf.mxu3  ;;  %v6745_v11 = vld [vmem:[#allocation106_spill] sm:$0xff] }
 0x55c   :  { %v410_v13 = vadd.f32 %v6745_v11, %v6744_v23 }
 0x55d   :  { %v4159_v2 = vpop.eup %4158  ;;  %4160 = vpow2.f32 %v3832_v1  ;;  %v2630_v17 = vpop.f32.mrf.mxu1 }
 0x55e   :  { %v5816_v62 = vadd.f32 1.0, %v4159_v2  ;;  %v2661_v61 = vadd.f32 %v2630_v17, %v352_v53  ;;  %v2541_v47 = vpop.f32.mrf.mxu2 }
 0x560   :  { %4162 = vrcp.f32 %v5816_v62  ;;  %v3829_v15 = vmul.f32 -1.442695, %v2661_v61  ;;  %v2565_v52 = vpop.f32.mrf.mxu0  ;;  %vm2736_vm6 = vweird.f32 %v5816_v62 }
 0x562   :  { %4164 = vpow2.f32 %v3829_v15  ;;  %v2566_v15 = vadd.f32 %v2565_v52, %v6443_v0 }
 0x563   :  { %v4161_v46 = vpop.eup %4160 }
 0x564   :  { %v2749_v44 = vadd.f32 1.0, %v4161_v46 }
 0x565   :  { %v2656_v9 = vpop.f32.mrf.mxu3  ;;  %v2632_v29 = vpop.f32.mrf.mxu1 }
 0x566   :  { %v4163_v33 = vpop.eup %4162  ;;  %4166 = vrcp.f32 %v2749_v44  ;;  %v2591_v1 = vpop.f32.mrf.mxu2  ;;  %v2663_v2 = vadd.f32 %v2656_v9, %v410_v13  ;;  %v6746_v9 = vld [vmem:[#allocation117_spill] sm:$0xff]  ;;  %vm2755_vm7 = vweird.f32 %v2749_v44 }
 0x567   :  { %v2732_v42 = vmul.f32 %v4163_v33, %v5816_v62  ;;  %v2592_v17 = vadd.f32 %v2591_v1, %v5016_v27  ;;  %v323_v13 = vadd.f32 %v6746_v9, %v6444_v8  ;;  %vm2737_vm4 = vweird.f32 %v4163_v33 }
 0x568   :  { %v2567_v53 = vpop.f32.mrf.mxu0  ;;  %v4165_v47 = vpop.eup %4164  ;;  %v3830_v46 = vmul.f32 -1.442695, %v2663_v2  ;;  %vm5831_vm8 = vmor %vm2736_vm6, %vm2737_vm4 }
 0x569   :  { %v2733_v61 = vsub.f32 1.0, %v2732_v42  ;;  %v2605_v49 = vadd.f32 %v2604_v24, %v2592_v17  ;;  %v5824_v43 = vadd.f32 1.0, %v4165_v47  ;;  %v2579_v53 = vadd.f32 %v2578_v20, %v2566_v15 }
 0x56a   :  { %v2761_v42 = vand.u32 2147483648, %v2749_v44  ;;  %v2759_v24 = vand.u32 2147483647, %v2749_v44  ;;  %v2740_v20 = vand.u32 2147483647, %v5816_v62 }
 0x56b   :  { %v3833_v11 = vmul.f32 -1.442695, %v2605_v49  ;;  %v2734_v16 = vmul.f32 %v4163_v33, %v2733_v61  ;;  %vm2692_vm1 = vweird.f32 %v5824_v43 }
 0x56c   :  { %v4167_v21 = vpop.eup %4166  ;;  %vm2760_vm10 = vcmp.eq.f32.partialorder %v2759_v24, 8.507059e+37  ;;  %vm2741_vm11 = vcmp.eq.f32.partialorder %v2740_v20, 8.507059e+37 }
 0x56d   :  { %v2658_v29 = vpop.f32.mrf.mxu3  ;;  %v2751_v23 = vmul.f32 %v4167_v21, %v2749_v44  ;;  %4168 = vpow2.f32 %v3833_v11  ;;  %vm2756_vm5 = vweird.f32 %v4167_v21  ;;  %v2735_v49 = vadd.f32 %v4163_v33, %v2734_v16 }
 0x56e   :  { %v2593_v30 = vpop.f32.mrf.mxu2  ;;  %4170 = vpow2.f32 %v3830_v46  ;;  %vm2757_vm9 = vmor %vm2755_vm7, %vm2756_vm5  ;;  %v2762_v46 = vor.u32 1.1754944e-38, %v2761_v42 }
 0x56f   :  { %v2752_v1 = vsub.f32 1.0, %v2751_v23  ;;  %4172 = vrcp.f32 %v5824_v43  ;;  %v2742_v30 = vand.u32 2147483648, %v5816_v62  ;;  %v2739_v16 = vsel %vm5831_vm8, %v4163_v33, %v2735_v49 }
 0x570   :  { %v2617_v52 = vpop.f32.mrf.mxu0  ;;  %4174 = vtanh.f32 %v2579_v53 }
 0x571   :  { %v2753_v2 = vmul.f32 %v4167_v21, %v2752_v1  ;;  %v2660_v17 = vadd.f32 %v2617_v52, %v323_v13  ;;  %v2743_v13 = vor.u32 1.1754944e-38, %v2742_v30 }
 0x573   :  { %v2754_v23 = vadd.f32 %v4167_v21, %v2753_v2  ;;  %v3828_v61 = vmul.f32 -1.442695, %v2660_v17  ;;  %v4169_v15 = vpop.eup %4168  ;;  %v2744_v52 = vsel %vm2741_vm11, %v2743_v13, %v2739_v16  ;;  %v6750_v13 = vld [vmem:[#allocation118_spill] sm:$0xff] }
 0x574   :  { %v4171_v11 = vpop.eup %4170  ;;  %v2769_v9 = vadd.f32 1.0, %v4169_v15 }
 0x575   :  { %v2758_v29 = vsel %vm2757_vm9, %v4167_v21, %v2754_v23  ;;  %v5838_v44 = vpop.eup %4172  ;;  %4176 = vpow2.f32 %v3828_v61  ;;  %v5843_v33 = vadd.f32 1.0, %v4171_v11 }
 0x576   :  { %v2763_v1 = vsel %vm2760_vm10, %v2762_v46, %v2758_v29  ;;  %4178 = vrcp.f32 %v2769_v9  ;;  %v2688_v53 = vmul.f32 %v5838_v44, %v5824_v43  ;;  %v4175_v17 = vpop.eup %4174  ;;  %v2779_v16 = vand.u32 2147483647, %v2769_v9  ;;  %v6749_v29 = vld [vmem:[#allocation89_spill] sm:$0xff] }
 0x577   :  { %v2785_v42 = vmul.f32 %v2763_v1, %v5682_v41  ;;  %v2786_v21 = vmul.f32 %v4175_v17, %v2744_v52  ;;  %4180 = vrcp.f32 %v5843_v33  ;;  %v2781_v41 = vand.u32 2147483648, %v2769_v9 }
 0x578   :  { %v2619_v2 = vpop.f32.mrf.mxu0  ;;  %v2689_v47 = vsub.f32 1.0, %v2688_v53  ;;  %v381_v1 = vadd.f32 %v6750_v13, %v6749_v29  ;;  %vm2775_vm13 = vweird.f32 %v2769_v9  ;;  %vm2693_vm14 = vweird.f32 %v5838_v44 }
 0x579   :  { %v5845_v30 = vadd.f32 %v2786_v21, %v2785_v42  ;;  %v2782_v21 = vor.u32 1.1754944e-38, %v2781_v41  ;;  %vm2780_vm0 = vcmp.eq.f32.partialorder %v2779_v16, 8.507059e+37  ;;  %vm5860_vm2 = vmor %vm2692_vm1, %vm2693_vm14  ;;  %vm2712_vm9 = vweird.f32 %v5843_v33 }
 0x57a   :  { %v2643_v62 = vpop.f32.mrf.mxu2  ;;  %v2690_v46 = vmul.f32 %v5838_v44, %v2689_v47 }
 0x57b   :  { %v4177_v24 = vpop.eup %4176  ;;  %v2662_v42 = vadd.f32 %v2643_v62, %v381_v1 }
 0x57c   :  { %v4179_v49 = vpop.eup %4178  ;;  %v2667_v23 = vadd.f32 1.0, %v4177_v24  ;;  %v2691_v17 = vadd.f32 %v5838_v44, %v2690_v46  ;;  %v2696_v46 = vand.u32 2147483647, %v5824_v43 }
 0x57d   :  { %v2771_v20 = vmul.f32 %v4179_v49, %v2769_v9  ;;  %vm2776_vm12 = vweird.f32 %v4179_v49  ;;  %v5852_v52 = vpop.eup %4180 }
 0x57e   :  { %4182 = vrcp.f32 %v2667_v23  ;;  %vm2777_vm15 = vmor %vm2775_vm13, %vm2776_vm12  ;;  %v2708_v9 = vmul.f32 %v5852_v52, %v5843_v33  ;;  %v2679_v13 = vand.u32 2147483648, %v2667_v23  ;;  %v2677_v1 = vand.u32 2147483647, %v2667_v23 }
 0x57f   :  { %v2772_v15 = vsub.f32 1.0, %v2771_v20  ;;  %4184 = vtanh.f32 %v5845_v30  ;;  %vm2673_vm4 = vweird.f32 %v2667_v23  ;;  %vm2697_vm5 = vcmp.eq.f32.partialorder %v2696_v46, 8.507059e+37  ;;  %v6786_v46 = vld [vmem:[#allocation38_spill] sm:$0xff] }
 0x580   :  { %4186 = vtanh.f32 %v2662_v42  ;;  %vm2678_vm7 = vcmp.eq.f32.partialorder %v2677_v1, 8.507059e+37  ;;  %vm2713_vm8 = vweird.f32 %v5852_v52  ;;  %v6791_v1 = vld [vmem:[#allocation57_spill] sm:$0xff] }
 0x581   :  { %v2773_v11 = vmul.f32 %v4179_v49, %v2772_v15  ;;  %vm2714_vm10 = vmor %vm2712_vm9, %vm2713_vm8 }
 0x582   :  { %v2645_v61 = vpop.f32.mrf.mxu2 }
 0x583   :  { %v2774_v2 = vadd.f32 %v4179_v49, %v2773_v11  ;;  %v2698_v61 = vand.u32 2147483648, %v5824_v43  ;;  %v2680_v43 = vor.u32 1.1754944e-38, %v2679_v13  ;;  %v6788_v13 = vld [vmem:[#allocation52_spill] sm:$0xff] }
 0x584   :  { %v4183_v53 = vpop.eup %4182 }
 0x585   :  { %v2669_v24 = vmul.f32 %v4183_v53, %v2667_v23  ;;  %v2778_v47 = vsel %vm2777_vm15, %v4179_v49, %v2774_v2  ;;  %v4185_v20 = vpop.eup %4184  ;;  %v2695_v49 = vsel %vm5860_vm2, %v5838_v44, %v2691_v17  ;;  %vm2674_vm3 = vweird.f32 %v4183_v53 }
 0x586   :  { %v2783_v15 = vsel %vm2780_vm0, %v2782_v21, %v2778_v47  ;;  %v2699_v29 = vor.u32 1.1754944e-38, %v2698_v61  ;;  %v2709_v21 = vsub.f32 1.0, %v2708_v9  ;;  %vm2675_vm6 = vmor %vm2673_vm4, %vm2674_vm3  ;;  %v4187_v42 = vpop.eup %4186 }
 0x587   :  { %v2670_v62 = vsub.f32 1.0, %v2669_v24  ;;  %v2789_v41 = vmul.f32 %v4185_v20, %v2783_v15 }
 0x588   :  { %v2700_v24 = vsel %vm2697_vm5, %v2699_v29, %v2695_v49  ;;  %v2710_v17 = vmul.f32 %v5852_v52, %v2709_v21  ;;  %v6789_v49 = vld [vmem:[#allocation41_spill] sm:$0xff]  ;;  %v6793_v21 = vld [vmem:[#allocation59_spill] sm:$0xff] }
 0x589   :  { %v2671_v16 = vmul.f32 %v4183_v53, %v2670_v62  ;;  %v2791_v2 = vpack.c.bf16 %v2789_v41, %v2789_v41  ;;  %v2722_v61 = vmul.f32 %v2700_v24, %v5711_v60  ;;  %v6785_v62 = vld [vmem:[#allocation37_spill] sm:$0xff]  ;;  %v6787_v41 = vld [vmem:[#allocation51_spill] sm:$0xff]  ;;  %v6796_v24 = vld [vmem:[#allocation46_spill] sm:$0xff] }
 0x58a   :  { %v2711_v29 = vadd.f32 %v5852_v52, %v2710_v17  ;;  %v6799_v17 = vld [vmem:[#allocation49_spill] sm:$0xff] }
 0x58b   :  { %v2672_v47 = vadd.f32 %v4183_v53, %v2671_v16  ;;  %2813 = vmatmul.bf16.vlgmr.msrb.gmra.mxu1 %v2791_v2  ;;  %2839 = vmatmul.bf16.vlgmr.msrb.gmra.mxu3 %v2791_v2  ;;  %v6790_v16 = vld [vmem:[#allocation42_spill] sm:$0xff] }
 0x58c   :  { %2909 = vmatpush.bf16.msrb.mxu1 %v6377_v36  ;;  %2935 = vmatpush.bf16.msrb.mxu3 %v6378_v39  ;;  %v2718_v36 = vand.u32 2147483648, %v5843_v33  ;;  %v2716_v39 = vand.u32 2147483647, %v5843_v33  ;;  %v6783_v33 = vld [vmem:[#allocation47_spill] sm:$0xff] }
 0x58d   :  { %v2676_v44 = vsel %vm2675_vm6, %v4183_v53, %v2672_v47  ;;  %v6794_v47 = vld [vmem:[#allocation60_spill] sm:$0xff] }
 0x58e   :  { %v2681_v20 = vsel %vm2678_vm7, %v2680_v43, %v2676_v44  ;;  %vm2717_vm11 = vcmp.eq.f32.partialorder %v2716_v39, 8.507059e+37  ;;  %v6795_v43 = vld [vmem:[#allocation45_spill] sm:$0xff]  ;;  %v6797_v44 = vld [vmem:[#allocation63_spill] sm:$0xff] }
 0x58f   :  { %v2723_v9 = vmul.f32 %v4187_v42, %v2681_v20  ;;  %v6798_v42 = vld [vmem:[#allocation64_spill] sm:$0xff]  ;;  %v6800_v20 = vld [vmem:[#allocation50_spill] sm:$0xff]  ;;  %v6805_v39 = vld [vmem:[#allocation73_spill] sm:$0xff] }
 0x590   :  { %2910 = vmatpush.bf16.msrb.mxu1 %v6379_v12  ;;  %2936 = vmatpush.bf16.msrb.mxu3 %v6380_v51  ;;  %v2715_v12 = vsel %vm2714_vm10, %v5852_v52, %v2711_v29  ;;  %v2719_v51 = vor.u32 1.1754944e-38, %v2718_v36  ;;  %v6784_v52 = vld [vmem:[#allocation48_spill] sm:$0xff]  ;;  %v6803_v29 = vld [vmem:[#allocation53_spill] sm:$0xff]  ;;  %v6804_v36 = vld [vmem:[#allocation54_spill] sm:$0xff] }
 0x591   :  { %v5874_v23 = vadd.f32 %v2723_v9, %v2722_v61  ;;  %v6801_v61 = vld [vmem:[#allocation67_spill] sm:$0xff]  ;;  %v6802_v9 = vld [vmem:[#allocation68_spill] sm:$0xff] }
 0x592   :  { %v2720_v53 = vsel %vm2717_vm11, %v2719_v51, %v2715_v12  ;;  %v6806_v12 = vld [vmem:[#allocation74_spill] sm:$0xff]  ;;  %v6807_v51 = vld [vmem:[#allocation77_spill] sm:$0xff] }
 0x593   :  { %4188 = vtanh.f32 %v5874_v23 }
 0x594   :  { %2911 = vmatpush.bf16.msrb.mxu1 %v6381_v14  ;;  %2937 = vmatpush.bf16.msrb.mxu3 %v6382_v35  ;;  %v6765_v14 = vld [vmem:[#allocation17_spill] sm:$0xff]  ;;  %v6766_v35 = vld [vmem:[#allocation20_spill] sm:$0xff] }
 0x598   :  { %2912 = vmatpush.bf16.msrb.mxu1 %v6383_v56  ;;  %2938 = vmatpush.bf16.msrb.mxu3 %v6384_v55  ;;  %v6767_v56 = vld [vmem:[#allocation27_spill] sm:$0xff]  ;;  %v6768_v55 = vld [vmem:[#allocation28_spill] sm:$0xff] }
 0x599   :  { %v4189_v60 = vpop.eup %4188 }
 0x59a   :  { %v2726_v15 = vmul.f32 %v4189_v60, %v2720_v53  ;;  %v6808_v60 = vld [vmem:[#allocation78_spill] sm:$0xff] }
 0x59b   :  { %2865 = vmatmul.bf16.vlgmr.msra.gmra.mxu1 %v2791_v2  ;;  %2891 = vmatmul.bf16.vlgmr.msra.gmra.mxu3 %v2791_v2  ;;  %v6792_v2 = vld [vmem:[#allocation58_spill] sm:$0xff] }
 0x59c   :  { %v2790_v11 = vpack.c.bf16 %v2726_v15, %v2726_v15  ;;  %2913 = vmatpush.bf16.msrb.mxu1 %v6385_v40  ;;  %2939 = vmatpush.bf16.msrb.mxu3 %v6386_v48  ;;  %v6769_v40 = vld [vmem:[#allocation21_spill] sm:$0xff]  ;;  %v6770_v48 = vld [vmem:[#allocation24_spill] sm:$0xff]  ;;  %v6809_v53 = vld [vmem:[#allocation82_spill] sm:$0xff] }
 0x59d   :  { %v6810_v15 = vld [vmem:[#allocation83_spill] sm:$0xff] }
 0x59e   :  { %2800 = vmatmul.bf16.vlgmr.msrb.gmra.mxu0 %v2790_v11  ;;  %2826 = vmatmul.bf16.vlgmr.msrb.gmra.mxu2 %v2790_v11 }
 0x59f   :  { %2896 = vmatpush.bf16.msrb.mxu0 %v4842_v32  ;;  %2922 = vmatpush.bf16.msrb.mxu2 %v4844_v38  ;;  %v6753_v32 = vld [vmem:[#allocation18_spill] sm:$0xff]  ;;  %v6754_v38 = vld [vmem:[#allocation19_spill] sm:$0xff] }
 0x5a0   :  { %2914 = vmatpush.bf16.msrb.mxu1 %v6387_v18  ;;  %2940 = vmatpush.bf16.msrb.mxu3 %v6388_v45  ;;  %v6771_v18 = vld [vmem:[#allocation29_spill] sm:$0xff]  ;;  %v6772_v45 = vld [vmem:[#allocation30_spill] sm:$0xff] }
 0x5a3   :  { %2897 = vmatpush.bf16.msrb.mxu0 %v4854_v10  ;;  %2923 = vmatpush.bf16.msrb.mxu2 %v4856_v25  ;;  %v6755_v10 = vld [vmem:[#allocation97_spill] sm:$0xff]  ;;  %v6756_v25 = vld [vmem:[#allocation98_spill] sm:$0xff] }
 0x5a4   :  { %2915 = vmatpush.bf16.msrb.mxu1 %v6389_v7  ;;  %2941 = vmatpush.bf16.msrb.mxu3 %v6390_v59  ;;  %v6773_v7 = vld [vmem:[#allocation31_spill] sm:$0xff]  ;;  %v6774_v59 = vld [vmem:[#allocation32_spill] sm:$0xff] }
 0x5a7   :  { %2898 = vmatpush.bf16.msrb.mxu0 %v4864_v5  ;;  %2924 = vmatpush.bf16.msrb.mxu2 %v4866_v57  ;;  %v6757_v5 = vld [vmem:[#allocation22_spill] sm:$0xff]  ;;  %v6758_v57 = vld [vmem:[#allocation23_spill] sm:$0xff] }
 0x5a8   :  { %2916 = vmatpush.bf16.msrb.mxu1 %v6391_v28  ;;  %2942 = vmatpush.bf16.msrb.mxu3 %v6392_v6  ;;  %v6775_v28 = vld [vmem:[#allocation39_spill] sm:$0xff]  ;;  %v6776_v6 = vld [vmem:[#allocation40_spill] sm:$0xff] }
 0x5ab   :  { %2899 = vmatpush.bf16.msrb.mxu0 %v4874_v58  ;;  %2917 = vmatmul.bf16.vlgmr.msrb.gmra.mxu1 %v2790_v11  ;;  %v6760_v58 = vld [vmem:[#allocation101_spill] sm:$0xff] }
 0x5ac   :  { %3093 = vmatpush.bf16.msra.mxu1 %v6393_v54  ;;  %3119 = vmatpush.bf16.msra.mxu3 %v6394_v34  ;;  %v6777_v54 = vld [vmem:[#allocation33_spill] sm:$0xff]  ;;  %v6778_v34 = vld [vmem:[#allocation34_spill] sm:$0xff] }
 0x5ad   :  { %2925 = vmatpush.bf16.msrb.mxu2 %v4876_v31  ;;  %2943 = vmatmul.bf16.vlgmr.msrb.gmra.mxu3 %v2790_v11  ;;  %v6761_v31 = vld [vmem:[#allocation13_spill] sm:$0xff] }
 0x5ae   :  { %2852 = vmatmul.bf16.vlgmr.msra.gmra.mxu0 %v2790_v11  ;;  %2878 = vmatmul.bf16.vlgmr.msra.gmra.mxu2 %v2790_v11 }
 0x5af   :  { %2900 = vmatpush.bf16.msrb.mxu0 %v4884_v4  ;;  %v6759_v4 = vld [vmem:[#allocation100_spill] sm:$0xff] }
 0x5b0   :  { %3094 = vmatpush.bf16.msra.mxu1 %v6395_v63  ;;  %3120 = vmatpush.bf16.msra.mxu3 %v6396_v50  ;;  %v6779_v63 = vld [vmem:[#allocation43_spill] sm:$0xff]  ;;  %v6780_v50 = vld [vmem:[#allocation44_spill] sm:$0xff] }
 0x5b1   :  { %2926 = vmatpush.bf16.msrb.mxu2 %v4886_v3  ;;  %v6762_v3 = vld [vmem:[#allocation16_spill] sm:$0xff] }
 0x5b3   :  { %2901 = vmatpush.bf16.msrb.mxu0 %v4894_v22  ;;  %v6763_v22 = vld [vmem:[#allocation25_spill] sm:$0xff] }
 0x5b4   :  { %3095 = vmatpush.bf16.msra.mxu1 %v6397_v26  ;;  %3121 = vmatpush.bf16.msra.mxu3 %v6398_v37  ;;  %v6781_v26 = vld [vmem:[#allocation35_spill] sm:$0xff]  ;;  %v6782_v37 = vld [vmem:[#allocation36_spill] sm:$0xff] }
 0x5b5   :  { %2927 = vmatpush.bf16.msrb.mxu2 %v4896_v19  ;;  %v6764_v19 = vld [vmem:[#allocation26_spill] sm:$0xff] }
 0x5b7   :  { %2902 = vmatpush.bf16.msrb.mxu0 %v6755_v10  ;;  %v6814_v10 = vld [vmem:[#allocation92_spill] sm:$0xff] }
 0x5b8   :  { %3096 = vmatpush.bf16.msra.mxu1 %v6753_v32  ;;  %3122 = vmatpush.bf16.msra.mxu3 %v6754_v38  ;;  %v6812_v32 = vld [vmem:[#allocation87_spill] sm:$0xff] }
 0x5b9   :  { %2928 = vmatpush.bf16.msrb.mxu2 %v6756_v25  ;;  %v6813_v38 = vld [vmem:[#allocation91_spill] sm:$0xff] }
 0x5bb   :  { %2903 = vmatpush.bf16.msrb.mxu0 %v6759_v4 }
 0x5bc   :  { %3097 = vmatpush.bf16.msra.mxu1 %v6757_v5  ;;  %3123 = vmatpush.bf16.msra.mxu3 %v6758_v57 }
 0x5bd   :  { %2929 = vmatpush.bf16.msrb.mxu2 %v6760_v58 }
 0x5be   :  { %2904 = vmatmul.bf16.vlgmr.msrb.gmra.mxu0 %v2790_v11 }
 0x5bf   :  { %3080 = vmatpush.bf16.msra.mxu0 %v6761_v31 }
 0x5c0   :  { %3098 = vmatpush.bf16.msra.mxu1 %v6763_v22  ;;  %3124 = vmatpush.bf16.msra.mxu3 %v6764_v19 }
 0x5c1   :  { %3106 = vmatpush.bf16.msra.mxu2 %v6762_v3  ;;  %v6815_v3 = vld [vmem:[#allocation121_spill] sm:$0xff] }
 0x5c2   :  { %2930 = vmatmul.bf16.vlgmr.msrb.gmra.mxu2 %v2790_v11  ;;  %v6811_v11 = vld [vmem:[#allocation86_spill] sm:$0xff] }
 0x5c3   :  { %3081 = vmatpush.bf16.msra.mxu0 %v6765_v14 }
 0x5c4   :  { %3099 = vmatpush.bf16.msra.mxu1 %v6767_v56  ;;  %3125 = vmatpush.bf16.msra.mxu3 %v6768_v55 }
 0x5c5   :  { %3107 = vmatpush.bf16.msra.mxu2 %v6766_v35 }
 0x5c7   :  { %3082 = vmatpush.bf16.msra.mxu0 %v6769_v40  ;;  %v6816_v40 = vld [vmem:[#allocation122_spill] sm:$0xff] }
 0x5c8   :  { %3100 = vmatpush.bf16.msra.mxu1 %v6771_v18  ;;  %3126 = vmatpush.bf16.msra.mxu3 %v6772_v45 }
 0x5c9   :  { %3108 = vmatpush.bf16.msra.mxu2 %v6770_v48 }
 0x5cb   :  { %3083 = vmatpush.bf16.msra.mxu0 %v6775_v28  ;;  %v6817_v28 = vld [vmem:[#allocation71_spill] sm:$0xff] }
 0x5cc   :  { %3145 = vmatpush.bf16.msrb.mxu1 %v6773_v7  ;;  %3171 = vmatpush.bf16.msrb.mxu3 %v6774_v59 }
 0x5cd   :  { %3109 = vmatpush.bf16.msra.mxu2 %v6776_v6  ;;  %v6818_v6 = vld [vmem:[#allocation107_spill] sm:$0xff] }
 0x5cf   :  { %3084 = vmatpush.bf16.msra.mxu0 %v6779_v63 }
 0x5d0   :  { %3146 = vmatpush.bf16.msrb.mxu1 %v6777_v54  ;;  %3172 = vmatpush.bf16.msrb.mxu3 %v6778_v34  ;;  %v354_v54 = vadd.f32 %v6818_v6, %v6817_v28 }
 0x5d1   :  { %3110 = vmatpush.bf16.msra.mxu2 %v6780_v50 }
 0x5d3   :  { %3085 = vmatpush.bf16.msra.mxu0 %v6783_v33 }
 0x5d4   :  { %3147 = vmatpush.bf16.msrb.mxu1 %v6781_v26  ;;  %3173 = vmatpush.bf16.msrb.mxu3 %v6782_v37 }
 0x5d5   :  { %3111 = vmatpush.bf16.msra.mxu2 %v6784_v52 }
 0x5d7   :  { %3086 = vmatpush.bf16.msra.mxu0 %v6787_v41 }
 0x5d8   :  { %3148 = vmatpush.bf16.msrb.mxu1 %v6785_v62  ;;  %3174 = vmatpush.bf16.msrb.mxu3 %v6786_v46 }
 0x5d9   :  { %3112 = vmatpush.bf16.msra.mxu2 %v6788_v13  ;;  %v6819_v13 = vld [vmem:[#allocation80_spill] sm:$0xff] }
 0x5db   :  { %3087 = vmatpush.bf16.msra.mxu0 %v6791_v1 }
 0x5dc   :  { %3149 = vmatpush.bf16.msrb.mxu1 %v6789_v49  ;;  %3175 = vmatpush.bf16.msrb.mxu3 %v6790_v16  ;;  %v6820_v49 = vld [vmem:[#allocation108_spill] sm:$0xff] }
 0x5dd   :  { %3113 = vmatpush.bf16.msra.mxu2 %v6792_v2  ;;  %v412_v16 = vadd.f32 %v6820_v49, %v6819_v13 }
 0x5df   :  { %3132 = vmatpush.bf16.msrb.mxu0 %v6793_v21 }
 0x5e0   :  { %3150 = vmatpush.bf16.msrb.mxu1 %v6795_v43  ;;  %3176 = vmatpush.bf16.msrb.mxu3 %v6796_v24 }
 0x5e1   :  { %3158 = vmatpush.bf16.msrb.mxu2 %v6794_v47 }
 0x5e3   :  { %3133 = vmatpush.bf16.msrb.mxu0 %v6797_v44 }
 0x5e4   :  { %3151 = vmatpush.bf16.msrb.mxu1 %v6799_v17  ;;  %3177 = vmatpush.bf16.msrb.mxu3 %v6800_v20 }
 0x5e5   :  { %3159 = vmatpush.bf16.msrb.mxu2 %v6798_v42 }
 0x5e7   :  { %3134 = vmatpush.bf16.msrb.mxu0 %v6801_v61 }
 0x5e8   :  { %3152 = vmatpush.bf16.msrb.mxu1 %v6803_v29  ;;  %3178 = vmatpush.bf16.msrb.mxu3 %v6804_v36 }
 0x5e9   :  { %3160 = vmatpush.bf16.msrb.mxu2 %v6802_v9 }
 0x5eb   :  { %3135 = vmatpush.bf16.msrb.mxu0 %v6805_v39 }
 0x5ed   :  { %3161 = vmatpush.bf16.msrb.mxu2 %v6806_v12 }
 0x5ef   :  { %3136 = vmatpush.bf16.msrb.mxu0 %v6807_v51 }
 0x5f1   :  { %3162 = vmatpush.bf16.msrb.mxu2 %v6808_v60 }
 0x5f3   :  { %3137 = vmatpush.bf16.msrb.mxu0 %v6809_v53 }
 0x5f5   :  { %3163 = vmatpush.bf16.msrb.mxu2 %v6810_v15  ;;  %v6821_v15 = vld [vmem:[#allocation119_spill] sm:$0xff] }
 0x5f7   :  { %3138 = vmatpush.bf16.msrb.mxu0 %v6811_v11  ;;  %v325_v11 = vadd.f32 %v6821_v15, %v6444_v8 }
 0x5f9   :  { %3164 = vmatpush.bf16.msrb.mxu2 %v6812_v32 }
 0x5fb   :  { %3139 = vmatpush.bf16.msrb.mxu0 %v6813_v38 }
 0x5fd   :  { %3165 = vmatpush.bf16.msrb.mxu2 %v6814_v10 }
 0x608   :  { %v2814_v25 = vpop.f32.mrf.mxu1 }
 0x60e   :  { %v2840_v5 = vpop.f32.mrf.mxu3 }
 0x610   :  { %v2816_v57 = vpop.f32.mrf.mxu1 }
 0x616   :  { %v2842_v4 = vpop.f32.mrf.mxu3 }
 0x618   :  { %v2866_v58 = vpop.f32.mrf.mxu1 }
 0x61b   :  { %v2801_v31 = vpop.f32.mrf.mxu0 }
 0x61c   :  { %v2802_v22 = vadd.f32 %v2801_v31, %v6815_v3 }
 0x61e   :  { %v2815_v19 = vadd.f32 %v2814_v25, %v2802_v22  ;;  %v2892_v14 = vpop.f32.mrf.mxu3 }
 0x620   :  { %v3837_v35 = vmul.f32 -1.442695, %v2815_v19  ;;  %v2868_v56 = vpop.f32.mrf.mxu1 }
 0x621   :  { %v2827_v55 = vpop.f32.mrf.mxu2 }
 0x622   :  { %4190 = vpow2.f32 %v3837_v35  ;;  %v2828_v48 = vadd.f32 %v2827_v55, %v6816_v40 }
 0x623   :  { %v2803_v18 = vpop.f32.mrf.mxu0 }
 0x624   :  { %v2841_v45 = vadd.f32 %v2840_v5, %v2828_v48 }
 0x626   :  { %v3838_v7 = vmul.f32 -1.442695, %v2841_v45  ;;  %v2894_v59 = vpop.f32.mrf.mxu3 }
 0x628   :  { %v4191_v34 = vpop.eup %4190  ;;  %4192 = vpow2.f32 %v3838_v7  ;;  %v2918_v63 = vpop.f32.mrf.mxu1 }
 0x629   :  { %v5979_v50 = vadd.f32 1.0, %v4191_v34  ;;  %v2949_v26 = vadd.f32 %v2918_v63, %v354_v54  ;;  %v2829_v37 = vpop.f32.mrf.mxu2 }
 0x62b   :  { %4194 = vrcp.f32 %v5979_v50  ;;  %v3835_v33 = vmul.f32 -1.442695, %v2949_v26  ;;  %v2853_v52 = vpop.f32.mrf.mxu0  ;;  %vm3024_vm14 = vweird.f32 %v5979_v50  ;;  %v3030_v22 = vand.u32 2147483648, %v5979_v50 }
 0x62c   :  { %v2854_v61 = vadd.f32 %v2853_v52, %v6443_v0 }
 0x62d   :  { %4196 = vpow2.f32 %v3835_v33  ;;  %v3031_v59 = vor.u32 1.1754944e-38, %v3030_v22 }
 0x62e   :  { %v4193_v62 = vpop.eup %4192  ;;  %v2867_v38 = vadd.f32 %v2866_v58, %v2854_v61  ;;  %v3028_v58 = vand.u32 2147483647, %v5979_v50 }
 0x62f   :  { %v3037_v46 = vadd.f32 1.0, %v4193_v62 }
 0x630   :  { %v2944_v41 = vpop.f32.mrf.mxu3  ;;  %v2920_v1 = vpop.f32.mrf.mxu1  ;;  %vm3029_vm3 = vcmp.eq.f32.partialorder %v3028_v58, 8.507059e+37 }
 0x631   :  { %v4195_v2 = vpop.eup %4194  ;;  %4198 = vrcp.f32 %v3037_v46  ;;  %v2879_v21 = vpop.f32.mrf.mxu2  ;;  %v2951_v43 = vadd.f32 %v2944_v41, %v412_v16  ;;  %v3049_v10 = vand.u32 2147483648, %v3037_v46  ;;  %v3047_v25 = vand.u32 2147483647, %v3037_v46 }
 0x632   :  { %v3020_v47 = vmul.f32 %v4195_v2, %v5979_v50  ;;  %v2880_v24 = vadd.f32 %v2879_v21, %v5016_v27  ;;  %vm3025_vm12 = vweird.f32 %v4195_v2  ;;  %vm3043_vm15 = vweird.f32 %v3037_v46  ;;  %v6824_v21 = vld [vmem:[#allocation89_spill] sm:$0xff] }
 0x633   :  { %v2855_v44 = vpop.f32.mrf.mxu0  ;;  %v4197_v42 = vpop.eup %4196  ;;  %v3836_v9 = vmul.f32 -1.442695, %v2951_v43  ;;  %vm5994_vm0 = vmor %vm3024_vm14, %vm3025_vm12  ;;  %v3050_v56 = vor.u32 1.1754944e-38, %v3049_v10  ;;  %vm3048_vm2 = vcmp.eq.f32.partialorder %v3047_v25, 8.507059e+37 }
 0x634   :  { %v3021_v17 = vsub.f32 1.0, %v3020_v47  ;;  %v2893_v20 = vadd.f32 %v2892_v14, %v2880_v24  ;;  %v5987_v36 = vadd.f32 1.0, %v4197_v42  ;;  %v6825_v47 = vld [vmem:[#allocation120_spill] sm:$0xff] }
 0x635   :  { %v383_v43 = vadd.f32 %v6825_v47, %v6824_v21 }
 0x636   :  { %v3839_v39 = vmul.f32 -1.442695, %v2893_v20  ;;  %v3022_v60 = vmul.f32 %v4195_v2, %v3021_v17  ;;  %vm2980_vm9 = vweird.f32 %v5987_v36 }
 0x637   :  { %v4199_v29 = vpop.eup %4198 }
 0x638   :  { %v2946_v12 = vpop.f32.mrf.mxu3  ;;  %v3039_v51 = vmul.f32 %v4199_v29, %v3037_v46  ;;  %4200 = vpow2.f32 %v3839_v39  ;;  %vm3044_vm13 = vweird.f32 %v4199_v29  ;;  %v3023_v4 = vadd.f32 %v4195_v2, %v3022_v60 }
 0x639   :  { %v2881_v53 = vpop.f32.mrf.mxu2  ;;  %4202 = vpow2.f32 %v3836_v9  ;;  %vm3045_vm1 = vmor %vm3043_vm15, %vm3044_vm13  ;;  %v2986_v12 = vand.u32 2147483648, %v5987_v36 }
 0x63a   :  { %v3040_v32 = vsub.f32 1.0, %v3039_v51  ;;  %4204 = vrcp.f32 %v5987_v36  ;;  %v3027_v48 = vsel %vm5994_vm0, %v4195_v2, %v3023_v4 }
 0x63b   :  { %v2905_v5 = vpop.f32.mrf.mxu0  ;;  %4206 = vtanh.f32 %v2867_v38  ;;  %v3032_v54 = vsel %vm3029_vm3, %v3031_v59, %v3027_v48 }
 0x63c   :  { %v3041_v57 = vmul.f32 %v4199_v29, %v3040_v32  ;;  %v2948_v31 = vadd.f32 %v2905_v5, %v325_v11  ;;  %v2984_v11 = vand.u32 2147483647, %v5987_v36 }
 0x63e   :  { %v3042_v19 = vadd.f32 %v4199_v29, %v3041_v57  ;;  %v3834_v14 = vmul.f32 -1.442695, %v2948_v31  ;;  %v4201_v35 = vpop.eup %4200  ;;  %v2987_v31 = vor.u32 1.1754944e-38, %v2986_v12  ;;  %vm2985_vm13 = vcmp.eq.f32.partialorder %v2984_v11, 8.507059e+37 }
 0x63f   :  { %v4203_v55 = vpop.eup %4202  ;;  %v3057_v45 = vadd.f32 1.0, %v4201_v35 }
 0x640   :  { %v3046_v18 = vsel %vm3045_vm1, %v4199_v29, %v3042_v19  ;;  %4208 = vpow2.f32 %v3834_v14  ;;  %v6001_v7 = vpop.eup %4204  ;;  %v6006_v26 = vadd.f32 1.0, %v4203_v55 }
 0x641   :  { %v3051_v28 = vsel %vm3048_vm2, %v3050_v56, %v3046_v18  ;;  %4210 = vrcp.f32 %v3057_v45  ;;  %v2976_v63 = vmul.f32 %v6001_v7, %v5987_v36  ;;  %v4207_v37 = vpop.eup %4206  ;;  %v3067_v44 = vand.u32 2147483647, %v3057_v45 }
 0x642   :  { %v3073_v50 = vmul.f32 %v3051_v28, %v5845_v30  ;;  %v3074_v52 = vmul.f32 %v4207_v37, %v3032_v54  ;;  %4212 = vrcp.f32 %v6006_v26  ;;  %v3069_v30 = vand.u32 2147483648, %v3057_v45 }
 0x643   :  { %v2907_v34 = vpop.f32.mrf.mxu0  ;;  %v2977_v41 = vsub.f32 1.0, %v2976_v63  ;;  %vm3063_vm5 = vweird.f32 %v3057_v45  ;;  %vm2981_vm6 = vweird.f32 %v6001_v7  ;;  %vm3068_vm8 = vcmp.eq.f32.partialorder %v3067_v44, 8.507059e+37 }
 0x644   :  { %v6008_v13 = vadd.f32 %v3074_v52, %v3073_v50  ;;  %v3070_v39 = vor.u32 1.1754944e-38, %v3069_v30  ;;  %vm6021_vm10 = vmor %vm2980_vm9, %vm2981_vm6  ;;  %v3006_v59 = vand.u32 2147483648, %v6006_v26  ;;  %vm3000_vm1 = vweird.f32 %v6006_v26 }
 0x645   :  { %v2931_v6 = vpop.f32.mrf.mxu2  ;;  %v2978_v2 = vmul.f32 %v6001_v7, %v2977_v41  ;;  %v3004_v28 = vand.u32 2147483647, %v6006_v26 }
 0x646   :  { %v4209_v33 = vpop.eup %4208  ;;  %v2950_v20 = vadd.f32 %v2931_v6, %v383_v43  ;;  %v3007_v54 = vor.u32 1.1754944e-38, %v3006_v59 }
 0x647   :  { %v2955_v62 = vadd.f32 1.0, %v4209_v33  ;;  %v4211_v46 = vpop.eup %4210  ;;  %v2979_v29 = vadd.f32 %v6001_v7, %v2978_v2  ;;  %vm3005_vm3 = vcmp.eq.f32.partialorder %v3004_v28, 8.507059e+37 }
 0x648   :  { %v3059_v49 = vmul.f32 %v4211_v46, %v3057_v45  ;;  %vm3064_vm4 = vweird.f32 %v4211_v46  ;;  %v4213_v42 = vpop.eup %4212 }
 0x649   :  { %4214 = vrcp.f32 %v2955_v62  ;;  %vm3065_vm7 = vmor %vm3063_vm5, %vm3064_vm4  ;;  %v2996_v51 = vmul.f32 %v4213_v42, %v6006_v26  ;;  %v2967_v10 = vand.u32 2147483648, %v2955_v62  ;;  %v2965_v57 = vand.u32 2147483647, %v2955_v62 }
 0x64a   :  { %v3060_v1 = vsub.f32 1.0, %v3059_v49  ;;  %4216 = vtanh.f32 %v6008_v13  ;;  %v2983_v4 = vsel %vm6021_vm10, %v6001_v7, %v2979_v29  ;;  %vm2961_vm12 = vweird.f32 %v2955_v62 }
 0x64b   :  { %4218 = vtanh.f32 %v2950_v20  ;;  %v2997_v22 = vsub.f32 1.0, %v2996_v51  ;;  %v2968_v36 = vor.u32 1.1754944e-38, %v2967_v10  ;;  %v2988_v19 = vsel %vm2985_vm13, %v2987_v31, %v2983_v4 }
 0x64c   :  { %v3061_v24 = vmul.f32 %v4211_v46, %v3060_v1  ;;  %vm2966_vm15 = vcmp.eq.f32.partialorder %v2965_v57, 8.507059e+37  ;;  %v3010_v48 = vmul.f32 %v2988_v19, %v5874_v23  ;;  %vm3001_vm0 = vweird.f32 %v4213_v42 }
 0x64d   :  { %v2933_v16 = vpop.f32.mrf.mxu2  ;;  %v2998_v56 = vmul.f32 %v4213_v42, %v2997_v22  ;;  %vm3002_vm2 = vmor %vm3000_vm1, %vm3001_vm0  ;;  %vm3259_vm0 = vcmask 7168  }
 0x64e   :  { %v3062_v61 = vadd.f32 %v4211_v46, %v3061_v24 }
 0x64f   :  { %v4215_v17 = vpop.eup %4214  ;;  %v2999_v7 = vadd.f32 %v4213_v42, %v2998_v56 }
 0x650   :  { %v2957_v9 = vmul.f32 %v4215_v17, %v2955_v62  ;;  %v3066_v60 = vsel %vm3065_vm7, %v4211_v46, %v3062_v61  ;;  %v4217_v53 = vpop.eup %4216  ;;  %vm2962_vm11 = vweird.f32 %v4215_v17 }
 0x651   :  { %v3071_v32 = vsel %vm3068_vm8, %v3070_v39, %v3066_v60  ;;  %vm2963_vm14 = vmor %vm2961_vm12, %vm2962_vm11  ;;  %v4219_v35 = vpop.eup %4218  ;;  %v3003_v6 = vsel %vm3002_vm2, %v4213_v42, %v2999_v7 }
 0x652   :  { %v2958_v15 = vsub.f32 1.0, %v2957_v9  ;;  %v3077_v25 = vmul.f32 %v4217_v53, %v3071_v32  ;;  %v3008_v63 = vsel %vm3005_vm3, %v3007_v54, %v3003_v6 }
 0x654   :  { %v2959_v5 = vmul.f32 %v4215_v17, %v2958_v15  ;;  %v3079_v8 = vpack.c.bf16 %v3077_v25, %v3077_v25 }
 0x656   :  { %v2960_v58 = vadd.f32 %v4215_v17, %v2959_v5  ;;  %3101 = vmatmul.bf16.vlgmr.msra.gmra.mxu1 %v3079_v8  ;;  %3127 = vmatmul.bf16.vlgmr.msra.gmra.mxu3 %v3079_v8 }
 0x658   :  { %v2964_v14 = vsel %vm2963_vm14, %v4215_v17, %v2960_v58 }
 0x659   :  { %v2969_v55 = vsel %vm2966_vm15, %v2968_v36, %v2964_v14 }
 0x65a   :  { %v3011_v18 = vmul.f32 %v4219_v35, %v2969_v55 }
 0x65c   :  { %v3012_v45 = vadd.f32 %v3011_v18, %v3010_v48 }
 0x65e   :  { %4220 = vtanh.f32 %v3012_v45 }
 0x664   :  { %v4221_v34 = vpop.eup %4220 }
 0x665   :  { %v3014_v50 = vmul.f32 %v4221_v34, %v3008_v63 }
 0x666   :  { %3153 = vmatmul.bf16.vlgmr.msrb.gmra.mxu1 %v3079_v8  ;;  %3179 = vmatmul.bf16.vlgmr.msrb.gmra.mxu3 %v3079_v8 }
 0x667   :  { %v3078_v23 = vpack.c.bf16 %v3014_v50, %v3014_v50 }
 0x669   :  { %3088 = vmatmul.bf16.vlgmr.msra.gmra.mxu0 %v3078_v23  ;;  %3114 = vmatmul.bf16.vlgmr.msra.gmra.mxu2 %v3078_v23 }
 0x679   :  { %3140 = vmatmul.bf16.vlgmr.msrb.gmra.mxu0 %v3078_v23  ;;  %3166 = vmatmul.bf16.vlgmr.msrb.gmra.mxu2 %v3078_v23 }
 0x6d3   :  { %v3102_v37 = vpop.f32.mrf.mxu1 }
 0x6d9   :  { %v3128_v33 = vpop.f32.mrf.mxu3 }
 0x6db   :  { %v3104_v52 = vpop.f32.mrf.mxu1 }
 0x6e1   :  { %v3130_v62 = vpop.f32.mrf.mxu3 }
 0x6e3   :  { %v3154_v46 = vpop.f32.mrf.mxu1 }
 0x6e6   :  { %v3089_v26 = vpop.f32.mrf.mxu0 }
 0x6e7   :  { %v3090_v41 = vadd.f32 %v3089_v26, %v6815_v3 }
 0x6e9   :  { %v3103_v49 = vadd.f32 %v3102_v37, %v3090_v41  ;;  %v3180_v16 = vpop.f32.mrf.mxu3 }
 0x6eb   :  { %v3840_v1 = vmul.f32 -1.442695, %v3103_v49  ;;  %v3156_v2 = vpop.f32.mrf.mxu1  ;;  %v3981_v49 = vld [vmem:[#allocation2] ss:$0 sm:$0xff] }
 0x6ec   :  { %v3115_v30 = vpop.f32.mrf.mxu2 }
 0x6ed   :  { %4222 = vpow2.f32 %v3840_v1  ;;  %v3116_v21 = vadd.f32 %v3115_v30, %v6816_v40 }
 0x6ee   :  { %v3091_v47 = vpop.f32.mrf.mxu0 }
 0x6ef   :  { %v3129_v43 = vadd.f32 %v3128_v33, %v3116_v21 }
 0x6f1   :  { %v3841_v24 = vmul.f32 -1.442695, %v3129_v43  ;;  %v3182_v44 = vpop.f32.mrf.mxu3 }
 0x6f3   :  { %v4223_v42 = vpop.eup %4222  ;;  %4224 = vpow2.f32 %v3841_v24 }
 0x6f4   :  { %v3187_v17 = vadd.f32 1.0, %v4223_v42  ;;  %v3117_v20 = vpop.f32.mrf.mxu2 }
 0x6f6   :  { %4226 = vrcp.f32 %v3187_v17  ;;  %v3141_v61 = vpop.f32.mrf.mxu0  ;;  %v3199_v8 = vand.u32 2147483648, %v3187_v17  ;;  %vm3193_vm6 = vweird.f32 %v3187_v17  ;;  %v3197_v58 = vand.u32 2147483647, %v3187_v17 }
 0x6f7   :  { %v3142_v15 = vadd.f32 %v3141_v61, %v6443_v0 }
 0x6f8   :  { %v3200_v56 = vor.u32 1.1754944e-38, %v3199_v8  ;;  %vm3198_vm11 = vcmp.eq.f32.partialorder %v3197_v58, 8.507059e+37 }
 0x6f9   :  { %v4225_v9 = vpop.eup %4224  ;;  %v3155_v57 = vadd.f32 %v3154_v46, %v3142_v15 }
 0x6fa   :  { %v3206_v3 = vadd.f32 1.0, %v4225_v9 }
 0x6fc   :  { %v4227_v29 = vpop.eup %4226  ;;  %4228 = vrcp.f32 %v3206_v3  ;;  %v3167_v39 = vpop.f32.mrf.mxu2  ;;  %v3218_v31 = vand.u32 2147483648, %v3206_v3  ;;  %vm3212_vm7 = vweird.f32 %v3206_v3 }
 0x6fd   :  { %v3189_v12 = vmul.f32 %v4227_v29, %v3187_v17  ;;  %v3168_v51 = vadd.f32 %v3167_v39, %v5016_v27  ;;  %vm3194_vm4 = vweird.f32 %v4227_v29  ;;  %v3216_v27 = vand.u32 2147483647, %v3206_v3 }
 0x6fe   :  { %v3143_v60 = vpop.f32.mrf.mxu0  ;;  %vm3195_vm8 = vmor %vm3193_vm6, %vm3194_vm4  ;;  %v3219_v35 = vor.u32 1.1754944e-38, %v3218_v31 }
 0x6ff   :  { %v3190_v40 = vsub.f32 1.0, %v3189_v12  ;;  %v3181_v53 = vadd.f32 %v3180_v16, %v3168_v51  ;;  %vm3217_vm10 = vcmp.eq.f32.partialorder %v3216_v27, 8.507059e+37 }
 0x701   :  { %v3842_v11 = vmul.f32 -1.442695, %v3181_v53  ;;  %v3191_v38 = vmul.f32 %v4227_v29, %v3190_v40 }
 0x702   :  { %v4229_v32 = vpop.eup %4228 }
 0x703   :  { %v3208_v10 = vmul.f32 %v4229_v32, %v3206_v3  ;;  %4230 = vpow2.f32 %v3842_v11  ;;  %v3192_v4 = vadd.f32 %v4227_v29, %v3191_v38  ;;  %vm3213_vm5 = vweird.f32 %v4229_v32 }
 0x704   :  { %v3169_v25 = vpop.f32.mrf.mxu2  ;;  %4232 = vtanh.f32 %v3155_v57  ;;  %vm3214_vm9 = vmor %vm3212_vm7, %vm3213_vm5 }
 0x705   :  { %v3209_v5 = vsub.f32 1.0, %v3208_v10  ;;  %v3196_v19 = vsel %vm3195_vm8, %v4227_v29, %v3192_v4 }
 0x706   :  { %v3201_v18 = vsel %vm3198_vm11, %v3200_v56, %v3196_v19 }
 0x707   :  { %v3210_v22 = vmul.f32 %v4229_v32, %v3209_v5 }
 0x709   :  { %v4231_v36 = vpop.eup %4230  ;;  %v3211_v0 = vadd.f32 %v4229_v32, %v3210_v22 }
 0x70a   :  { %v3226_v14 = vadd.f32 1.0, %v4231_v36  ;;  %v4233_v7 = vpop.eup %4232 }
 0x70b   :  { %v3215_v55 = vsel %vm3214_vm9, %v4229_v32, %v3211_v0  ;;  %v3243_v59 = vmul.f32 %v4233_v7, %v3201_v18 }
 0x70c   :  { %4234 = vrcp.f32 %v3226_v14  ;;  %v3220_v48 = vsel %vm3217_vm10, %v3219_v35, %v3215_v55  ;;  %v3238_v63 = vand.u32 2147483648, %v3226_v14  ;;  %v3236_v23 = vand.u32 2147483647, %v3226_v14 }
 0x70d   :  { %v3242_v45 = vmul.f32 %v3220_v48, %v6008_v13  ;;  %vm3232_vm13 = vweird.f32 %v3226_v14  ;;  %v3980_v13 = vld [vmem:[%s6049_s6] ss:$0 sm:$0xff] }
 0x70e   :  { %v3239_v33 = vor.u32 1.1754944e-38, %v3238_v63  ;;  %vm3237_vm15 = vcmp.eq.f32.partialorder %v3236_v23, 8.507059e+37 }
 0x70f   :  { %v3244_v6 = vadd.f32 %v3243_v59, %v3242_v45 }
 0x711   :  { %4236 = vtanh.f32 %v3244_v6 }
 0x712   :  { %v4235_v28 = vpop.eup %4234 }
 0x713   :  { %v3228_v54 = vmul.f32 %v4235_v28, %v3226_v14  ;;  %vm3233_vm12 = vweird.f32 %v4235_v28 }
 0x714   :  { %vm3234_vm14 = vmor %vm3232_vm13, %vm3233_vm12 }
 0x715   :  { %v3229_v34 = vsub.f32 1.0, %v3228_v54 }
 0x717   :  { %v3230_v50 = vmul.f32 %v4235_v28, %v3229_v34  ;;  %v4237_v62 = vpop.eup %4236 }
 0x719   :  { %v3231_v37 = vadd.f32 %v4235_v28, %v3230_v50 }
 0x71b   :  { %v3235_v52 = vsel %vm3234_vm14, %v4235_v28, %v3231_v37 }
 0x71c   :  { %v3240_v46 = vsel %vm3237_vm15, %v3239_v33, %v3235_v52 }
 0x71d   :  { %v3246_v26 = vmul.f32 %v4237_v62, %v3240_v46 }
 0x71f   :  { %v3251_v41 = vmul.f32 %v3980_v13, %v3246_v26 }
 0x721   :  { %3252 = vadd.xlane.f32.xlu0 %v3251_v41 }
 0x794   :  { %v3253_v16 = vpop.xlane.xlu0 %3252 }
 0x795   :  { %v3258_v1 = vadd.f32 %v3981_v49, %v3253_v16 }
 0x797   :  { %3260 = vst.msk [vmem:[%s6051_s8] sm:$0xff] %vm3259_vm0, %v3258_v1 }
 0x798   :  { %3265 = vsyncpa [#allocation4], 1 }
 0x799   :  { %3266 = vsyncpa [#allocation6], 1 }

</bundles_post_ra>
